<compile_context>
chip_gen: v6e
topology: v6e:2x2x1
jax: 0.10.0
libtpu: 0.0.40
codegen_flags: <defaults>
</compile_context>

<pallas_src>
import functools

import jax
import jax.numpy as jnp
from jax.experimental import pallas as pl
from jax.experimental.pallas import tpu as pltpu

_LANE = 128


def _dwconvnex_kernel(pad, eps, neg_slope, K, TH, c_true,
                      xpad_hbm, dww_ref, dwb_ref, g_ref, beta_ref,
                      w1_ref, b1_ref, w2_ref, b2_ref,
                      out_ref, hbuf, dsem):
    # xpad_hbm: (N, Hp, Wp, Cp) spatially + channel padded input, left in HBM
    # out_ref : (1, TH, W, Cp)  one row tile of the output
    # hbuf    : (2, TH+K-1, Wp, Cp) double-buffered halo'd row-tile scratch
    _, _, W, Cp = out_ref.shape
    TH2 = TH + K - 1
    n = pl.program_id(0)
    t = pl.program_id(1)
    T = pl.num_programs(1)
    slot = t % 2

    def tile_copy(t_idx, slot_idx):
        row0 = pl.multiple_of(t_idx * TH, TH)
        return pltpu.make_async_copy(
            xpad_hbm.at[n, pl.ds(row0, TH2)],      # (TH2, Wp, Cp) in HBM
            hbuf.at[slot_idx],                     # (TH2, Wp, Cp) in VMEM
            dsem.at[slot_idx])

    # First row tile of each batch element: blocking fetch into this slot.
    @pl.when(t == 0)
    def _():
        tile_copy(t, slot).start()

    tile_copy(t, slot).wait()

    # Prefetch the next row tile of the same batch element into the other slot
    # (row-tile axis is sequential per core, so this is always waited next step).
    @pl.when(t + 1 < T)
    def _():
        tile_copy(t + 1, 1 - slot).start()

    cur = hbuf.at[slot]

    # ---- depthwise conv (groups == C, stride 1): per-tap loads from the halo
    # tile; the centre tap doubles as the residual. ----------------------------
    # TODO(synk): generate the kw taps with pltpu.roll over a full-Wp slab if
    # the MLIR dump shows these W-offset slices lowering to relayout copies.
    dww = dww_ref[...]                               # (K*K, Cp) f32
    acc = jnp.zeros((TH, W, Cp), jnp.float32)
    x_res = None
    for kh in range(K):
        for kw in range(K):
            patch = cur[kh:kh + TH, kw:kw + W, :].astype(jnp.float32)
            if kh == pad and kw == pad:
                x_res = patch                        # == x for these output rows
            acc = acc + patch * dww[kh * K + kw]
    acc = acc + dwb_ref[...]

    # ---- LayerNorm over channels.  Padded lanes of acc are exactly 0 and the
    # sums divide by the true C, so they do not perturb mean/var. -------------
    inv_c = 1.0 / c_true
    mean = jnp.sum(acc, axis=-1, keepdims=True) * inv_c
    var = jnp.sum(acc * acc, axis=-1, keepdims=True) * inv_c - mean * mean
    var = jnp.maximum(var, 0.0)                      # single-pass cancellation guard
    yn = (acc - mean) * jax.lax.rsqrt(var + eps)
    yn = yn * g_ref[...] + beta_ref[...]

    # ---- 1x1 conv (C -> 4C), LeakyReLU, 1x1 conv (4C -> C): bf16 on the MXU,
    # f32 accumulation, biases added in f32. -----------------------------------
    yn2 = yn.reshape(TH * W, Cp).astype(jnp.bfloat16)
    h1 = jnp.dot(yn2, w1_ref[...], preferred_element_type=jnp.float32)
    h1 = h1 + b1_ref[...]
    h1 = jnp.where(h1 >= 0, h1, neg_slope * h1)      # LeakyReLU(0.01)
    h2 = jnp.dot(h1.astype(jnp.bfloat16), w2_ref[...],
                 preferred_element_type=jnp.float32)
    h2 = h2 + b2_ref[...]

    out = h2.reshape(TH, W, Cp) + x_res
    out_ref[0] = out.astype(out_ref.dtype)


def _divisors_desc(n):
    return [d for d in range(n, 0, -1) if n % d == 0]


def _gen_budgets():
    """Returns (VMEM cap for the kernel, budget for the f32 4x-expansion tile)."""
    phys = 64 << 20
    try:
        phys = int(pltpu.get_tpu_info().vmem_capacity_bytes)
    except Exception:
        pass
    if phys >= (96 << 20):            # v5e / v6e class: 128 MiB physical VMEM
        return 100 << 20, 12 << 20
    return 48 << 20, 5 << 20          # v7x class: 64 MiB physical VMEM


def _vmem_estimate(TH, K, W, Wp, Cp, x_isz, out_isz):
    """Generous per-step VMEM footprint estimate (bytes)."""
    f32, bf16 = 4, 2
    TH2 = TH + K - 1
    halo = 2 * TH2 * Wp * Cp * x_isz                  # double-buffered halo tile
    out_blk = 2 * TH * W * Cp * out_isz               # double-buffered output
    weights = 2 * ((K * K + 8) * Cp * f32 + 4 * Cp * f32
                   + 2 * 4 * Cp * Cp * bf16)          # worst case: double-buffered
    interm = 8 * TH * W * Cp * f32 + 3 * TH * W * 4 * Cp * f32
    return halo + out_blk + weights + interm


def _choose_tile_h(H, W, K, Wp, Cp, x_isz, out_isz, vmem_cap, h1_budget,
                   requested=None):
    divs = _divisors_desc(H)
    if requested is not None:
        req = max(1, min(int(requested), H))
        divs = [d for d in divs if d <= req]

    def fits_cap(th):
        return _vmem_estimate(th, K, W, Wp, Cp, x_isz, out_isz) <= vmem_cap

    if requested is None:
        # Prefer tiles whose row count feeds the MXU M dim in 256-multiples.
        for th in divs:
            if (th * W) % 256 == 0 and th * W * 4 * Cp * 4 <= h1_budget and fits_cap(th):
                return th
        for th in divs:
            if th * W * 4 * Cp * 4 <= h1_budget and fits_cap(th):
                return th
    for th in divs:
        if fits_cap(th):
            return th
    raise ValueError(
        "DWConvNeX row tile does not fit in VMEM even at tile_h=1; "
        f"W={W}, padded C={Cp} are too large for this TPU generation.")


def dwconvnex(x_nchw, params, kernel_size, stride=1, padding=0,
              eps=1e-6, neg_slope=0.01, tile_h=None):
    """x_nchw: (N, C, H, W), like the PyTorch module. Returns NCHW."""
    N, C, H, W = x_nchw.shape
    dww, dwb, g, beta, w1, b1, w2, b2 = params
    K = kernel_size

    Hp, Wp = H + 2 * padding, W + 2 * padding
    h_out = (Hp - K) // stride + 1
    w_out = (Wp - K) // stride + 1
    # The residual `y + x` in the PyTorch forward only typechecks for a
    # same-size conv output; enforce that (=> K odd, padding == (K-1)//2).
    assert (h_out, w_out) == (H, W), "residual requires same-size conv output"
    assert stride == 1, "kernel currently supports stride == 1 only"

    # Channels padded to a lane-dense multiple of 128.  Padded weight/gamma/
    # beta entries are zero so padded output channels are exactly 0.
    Cp = ((C + _LANE - 1) // _LANE) * _LANE
    cpad = Cp - C

    # One wrapper-side HBM pass: NCHW -> NHWC plus spatial/channel zero pad.
    # TODO(synk): accept/return NHWC and emit only C output channels (masked
    # store) to remove the remaining transpose / pad / slice HBM passes.
    x_nhwc = jnp.transpose(x_nchw, (0, 2, 3, 1))
    xpad = jnp.pad(x_nhwc, ((0, 0), (padding, padding), (padding, padding),
                            (0, cpad)))

    dww_p = jnp.pad(dww, ((0, 0), (0, cpad)))
    dwb_p = jnp.pad(dwb, ((0, 0), (0, cpad)))
    g_p = jnp.pad(g, ((0, 0), (0, cpad)))
    beta_p = jnp.pad(beta, ((0, 0), (0, cpad)))
    w1_p = jnp.pad(w1, ((0, cpad), (0, 4 * cpad))).astype(jnp.bfloat16)
    b1_p = jnp.pad(b1, ((0, 0), (0, 4 * cpad)))
    w2_p = jnp.pad(w2, ((0, 4 * cpad), (0, cpad))).astype(jnp.bfloat16)
    b2_p = jnp.pad(b2, ((0, 0), (0, cpad)))

    out_dtype = x_nchw.dtype
    x_isz = xpad.dtype.itemsize
    out_isz = jnp.dtype(out_dtype).itemsize

    vmem_cap, h1_budget = _gen_budgets()
    TH = _choose_tile_h(H, W, K, Wp, Cp, x_isz, out_isz, vmem_cap, h1_budget,
                        requested=tile_h)
    T = H // TH

    est = _vmem_estimate(TH, K, W, Wp, Cp, x_isz, out_isz)
    vmem_limit = int(min(max(est * 5 // 4, 32 << 20), vmem_cap))

    def _const_spec(shape):
        idx = lambda n, t, _s=len(shape): (0,) * _s
        try:
            # Constant blocks: single-buffer to halve their VMEM footprint.
            return pl.BlockSpec(shape, idx, pipeline_mode=pl.Buffered(1))
        except Exception:
            return pl.BlockSpec(shape, idx)

    kernel = functools.partial(_dwconvnex_kernel, padding, eps, neg_slope,
                               K, TH, C)

    out_nhwc = pl.pallas_call(
        kernel,
        out_shape=jax.ShapeDtypeStruct((N, H, W, Cp), out_dtype),
        grid_spec=pltpu.PrefetchScalarGridSpec(
            num_scalar_prefetch=0,
            grid=(N, T),
            in_specs=[
                # Padded image stays in HBM; halo'd row tiles are DMA'd
                # manually into a double-buffered VMEM scratch.
                pl.BlockSpec(memory_space=pl.ANY),
                _const_spec((K * K, Cp)),        # depthwise weights (f32)
                _const_spec((1, Cp)),            # depthwise bias
                _const_spec((1, Cp)),            # LN gamma
                _const_spec((1, Cp)),            # LN beta
                _const_spec((Cp, 4 * Cp)),       # 1x1 expand weight (bf16)
                _const_spec((1, 4 * Cp)),        # 1x1 expand bias
                _const_spec((4 * Cp, Cp)),       # 1x1 project weight (bf16)
                _const_spec((1, Cp)),            # 1x1 project bias
            ],
            out_specs=pl.BlockSpec((1, TH, W, Cp), lambda n, t: (n, t, 0, 0)),
            scratch_shapes=[
                pltpu.VMEM((2, TH + K - 1, Wp, Cp), xpad.dtype),
                pltpu.SemaphoreType.DMA((2,)),
            ]),
        compiler_params=pltpu.CompilerParams(
            # Batch axis is parallel (shards across v7x's 2 TensorCores); the
            # row-tile axis stays sequential for the manual prefetch chain.
            dimension_semantics=("parallel", "arbitrary"),
            vmem_limit_bytes=vmem_limit),
    )(xpad, dww_p, dwb_p, g_p, beta_p, w1_p, b1_p, w2_p, b2_p)

    out = out_nhwc[..., :C] if cpad else out_nhwc
    return jnp.transpose(out, (0, 3, 1, 2))                       # back to NCHW


def dwconvnex_reference(x_nchw, params, kernel_size, stride, padding,
                        eps=1e-6, neg_slope=0.01):
    """Pure-JAX f32 reference mirroring the PyTorch forward (for verification)."""
    dww, dwb, g, beta, w1, b1, w2, b2 = params
    N, C, H, W = x_nchw.shape
    x = jnp.transpose(x_nchw, (0, 2, 3, 1))
    rhs = dww.reshape(kernel_size, kernel_size, 1, C)             # HWIO, I/group=1
    y = jax.lax.conv_general_dilated(
        x, rhs, window_strides=(stride, stride),
        padding=((padding, padding), (padding, padding)),
        dimension_numbers=("NHWC", "HWIO", "NHWC"),
        feature_group_count=C) + dwb
    mean = y.mean(-1, keepdims=True)
    var = jnp.square(y - mean).mean(-1, keepdims=True)
    yn = (y - mean) / jnp.sqrt(var + eps) * g + beta
    h1 = yn @ w1 + b1
    h1 = jnp.where(h1 >= 0, h1, neg_slope * h1)
    h2 = h1 @ w2 + b2
    out = h2 + x
    return jnp.transpose(out, (0, 3, 1, 2))


if __name__ == "__main__":
    # Small shapes consistent with the module: N=2, C=4, H=W=16, k=3, pad=1.
    N, C, H, W = 2, 4, 16, 16
    K, STRIDE, PAD = 3, 1, 1

    key = jax.random.PRNGKey(0)
    ks = jax.random.split(key, 9)
    dww = 0.1 * jax.random.normal(ks[0], (K * K, C), jnp.float32)   # depthwise W
    dwb = 0.1 * jax.random.normal(ks[1], (1, C), jnp.float32)       # depthwise b
    g = 1.0 + 0.1 * jax.random.normal(ks[2], (1, C), jnp.float32)   # LN gamma
    beta = 0.1 * jax.random.normal(ks[3], (1, C), jnp.float32)      # LN beta
    w1 = 0.1 * jax.random.normal(ks[4], (C, 4 * C), jnp.float32)    # Pconv0 W^T
    b1 = 0.1 * jax.random.normal(ks[5], (1, 4 * C), jnp.float32)
    w2 = 0.1 * jax.random.normal(ks[6], (4 * C, C), jnp.float32)    # proj W^T
    b2 = 0.1 * jax.random.normal(ks[7], (1, C), jnp.float32)
    params = (dww, dwb, g, beta, w1, b1, w2, b2)

    x = jax.random.normal(ks[8], (N, C, H, W), jnp.float32)

    # tile_h=8 -> 2 row tiles per image; exercises the halo'd double-buffered
    # manual-DMA path (prefetch of the next tile while computing the current).
    out = dwconvnex(x, params, kernel_size=K, stride=STRIDE, padding=PAD,
                    tile_h=8)
    out = jax.block_until_ready(out)

    ref = jax.block_until_ready(dwconvnex_reference(x, params, K, STRIDE, PAD))
    assert out.shape == (N, C, H, W)
    err = float(jnp.max(jnp.abs(out - ref)))
    # bf16 1x1-conv matmuls -> slightly looser tolerance than pure f32.
    assert jnp.allclose(out, ref, atol=1e-2, rtol=1e-2), err

    print("KERNEL_OK")
</pallas_src>

<mosaic_0001>
module attributes {stable_mosaic.version = 11 : i64} {
  func.func @_dwconvnex_kernel(%arg0: i32, %arg1: i32, %arg2: memref<2x18x18x128xf32, #tpu.memory_space<any>>, %arg3: memref<9x128xf32, #tpu.memory_space<vmem>>, %arg4: memref<1x128xf32, #tpu.memory_space<vmem>>, %arg5: memref<1x128xf32, #tpu.memory_space<vmem>>, %arg6: memref<1x128xf32, #tpu.memory_space<vmem>>, %arg7: memref<128x512xbf16, #tpu.memory_space<vmem>>, %arg8: memref<1x512xf32, #tpu.memory_space<vmem>>, %arg9: memref<512x128xbf16, #tpu.memory_space<vmem>>, %arg10: memref<1x128xf32, #tpu.memory_space<vmem>>, %arg11: memref<1x8x16x128xf32, #tpu.memory_space<vmem>>, %arg12: memref<2x10x18x128xf32, #tpu.memory_space<vmem>>, %arg13: memref<2x!tpu.dma_semaphore, #tpu.memory_space<semaphore_mem>>) attributes {dimension_semantics = [#tpu.dimension_semantics<parallel>, #tpu.dimension_semantics<arbitrary>], iteration_bounds = array<i64: 2, 2>, scalar_prefetch = 0 : i64, scratch_operands = 2 : i64, tpu.core_type = #tpu.core_type<tc>, window_params = [{}, {pipeline_mode = #tpu.pipeline_mode<synchronous>, transform_indices = @transform_1, window_bounds = array<i64: 9, 128>}, {pipeline_mode = #tpu.pipeline_mode<synchronous>, transform_indices = @transform_2, window_bounds = array<i64: 1, 128>}, {pipeline_mode = #tpu.pipeline_mode<synchronous>, transform_indices = @transform_3, window_bounds = array<i64: 1, 128>}, {pipeline_mode = #tpu.pipeline_mode<synchronous>, transform_indices = @transform_4, window_bounds = array<i64: 1, 128>}, {pipeline_mode = #tpu.pipeline_mode<synchronous>, transform_indices = @transform_5, window_bounds = array<i64: 128, 512>}, {pipeline_mode = #tpu.pipeline_mode<synchronous>, transform_indices = @transform_6, window_bounds = array<i64: 1, 512>}, {pipeline_mode = #tpu.pipeline_mode<synchronous>, transform_indices = @transform_7, window_bounds = array<i64: 512, 128>}, {pipeline_mode = #tpu.pipeline_mode<synchronous>, transform_indices = @transform_8, window_bounds = array<i64: 1, 128>}, {transform_indices = @transform_9, window_bounds = array<i64: 1, 8, 16, 128>}]} {
    %c2_i32 = arith.constant 2 : i32
    %c0_i32 = arith.constant 0 : i32
    %0 = arith.cmpi eq, %c2_i32, %c0_i32 : i32
    %c1_i32 = arith.constant 1 : i32
    %1 = arith.select %0, %c1_i32, %c2_i32 : i32
    %2 = arith.remsi %arg1, %1 : i32
    %c0_i32_0 = arith.constant 0 : i32
    %3 = arith.cmpi ne, %2, %c0_i32_0 : i32
    %c0_i32_1 = arith.constant 0 : i32
    %4 = arith.cmpi slt, %2, %c0_i32_1 : i32
    %c0_i32_2 = arith.constant 0 : i32
    %5 = arith.cmpi slt, %1, %c0_i32_2 : i32
    %6 = arith.xori %4, %5 : i1
    %7 = arith.andi %6, %3 : i1
    %8 = arith.addi %2, %1 : i32
    %9 = arith.select %7, %8, %2 : i32
    %c0_i32_3 = arith.constant 0 : i32
    %10 = arith.cmpi eq, %arg1, %c0_i32_3 : i32
    %11 = arith.extui %10 : i1 to i32
    %c0_i32_4 = arith.constant 0 : i32
    %12 = arith.cmpi ne, %11, %c0_i32_4 : i32
    scf.if %12 {
      %c8_i32_94 = arith.constant 8 : i32
      %163 = arith.muli %arg1, %c8_i32_94 : i32
      %164 = tpu.assume_multiple %163, 8 : i32
      %c0_i32_95 = arith.constant 0 : i32
      %c0_i32_96 = arith.constant 0 : i32
      %165 = tpu.memref_slice %arg2[%arg0, %164, %c0_i32_95, %c0_i32_96] : memref<2x18x18x128xf32, #tpu.memory_space<any>> -> memref<1x10x18x128xf32, #tpu.memory_space<any>>
      %166 = tpu.memref_squeeze %165 : memref<1x10x18x128xf32, #tpu.memory_space<any>> -> memref<10x18x128xf32, #tpu.memory_space<any>>
      %c0_i32_97 = arith.constant 0 : i32
      %c0_i32_98 = arith.constant 0 : i32
      %c0_i32_99 = arith.constant 0 : i32
      %167 = tpu.memref_slice %arg12[%9, %c0_i32_97, %c0_i32_98, %c0_i32_99] : memref<2x10x18x128xf32, #tpu.memory_space<vmem>> -> memref<1x10x18x128xf32, #tpu.memory_space<vmem>>
      %168 = tpu.memref_squeeze %167 : memref<1x10x18x128xf32, #tpu.memory_space<vmem>> -> memref<10x18x128xf32, #tpu.memory_space<vmem>>
      %169 = tpu.memref_slice %arg13[%9] : memref<2x!tpu.dma_semaphore, #tpu.memory_space<semaphore_mem>> -> memref<1x!tpu.dma_semaphore, #tpu.memory_space<semaphore_mem>>
      %170 = tpu.memref_squeeze %169 : memref<1x!tpu.dma_semaphore, #tpu.memory_space<semaphore_mem>> -> memref<!tpu.dma_semaphore, #tpu.memory_space<semaphore_mem>>
      tpu.enqueue_dma source(%166 : memref<10x18x128xf32, #tpu.memory_space<any>>) target(%168 : memref<10x18x128xf32, #tpu.memory_space<vmem>>) target_semaphore(%170 : memref<!tpu.dma_semaphore, #tpu.memory_space<semaphore_mem>>)
    } else {
    }
    %c8_i32 = arith.constant 8 : i32
    %13 = arith.muli %arg1, %c8_i32 : i32
    %14 = tpu.assume_multiple %13, 8 : i32
    %c0_i32_5 = arith.constant 0 : i32
    %c0_i32_6 = arith.constant 0 : i32
    %15 = tpu.memref_slice %arg2[%arg0, %14, %c0_i32_5, %c0_i32_6] : memref<2x18x18x128xf32, #tpu.memory_space<any>> -> memref<1x10x18x128xf32, #tpu.memory_space<any>>
    %16 = tpu.memref_squeeze %15 : memref<1x10x18x128xf32, #tpu.memory_space<any>> -> memref<10x18x128xf32, #tpu.memory_space<any>>
    %c0_i32_7 = arith.constant 0 : i32
    %c0_i32_8 = arith.constant 0 : i32
    %c0_i32_9 = arith.constant 0 : i32
    %17 = tpu.memref_slice %arg12[%9, %c0_i32_7, %c0_i32_8, %c0_i32_9] : memref<2x10x18x128xf32, #tpu.memory_space<vmem>> -> memref<1x10x18x128xf32, #tpu.memory_space<vmem>>
    %18 = tpu.memref_squeeze %17 : memref<1x10x18x128xf32, #tpu.memory_space<vmem>> -> memref<10x18x128xf32, #tpu.memory_space<vmem>>
    %19 = tpu.memref_slice %arg13[%9] : memref<2x!tpu.dma_semaphore, #tpu.memory_space<semaphore_mem>> -> memref<1x!tpu.dma_semaphore, #tpu.memory_space<semaphore_mem>>
    %20 = tpu.memref_squeeze %19 : memref<1x!tpu.dma_semaphore, #tpu.memory_space<semaphore_mem>> -> memref<!tpu.dma_semaphore, #tpu.memory_space<semaphore_mem>>
    tpu.wait_dma2 semaphore(%20 : memref<!tpu.dma_semaphore, #tpu.memory_space<semaphore_mem>>) src(%16 : memref<10x18x128xf32, #tpu.memory_space<any>>) dst(%18 : memref<10x18x128xf32, #tpu.memory_space<vmem>>)
    %c1_i32_10 = arith.constant 1 : i32
    %21 = arith.addi %arg1, %c1_i32_10 : i32
    %c2_i32_11 = arith.constant 2 : i32
    %22 = arith.cmpi slt, %21, %c2_i32_11 : i32
    %23 = arith.extui %22 : i1 to i32
    %c0_i32_12 = arith.constant 0 : i32
    %24 = arith.cmpi ne, %23, %c0_i32_12 : i32
    scf.if %24 {
      %c1_i32_94 = arith.constant 1 : i32
      %163 = arith.addi %arg1, %c1_i32_94 : i32
      %c1_i32_95 = arith.constant 1 : i32
      %164 = arith.subi %c1_i32_95, %9 : i32
      %c8_i32_96 = arith.constant 8 : i32
      %165 = arith.muli %163, %c8_i32_96 : i32
      %166 = tpu.assume_multiple %165, 8 : i32
      %c0_i32_97 = arith.constant 0 : i32
      %c0_i32_98 = arith.constant 0 : i32
      %167 = tpu.memref_slice %arg2[%arg0, %166, %c0_i32_97, %c0_i32_98] : memref<2x18x18x128xf32, #tpu.memory_space<any>> -> memref<1x10x18x128xf32, #tpu.memory_space<any>>
      %168 = tpu.memref_squeeze %167 : memref<1x10x18x128xf32, #tpu.memory_space<any>> -> memref<10x18x128xf32, #tpu.memory_space<any>>
      %c0_i32_99 = arith.constant 0 : i32
      %c0_i32_100 = arith.constant 0 : i32
      %c0_i32_101 = arith.constant 0 : i32
      %169 = tpu.memref_slice %arg12[%164, %c0_i32_99, %c0_i32_100, %c0_i32_101] : memref<2x10x18x128xf32, #tpu.memory_space<vmem>> -> memref<1x10x18x128xf32, #tpu.memory_space<vmem>>
      %170 = tpu.memref_squeeze %169 : memref<1x10x18x128xf32, #tpu.memory_space<vmem>> -> memref<10x18x128xf32, #tpu.memory_space<vmem>>
      %171 = tpu.memref_slice %arg13[%164] : memref<2x!tpu.dma_semaphore, #tpu.memory_space<semaphore_mem>> -> memref<1x!tpu.dma_semaphore, #tpu.memory_space<semaphore_mem>>
      %172 = tpu.memref_squeeze %171 : memref<1x!tpu.dma_semaphore, #tpu.memory_space<semaphore_mem>> -> memref<!tpu.dma_semaphore, #tpu.memory_space<semaphore_mem>>
      tpu.enqueue_dma source(%168 : memref<10x18x128xf32, #tpu.memory_space<any>>) target(%170 : memref<10x18x128xf32, #tpu.memory_space<vmem>>) target_semaphore(%172 : memref<!tpu.dma_semaphore, #tpu.memory_space<semaphore_mem>>)
    } else {
    }
    %c0 = arith.constant 0 : index
    %c0_13 = arith.constant 0 : index
    %25 = vector.load %arg3[%c0, %c0_13] : memref<9x128xf32, #tpu.memory_space<vmem>>, vector<9x128xf32>
    %cst = arith.constant 0.000000e+00 : f32
    %26 = vector.broadcast %cst : f32 to vector<8x16x128xf32>
    %c0_i32_14 = arith.constant 0 : i32
    %c0_i32_15 = arith.constant 0 : i32
    %c0_i32_16 = arith.constant 0 : i32
    %27 = tpu.memref_slice %arg12[%9, %c0_i32_14, %c0_i32_15, %c0_i32_16] : memref<2x10x18x128xf32, #tpu.memory_space<vmem>> -> memref<1x10x18x128xf32, #tpu.memory_space<vmem>>
    %28 = tpu.memref_squeeze %27 : memref<1x10x18x128xf32, #tpu.memory_space<vmem>> -> memref<10x18x128xf32, #tpu.memory_space<vmem>>
    %c0_17 = arith.constant 0 : index
    %c0_18 = arith.constant 0 : index
    %c0_19 = arith.constant 0 : index
    %29 = vector.load %28[%c0_17, %c0_18, %c0_19] : memref<10x18x128xf32, #tpu.memory_space<vmem>>, vector<8x16x128xf32>
    %30 = vector.extract_strided_slice %25 {offsets = [0, 0], sizes = [1, 128], strides = [1, 1]} : vector<9x128xf32> to vector<1x128xf32>
    %31 = vector.shape_cast %30 : vector<1x128xf32> to vector<128xf32>
    %32 = vector.shape_cast %31 : vector<128xf32> to vector<1x1x128xf32>
    %33 = vector.broadcast %32 : vector<1x1x128xf32> to vector<8x16x128xf32>
    %34 = arith.mulf %29, %33 : vector<8x16x128xf32>
    %35 = arith.addf %26, %34 : vector<8x16x128xf32>
    %c0_i32_20 = arith.constant 0 : i32
    %c0_i32_21 = arith.constant 0 : i32
    %c0_i32_22 = arith.constant 0 : i32
    %36 = tpu.memref_slice %arg12[%9, %c0_i32_20, %c0_i32_21, %c0_i32_22] : memref<2x10x18x128xf32, #tpu.memory_space<vmem>> -> memref<1x10x18x128xf32, #tpu.memory_space<vmem>>
    %37 = tpu.memref_squeeze %36 : memref<1x10x18x128xf32, #tpu.memory_space<vmem>> -> memref<10x18x128xf32, #tpu.memory_space<vmem>>
    %c0_23 = arith.constant 0 : index
    %c1 = arith.constant 1 : index
    %c0_24 = arith.constant 0 : index
    %38 = vector.load %37[%c0_23, %c1, %c0_24] : memref<10x18x128xf32, #tpu.memory_space<vmem>>, vector<8x16x128xf32>
    %39 = vector.extract_strided_slice %25 {offsets = [1, 0], sizes = [1, 128], strides = [1, 1]} : vector<9x128xf32> to vector<1x128xf32>
    %40 = vector.shape_cast %39 : vector<1x128xf32> to vector<128xf32>
    %41 = vector.shape_cast %40 : vector<128xf32> to vector<1x1x128xf32>
    %42 = vector.broadcast %41 : vector<1x1x128xf32> to vector<8x16x128xf32>
    %43 = arith.mulf %38, %42 : vector<8x16x128xf32>
    %44 = arith.addf %35, %43 : vector<8x16x128xf32>
    %c0_i32_25 = arith.constant 0 : i32
    %c0_i32_26 = arith.constant 0 : i32
    %c0_i32_27 = arith.constant 0 : i32
    %45 = tpu.memref_slice %arg12[%9, %c0_i32_25, %c0_i32_26, %c0_i32_27] : memref<2x10x18x128xf32, #tpu.memory_space<vmem>> -> memref<1x10x18x128xf32, #tpu.memory_space<vmem>>
    %46 = tpu.memref_squeeze %45 : memref<1x10x18x128xf32, #tpu.memory_space<vmem>> -> memref<10x18x128xf32, #tpu.memory_space<vmem>>
    %c0_28 = arith.constant 0 : index
    %c2 = arith.constant 2 : index
    %c0_29 = arith.constant 0 : index
    %47 = vector.load %46[%c0_28, %c2, %c0_29] : memref<10x18x128xf32, #tpu.memory_space<vmem>>, vector<8x16x128xf32>
    %48 = vector.extract_strided_slice %25 {offsets = [2, 0], sizes = [1, 128], strides = [1, 1]} : vector<9x128xf32> to vector<1x128xf32>
    %49 = vector.shape_cast %48 : vector<1x128xf32> to vector<128xf32>
    %50 = vector.shape_cast %49 : vector<128xf32> to vector<1x1x128xf32>
    %51 = vector.broadcast %50 : vector<1x1x128xf32> to vector<8x16x128xf32>
    %52 = arith.mulf %47, %51 : vector<8x16x128xf32>
    %53 = arith.addf %44, %52 : vector<8x16x128xf32>
    %c0_i32_30 = arith.constant 0 : i32
    %c0_i32_31 = arith.constant 0 : i32
    %c0_i32_32 = arith.constant 0 : i32
    %54 = tpu.memref_slice %arg12[%9, %c0_i32_30, %c0_i32_31, %c0_i32_32] : memref<2x10x18x128xf32, #tpu.memory_space<vmem>> -> memref<1x10x18x128xf32, #tpu.memory_space<vmem>>
    %55 = tpu.memref_squeeze %54 : memref<1x10x18x128xf32, #tpu.memory_space<vmem>> -> memref<10x18x128xf32, #tpu.memory_space<vmem>>
    %c1_33 = arith.constant 1 : index
    %c0_34 = arith.constant 0 : index
    %c0_35 = arith.constant 0 : index
    %56 = vector.load %55[%c1_33, %c0_34, %c0_35] : memref<10x18x128xf32, #tpu.memory_space<vmem>>, vector<8x16x128xf32>
    %57 = vector.extract_strided_slice %25 {offsets = [3, 0], sizes = [1, 128], strides = [1, 1]} : vector<9x128xf32> to vector<1x128xf32>
    %58 = vector.shape_cast %57 : vector<1x128xf32> to vector<128xf32>
    %59 = vector.shape_cast %58 : vector<128xf32> to vector<1x1x128xf32>
    %60 = vector.broadcast %59 : vector<1x1x128xf32> to vector<8x16x128xf32>
    %61 = arith.mulf %56, %60 : vector<8x16x128xf32>
    %62 = arith.addf %53, %61 : vector<8x16x128xf32>
    %c0_i32_36 = arith.constant 0 : i32
    %c0_i32_37 = arith.constant 0 : i32
    %c0_i32_38 = arith.constant 0 : i32
    %63 = tpu.memref_slice %arg12[%9, %c0_i32_36, %c0_i32_37, %c0_i32_38] : memref<2x10x18x128xf32, #tpu.memory_space<vmem>> -> memref<1x10x18x128xf32, #tpu.memory_space<vmem>>
    %64 = tpu.memref_squeeze %63 : memref<1x10x18x128xf32, #tpu.memory_space<vmem>> -> memref<10x18x128xf32, #tpu.memory_space<vmem>>
    %c1_39 = arith.constant 1 : index
    %c1_40 = arith.constant 1 : index
    %c0_41 = arith.constant 0 : index
    %65 = vector.load %64[%c1_39, %c1_40, %c0_41] : memref<10x18x128xf32, #tpu.memory_space<vmem>>, vector<8x16x128xf32>
    %66 = vector.extract_strided_slice %25 {offsets = [4, 0], sizes = [1, 128], strides = [1, 1]} : vector<9x128xf32> to vector<1x128xf32>
    %67 = vector.shape_cast %66 : vector<1x128xf32> to vector<128xf32>
    %68 = vector.shape_cast %67 : vector<128xf32> to vector<1x1x128xf32>
    %69 = vector.broadcast %68 : vector<1x1x128xf32> to vector<8x16x128xf32>
    %70 = arith.mulf %65, %69 : vector<8x16x128xf32>
    %71 = arith.addf %62, %70 : vector<8x16x128xf32>
    %c0_i32_42 = arith.constant 0 : i32
    %c0_i32_43 = arith.constant 0 : i32
    %c0_i32_44 = arith.constant 0 : i32
    %72 = tpu.memref_slice %arg12[%9, %c0_i32_42, %c0_i32_43, %c0_i32_44] : memref<2x10x18x128xf32, #tpu.memory_space<vmem>> -> memref<1x10x18x128xf32, #tpu.memory_space<vmem>>
    %73 = tpu.memref_squeeze %72 : memref<1x10x18x128xf32, #tpu.memory_space<vmem>> -> memref<10x18x128xf32, #tpu.memory_space<vmem>>
    %c1_45 = arith.constant 1 : index
    %c2_46 = arith.constant 2 : index
    %c0_47 = arith.constant 0 : index
    %74 = vector.load %73[%c1_45, %c2_46, %c0_47] : memref<10x18x128xf32, #tpu.memory_space<vmem>>, vector<8x16x128xf32>
    %75 = vector.extract_strided_slice %25 {offsets = [5, 0], sizes = [1, 128], strides = [1, 1]} : vector<9x128xf32> to vector<1x128xf32>
    %76 = vector.shape_cast %75 : vector<1x128xf32> to vector<128xf32>
    %77 = vector.shape_cast %76 : vector<128xf32> to vector<1x1x128xf32>
    %78 = vector.broadcast %77 : vector<1x1x128xf32> to vector<8x16x128xf32>
    %79 = arith.mulf %74, %78 : vector<8x16x128xf32>
    %80 = arith.addf %71, %79 : vector<8x16x128xf32>
    %c0_i32_48 = arith.constant 0 : i32
    %c0_i32_49 = arith.constant 0 : i32
    %c0_i32_50 = arith.constant 0 : i32
    %81 = tpu.memref_slice %arg12[%9, %c0_i32_48, %c0_i32_49, %c0_i32_50] : memref<2x10x18x128xf32, #tpu.memory_space<vmem>> -> memref<1x10x18x128xf32, #tpu.memory_space<vmem>>
    %82 = tpu.memref_squeeze %81 : memref<1x10x18x128xf32, #tpu.memory_space<vmem>> -> memref<10x18x128xf32, #tpu.memory_space<vmem>>
    %c2_51 = arith.constant 2 : index
    %c0_52 = arith.constant 0 : index
    %c0_53 = arith.constant 0 : index
    %83 = vector.load %82[%c2_51, %c0_52, %c0_53] : memref<10x18x128xf32, #tpu.memory_space<vmem>>, vector<8x16x128xf32>
    %84 = vector.extract_strided_slice %25 {offsets = [6, 0], sizes = [1, 128], strides = [1, 1]} : vector<9x128xf32> to vector<1x128xf32>
    %85 = vector.shape_cast %84 : vector<1x128xf32> to vector<128xf32>
    %86 = vector.shape_cast %85 : vector<128xf32> to vector<1x1x128xf32>
    %87 = vector.broadcast %86 : vector<1x1x128xf32> to vector<8x16x128xf32>
    %88 = arith.mulf %83, %87 : vector<8x16x128xf32>
    %89 = arith.addf %80, %88 : vector<8x16x128xf32>
    %c0_i32_54 = arith.constant 0 : i32
    %c0_i32_55 = arith.constant 0 : i32
    %c0_i32_56 = arith.constant 0 : i32
    %90 = tpu.memref_slice %arg12[%9, %c0_i32_54, %c0_i32_55, %c0_i32_56] : memref<2x10x18x128xf32, #tpu.memory_space<vmem>> -> memref<1x10x18x128xf32, #tpu.memory_space<vmem>>
    %91 = tpu.memref_squeeze %90 : memref<1x10x18x128xf32, #tpu.memory_space<vmem>> -> memref<10x18x128xf32, #tpu.memory_space<vmem>>
    %c2_57 = arith.constant 2 : index
    %c1_58 = arith.constant 1 : index
    %c0_59 = arith.constant 0 : index
    %92 = vector.load %91[%c2_57, %c1_58, %c0_59] : memref<10x18x128xf32, #tpu.memory_space<vmem>>, vector<8x16x128xf32>
    %93 = vector.extract_strided_slice %25 {offsets = [7, 0], sizes = [1, 128], strides = [1, 1]} : vector<9x128xf32> to vector<1x128xf32>
    %94 = vector.shape_cast %93 : vector<1x128xf32> to vector<128xf32>
    %95 = vector.shape_cast %94 : vector<128xf32> to vector<1x1x128xf32>
    %96 = vector.broadcast %95 : vector<1x1x128xf32> to vector<8x16x128xf32>
    %97 = arith.mulf %92, %96 : vector<8x16x128xf32>
    %98 = arith.addf %89, %97 : vector<8x16x128xf32>
    %c0_i32_60 = arith.constant 0 : i32
    %c0_i32_61 = arith.constant 0 : i32
    %c0_i32_62 = arith.constant 0 : i32
    %99 = tpu.memref_slice %arg12[%9, %c0_i32_60, %c0_i32_61, %c0_i32_62] : memref<2x10x18x128xf32, #tpu.memory_space<vmem>> -> memref<1x10x18x128xf32, #tpu.memory_space<vmem>>
    %100 = tpu.memref_squeeze %99 : memref<1x10x18x128xf32, #tpu.memory_space<vmem>> -> memref<10x18x128xf32, #tpu.memory_space<vmem>>
    %c2_63 = arith.constant 2 : index
    %c2_64 = arith.constant 2 : index
    %c0_65 = arith.constant 0 : index
    %101 = vector.load %100[%c2_63, %c2_64, %c0_65] : memref<10x18x128xf32, #tpu.memory_space<vmem>>, vector<8x16x128xf32>
    %102 = vector.extract_strided_slice %25 {offsets = [8, 0], sizes = [1, 128], strides = [1, 1]} : vector<9x128xf32> to vector<1x128xf32>
    %103 = vector.shape_cast %102 : vector<1x128xf32> to vector<128xf32>
    %104 = vector.shape_cast %103 : vector<128xf32> to vector<1x1x128xf32>
    %105 = vector.broadcast %104 : vector<1x1x128xf32> to vector<8x16x128xf32>
    %106 = arith.mulf %101, %105 : vector<8x16x128xf32>
    %107 = arith.addf %98, %106 : vector<8x16x128xf32>
    %c0_66 = arith.constant 0 : index
    %c0_67 = arith.constant 0 : index
    %108 = vector.load %arg4[%c0_66, %c0_67] : memref<1x128xf32, #tpu.memory_space<vmem>>, vector<1x128xf32>
    %109 = vector.shape_cast %108 : vector<1x128xf32> to vector<1x1x128xf32>
    %110 = vector.broadcast %109 : vector<1x1x128xf32> to vector<8x16x128xf32>
    %111 = arith.addf %107, %110 : vector<8x16x128xf32>
    %cst_68 = arith.constant dense<0.000000e+00> : vector<8x16xf32>
    %112 = vector.multi_reduction <add>, %111, %cst_68 [2] : vector<8x16x128xf32> to vector<8x16xf32>
    %113 = vector.shape_cast %112 : vector<8x16xf32> to vector<8x16x1xf32>
    %cst_69 = arith.constant 2.500000e-01 : f32
    %114 = vector.broadcast %cst_69 : f32 to vector<8x16x1xf32>
    %115 = arith.mulf %113, %114 : vector<8x16x1xf32>
    %116 = arith.mulf %111, %111 : vector<8x16x128xf32>
    %cst_70 = arith.constant dense<0.000000e+00> : vector<8x16xf32>
    %117 = vector.multi_reduction <add>, %116, %cst_70 [2] : vector<8x16x128xf32> to vector<8x16xf32>
    %118 = vector.shape_cast %117 : vector<8x16xf32> to vector<8x16x1xf32>
    %cst_71 = arith.constant 2.500000e-01 : f32
    %119 = vector.broadcast %cst_71 : f32 to vector<8x16x1xf32>
    %120 = arith.mulf %118, %119 : vector<8x16x1xf32>
    %121 = arith.mulf %115, %115 : vector<8x16x1xf32>
    %122 = arith.subf %120, %121 : vector<8x16x1xf32>
    %cst_72 = arith.constant 0.000000e+00 : f32
    %123 = vector.broadcast %cst_72 : f32 to vector<8x16x1xf32>
    %124 = arith.maximumf %122, %123 : vector<8x16x1xf32>
    %125 = vector.broadcast %115 : vector<8x16x1xf32> to vector<8x16x128xf32>
    %126 = arith.subf %111, %125 : vector<8x16x128xf32>
    %cst_73 = arith.constant 9.99999997E-7 : f32
    %127 = vector.broadcast %cst_73 : f32 to vector<8x16x1xf32>
    %128 = arith.addf %124, %127 : vector<8x16x1xf32>
    %129 = math.rsqrt %128 : vector<8x16x1xf32>
    %130 = vector.broadcast %129 : vector<8x16x1xf32> to vector<8x16x128xf32>
    %131 = arith.mulf %126, %130 : vector<8x16x128xf32>
    %c0_74 = arith.constant 0 : index
    %c0_75 = arith.constant 0 : index
    %132 = vector.load %arg5[%c0_74, %c0_75] : memref<1x128xf32, #tpu.memory_space<vmem>>, vector<1x128xf32>
    %133 = vector.shape_cast %132 : vector<1x128xf32> to vector<1x1x128xf32>
    %134 = vector.broadcast %133 : vector<1x1x128xf32> to vector<8x16x128xf32>
    %135 = arith.mulf %131, %134 : vector<8x16x128xf32>
    %c0_76 = arith.constant 0 : index
    %c0_77 = arith.constant 0 : index
    %136 = vector.load %arg6[%c0_76, %c0_77] : memref<1x128xf32, #tpu.memory_space<vmem>>, vector<1x128xf32>
    %137 = vector.shape_cast %136 : vector<1x128xf32> to vector<1x1x128xf32>
    %138 = vector.broadcast %137 : vector<1x1x128xf32> to vector<8x16x128xf32>
    %139 = arith.addf %135, %138 : vector<8x16x128xf32>
    %140 = vector.shape_cast %139 : vector<8x16x128xf32> to vector<128x128xf32>
    %141 = arith.truncf %140 : vector<128x128xf32> to vector<128x128xbf16>
    %c0_78 = arith.constant 0 : index
    %c0_79 = arith.constant 0 : index
    %142 = vector.load %arg7[%c0_78, %c0_79] : memref<128x512xbf16, #tpu.memory_space<vmem>>, vector<128x512xbf16>
    %cst_80 = arith.constant dense<0.000000e+00> : vector<128x512xf32>
    %143 = tpu.matmul %141, %142, %cst_80 {dimension_numbers = #tpu.dot_dimension_numbers<[1], [0], [0], [1], [0, 0, 1, 1], [], []>} : vector<128x128xbf16>, vector<128x512xbf16>, vector<128x512xf32> -> vector<128x512xf32>
    %c0_81 = arith.constant 0 : index
    %c0_82 = arith.constant 0 : index
    %144 = vector.load %arg8[%c0_81, %c0_82] : memref<1x512xf32, #tpu.memory_space<vmem>>, vector<1x512xf32>
    %145 = vector.broadcast %144 : vector<1x512xf32> to vector<128x512xf32>
    %146 = arith.addf %143, %145 : vector<128x512xf32>
    %cst_83 = arith.constant 0.000000e+00 : f32
    %147 = vector.broadcast %cst_83 : f32 to vector<128x512xf32>
    %148 = arith.cmpf oge, %146, %147 : vector<128x512xf32>
    %cst_84 = arith.constant 0.00999999977 : f32
    %149 = vector.broadcast %cst_84 : f32 to vector<128x512xf32>
    %150 = arith.mulf %149, %146 : vector<128x512xf32>
    %151 = arith.select %148, %146, %150 : vector<128x512xi1>, vector<128x512xf32>
    %152 = arith.truncf %151 : vector<128x512xf32> to vector<128x512xbf16>
    %c0_85 = arith.constant 0 : index
    %c0_86 = arith.constant 0 : index
    %153 = vector.load %arg9[%c0_85, %c0_86] : memref<512x128xbf16, #tpu.memory_space<vmem>>, vector<512x128xbf16>
    %cst_87 = arith.constant dense<0.000000e+00> : vector<128x128xf32>
    %154 = tpu.matmul %152, %153, %cst_87 {dimension_numbers = #tpu.dot_dimension_numbers<[1], [0], [0], [1], [0, 0, 1, 1], [], []>} : vector<128x512xbf16>, vector<512x128xbf16>, vector<128x128xf32> -> vector<128x128xf32>
    %c0_88 = arith.constant 0 : index
    %c0_89 = arith.constant 0 : index
    %155 = vector.load %arg10[%c0_88, %c0_89] : memref<1x128xf32, #tpu.memory_space<vmem>>, vector<1x128xf32>
    %156 = vector.broadcast %155 : vector<1x128xf32> to vector<128x128xf32>
    %157 = arith.addf %154, %156 : vector<128x128xf32>
    %158 = vector.shape_cast %157 : vector<128x128xf32> to vector<8x16x128xf32>
    %159 = arith.addf %158, %65 : vector<8x16x128xf32>
    %c0_90 = arith.constant 0 : index
    %c0_91 = arith.constant 0 : index
    %c0_92 = arith.constant 0 : index
    %c0_93 = arith.constant 0 : index
    %160 = vector.load %arg11[%c0_90, %c0_91, %c0_92, %c0_93] : memref<1x8x16x128xf32, #tpu.memory_space<vmem>>, vector<1x8x16x128xf32>
    %161 = vector.shape_cast %160 : vector<1x8x16x128xf32> to vector<8x16x128xf32>
    %162 = vector.shape_cast %159 : vector<8x16x128xf32> to vector<1x8x16x128xf32>
    tpu.vector_store %arg11[%c0_90, %c0_91, %c0_92, %c0_93], %162 {strides = array<i32>} : memref<1x8x16x128xf32, #tpu.memory_space<vmem>>, vector<1x8x16x128xf32>,
    return
  }
  func.func @transform_1(%arg0: i32, %arg1: i32) -> (i32, i32) {
    %c0_i32 = arith.constant 0 : i32
    %c0_i32_0 = arith.constant 0 : i32
    %c0_i32_1 = arith.constant 0 : i32
    return %c0_i32, %c0_i32_0 : i32, i32
  }
  func.func @transform_2(%arg0: i32, %arg1: i32) -> (i32, i32) {
    %c0_i32 = arith.constant 0 : i32
    %c0_i32_0 = arith.constant 0 : i32
    %c0_i32_1 = arith.constant 0 : i32
    return %c0_i32, %c0_i32_0 : i32, i32
  }
  func.func @transform_3(%arg0: i32, %arg1: i32) -> (i32, i32) {
    %c0_i32 = arith.constant 0 : i32
    %c0_i32_0 = arith.constant 0 : i32
    %c0_i32_1 = arith.constant 0 : i32
    return %c0_i32, %c0_i32_0 : i32, i32
  }
  func.func @transform_4(%arg0: i32, %arg1: i32) -> (i32, i32) {
    %c0_i32 = arith.constant 0 : i32
    %c0_i32_0 = arith.constant 0 : i32
    %c0_i32_1 = arith.constant 0 : i32
    return %c0_i32, %c0_i32_0 : i32, i32
  }
  func.func @transform_5(%arg0: i32, %arg1: i32) -> (i32, i32) {
    %c0_i32 = arith.constant 0 : i32
    %c0_i32_0 = arith.constant 0 : i32
    %c0_i32_1 = arith.constant 0 : i32
    return %c0_i32, %c0_i32_0 : i32, i32
  }
  func.func @transform_6(%arg0: i32, %arg1: i32) -> (i32, i32) {
    %c0_i32 = arith.constant 0 : i32
    %c0_i32_0 = arith.constant 0 : i32
    %c0_i32_1 = arith.constant 0 : i32
    return %c0_i32, %c0_i32_0 : i32, i32
  }
  func.func @transform_7(%arg0: i32, %arg1: i32) -> (i32, i32) {
    %c0_i32 = arith.constant 0 : i32
    %c0_i32_0 = arith.constant 0 : i32
    %c0_i32_1 = arith.constant 0 : i32
    return %c0_i32, %c0_i32_0 : i32, i32
  }
  func.func @transform_8(%arg0: i32, %arg1: i32) -> (i32, i32) {
    %c0_i32 = arith.constant 0 : i32
    %c0_i32_0 = arith.constant 0 : i32
    %c0_i32_1 = arith.constant 0 : i32
    return %c0_i32, %c0_i32_0 : i32, i32
  }
  func.func @transform_9(%arg0: i32, %arg1: i32) -> (i32, i32, i32, i32) {
    %c0_i32 = arith.constant 0 : i32
    %c0_i32_0 = arith.constant 0 : i32
    %c0_i32_1 = arith.constant 0 : i32
    return %arg0, %arg1, %c0_i32, %c0_i32_0 : i32, i32, i32, i32
  }
}

</mosaic_0001>

<bundles_post_ra>
// kernel: tpu_custom_call.1
= control target key start
LH: loop header
LB: loop body
LE: loop exit
PB: predicated region body
PF: predicated region fallthrough
CT: control target
= control target key end

     0   :  { %14 = vsyncpa [#allocation5], 0  ;;  %s4782_s0 = inlined_call_operand.vmem [shape: f32[2,18,18,128], index: 0, kind: input, shape index: {}]   ;;  %s4783_s1 = inlined_call_operand.vmem [shape: f32[9,128], index: 1, kind: input, shape index: {}]   ;;  %s4784_s2 = inlined_call_operand.vmem [shape: f32[1,128], index: 2, kind: input, shape index: {}]   ;;  %s4785_s3 = inlined_call_operand.vmem [shape: f32[1,128], index: 3, kind: input, shape index: {}]   ;;  %s4786_s4 = inlined_call_operand.vmem [shape: f32[1,128], index: 4, kind: input, shape index: {}]   ;;  %s4787_s5 = inlined_call_operand.vmem [shape: bf16[128,512], index: 5, kind: input, shape index: {}]   ;;  %s4788_s6 = inlined_call_operand.vmem [shape: f32[1,512], index: 6, kind: input, shape index: {}]   ;;  %s4789_s7 = inlined_call_operand.vmem [shape: bf16[512,128], index: 7, kind: input, shape index: {}]   ;;  %s4790_s8 = inlined_call_operand.vmem [shape: f32[1,128], index: 8, kind: input, shape index: {}]   ;;  %s4791_s9 = inlined_call_operand.hbm [shape: f32[2,16,16,128], index: 9, kind: output, shape index: {}]  }
   0x1   :  { %16 = vsyncpa [#allocation5 + $0x1], 0  ;;  %s3413_s30 = smov 0   ;;  %s3415_s10 = smov 0  }
   0x2   :  { %s3417_s11 = smov 0   ;;  %s3419_s12 = smov 0  }
   0x3   :  { %s3421_s13 = smov 0   ;;  %s3423_s14 = smov 0  }
   0x4   :  { %s3425_s15 = smov 0   ;;  %s3427_s16 = smov 0  }
   0x5 LB: > { %4797 = sst [smem:[#allocation10_spill]] %s3349_s14  ;;  %s2674_s17 = sadd.s32 4294967295, %s3357_s16   ;;  %s3357_s16 = sphi %s3427_s16, %s22_s16   ;;  %s3353_s15 = sphi %s3425_s15, %s4809_s15   ;;  %s3349_s14 = sphi %s3423_s14, %s4808_s14   ;;  %s3345_s13 = sphi %s3421_s13, %s4807_s13   ;;  %s3341_s12 = sphi %s3419_s12, %s4806_s12   ;;  %s3337_s11 = sphi %s3417_s11, %s4812_s11   ;;  %s3333_s10 = sphi %s3415_s10, %s4811_s10   ;;  %s3329_s30 = sphi %s3413_s30, %s4810_s30  }
   0x6   : > { %4798 = sst [smem:[#allocation11_spill]] %s3353_s15  ;;  %s2675_s18 = sadd.s32 4294967294, %s3357_s16  }
   0x7   : > { %s31_s19 = sadd.s32 1, %s3349_s14  ;;  %s34_s20 = sadd.s32 1, %s3353_s15 }
   0x8   : > { %p32_p0 = scmp.ge.s32.totalorder %s31_s19, 2  ;;  %p221_p1 = scmp.ne.s32.totalorder %s3337_s11, %s3333_s10 }
   0x9   : > { %p222_p2 = scmp.eq.s32.totalorder %s2674_s17, 3  ;;  %p227_p5 = scmp.ne.s32.totalorder %s3333_s10, %s3329_s30 }
   0xa   : > { %s4814_s19 = smov (%p32_p0, %s31_s19), 0  ;;  %s4816_s20 = smov (!%p32_p0, %s34_s20), %s3353_s15 }
   0xb   : > { %4799 = sst [smem:[#allocation12_spill]] %s4814_s19  ;;  %s207_s21 = ssub.s32 %s3349_s14, %s4814_s19 }
   0xc   : > { %p3464_p3 = por %p222_p2, %p221_p1  ;;  %p36_p4 = scmp.ge.s32.totalorder %s4816_s20, 2 }
   0xd   : > { %p228_p6 = scmp.eq.s32.totalorder %s2675_s18, 3  ;;  %p2677_p7 = scmp.ge.s32.totalorder %s3357_s16, 1 }
   0xe   : > { %s4818_s20 = smov (%p36_p4, %s4816_s20), 0  ;;  %p270_p9 = scmp.lt.s32.totalorder %s3357_s16, 5 }
   0xf   : > { %4801 = sst [smem:[#allocation13_spill]] %s4818_s20  ;;  %p3473_p8 = por %p228_p6, %p227_p5 }
  0x10   : > { %s206_s24 = ssub.s32 %s3353_s15, %s4818_s20  ;;  %s211_s25 = sadd.s32 1, %s3337_s11 }
  0x11   : > { %s208_s26 = sor.u32 %s207_s21, %s206_s24  ;;  %p271_p10 = pnand %p2677_p7, %p270_p9 }
  0x12   : > { %p209_p11 = scmp.eq.s32.totalorder %s208_s26, 0  ;;  %s4794_s28 = sand.u32 (!%p271_p10), 1, %s3333_s10  }
  0x13   : > { %274 = sbr.rel (%p271_p10) target bundleno = 775 (0x307), region = 52  ;;  %p301_p12 = scmp.lt.s32.totalorder (!%p271_p10), %s3341_s12, 0 }
  0x14   : > { %s3482_s27 = scalar_select %p209_p11, %s3337_s11, %s211_s25  }
  0x15   : > { %s2678_s29 = sshll.u32 (!%p271_p10), %s4794_s28, 7  ;;  %s302_s17 = ssub.s32 (!%p271_p10), 0, %s3341_s12 }
  0x16   : > { %4803 = sst [smem:[#allocation14_spill]] %s3482_s27  ;;  %s2679_s18 = smin.u32 (!%p271_p10), %s3341_s12, %s302_s17 }
  0x17   : > { %s304_s19 = sand.u32 (!%p271_p10), 1, %s2679_s18   ;;  %s3492_s24 = scalar_lea.vmem (!%p271_p10), [#allocation4], %s2678_s29 }
  0x18   : > { %s305_s20 = ssub.s32 0, %s304_s19  ;;  %p2682_p0 = scmp.ne.s32.totalorder %s3341_s12, 0 }
  0x19   : > { %s4820_s20 = smov (!%p301_p12, %s305_s20), %s304_s19  ;;  %s2684_s25 = smul.u32 (!%p2682_p0), 192, %s3341_s12 }
  0x1a   : > { %p2681_p13 = scmp.lt.s32.totalorder %s4820_s20, 0  ;;  %s311_s21 = sadd.s32 2, %s4820_s20 }
  0x1b   : > { %316 = sbr.rel (%p2682_p0) target bundleno = 50 (0x32), region = 56 }
  0x1c   : > { %s4822_s21 = smov (!%p2681_p13, %s311_s21), %s4820_s20  ;;  %s319_s26 = smul.u32 (!%p2682_p0), 432, %s3345_s13 }
  0x1d   : > { %s322_s28 = smul.u32 (!%p2682_p0), 240, %s4822_s21 }
  0x1e   : > { %s320_s15 = sadd.s32 (!%p2682_p0), %s2684_s25, %s319_s26 }
  0x1f   : > { %s3501_s19 = scalar_lea.vmem (!%p2682_p0), %s4782_s0, %s320_s15  ;;  %s3506_s20 = scalar_lea.vmem (!%p2682_p0), [#allocation2], %s322_s28 }
  0x20   : > { %v381_v0 = vld [vmem:[%s3501_s19] sm:$0xff]  ;;  %v383_v1 = vld [vmem:[%s3501_s19 + $0x8] sm:$0xff]  ;;  %v385_v2 = vld [vmem:[%s3501_s19 + $0x18] sm:$0xff]  ;;  %s324_s15 = scalar_lea.sflag [#allocation3], %s4822_s21 }
  0x21   : > { %382 = vst [vmem:[%s3506_s20] sm:$0xff] %v381_v0  ;;  %384 = vst [vmem:[%s3506_s20 + $0x8] sm:$0xff] %v383_v1  ;;  %v387_v3 = vld [vmem:[%s3501_s19 + $0x20] sm:$0xff]  ;;  %v389_v4 = vld [vmem:[%s3501_s19 + $0x30] sm:$0xff] }
  0x22   : > { %386 = vst [vmem:[%s3506_s20 + $0x18] sm:$0xff] %v385_v2  ;;  %v391_v5 = vld [vmem:[%s3501_s19 + $0x38] sm:$0xff]  ;;  %388 = vst [vmem:[%s3506_s20 + $0x20] sm:$0xff] %v387_v3  ;;  %v393_v6 = vld [vmem:[%s3501_s19 + $0x48] sm:$0xff] }
  0x23   : > { %390 = vst [vmem:[%s3506_s20 + $0x30] sm:$0xff] %v389_v4  ;;  %392 = vst [vmem:[%s3506_s20 + $0x38] sm:$0xff] %v391_v5  ;;  %v395_v7 = vld [vmem:[%s3501_s19 + $0x50] sm:$0xff]  ;;  %v397_v8 = vld [vmem:[%s3501_s19 + $0x60] sm:$0xff] }
  0x24   : > { %394 = vst [vmem:[%s3506_s20 + $0x48] sm:$0xff] %v393_v6  ;;  %396 = vst [vmem:[%s3506_s20 + $0x50] sm:$0xff] %v395_v7  ;;  %v399_v9 = vld [vmem:[%s3501_s19 + $0x68] sm:$0xff]  ;;  %v401_v10 = vld [vmem:[%s3501_s19 + $0x78] sm:$0xff] }
  0x25   : > { %398 = vst [vmem:[%s3506_s20 + $0x60] sm:$0xff] %v397_v8  ;;  %v403_v11 = vld [vmem:[%s3501_s19 + $0x80] sm:$0xff]  ;;  %400 = vst [vmem:[%s3506_s20 + $0x68] sm:$0xff] %v399_v9  ;;  %v405_v12 = vld [vmem:[%s3501_s19 + $0x90] sm:$0xff] }
  0x26   : > { %402 = vst [vmem:[%s3506_s20 + $0x78] sm:$0xff] %v401_v10  ;;  %404 = vst [vmem:[%s3506_s20 + $0x80] sm:$0xff] %v403_v11  ;;  %v407_v13 = vld [vmem:[%s3501_s19 + $0x98] sm:$0xff]  ;;  %v409_v14 = vld [vmem:[%s3501_s19 + $0xa8] sm:$0xff] }
  0x27   : > { %406 = vst [vmem:[%s3506_s20 + $0x90] sm:$0xff] %v405_v12  ;;  %408 = vst [vmem:[%s3506_s20 + $0x98] sm:$0xff] %v407_v13  ;;  %v411_v15 = vld [vmem:[%s3501_s19 + $0xb0] sm:$0xff]  ;;  %v413_v16 = vld [vmem:[%s3501_s19 + $0xc0] sm:$0xff] }
  0x28   : > { %410 = vst [vmem:[%s3506_s20 + $0xa8] sm:$0xff] %v409_v14  ;;  %v415_v17 = vld [vmem:[%s3501_s19 + $0xc8] sm:$0xff]  ;;  %412 = vst [vmem:[%s3506_s20 + $0xb0] sm:$0xff] %v411_v15  ;;  %v417_v18 = vld [vmem:[%s3501_s19 + $0xd8] sm:$0xff] }
  0x29   : > { %414 = vst [vmem:[%s3506_s20 + $0xc0] sm:$0xff] %v413_v16  ;;  %416 = vst [vmem:[%s3506_s20 + $0xc8] sm:$0xff] %v415_v17  ;;  %v419_v19 = vld [vmem:[%s3501_s19 + $0xe0] sm:$0xff]  ;;  %v2685_v20 = vld [vmem:[%s3501_s19 + $0x10] sm:$0x3] }
  0x2a   : > { %418 = vst [vmem:[%s3506_s20 + $0xd8] sm:$0xff] %v417_v18  ;;  %420 = vst [vmem:[%s3506_s20 + $0xe0] sm:$0xff] %v419_v19  ;;  %v2687_v21 = vld [vmem:[%s3501_s19 + $0x28] sm:$0x3]  ;;  %v2689_v22 = vld [vmem:[%s3501_s19 + $0x40] sm:$0x3] }
  0x2b   : > { %2686 = vst [vmem:[%s3506_s20 + $0x10] sm:$0x3] %v2685_v20  ;;  %v2691_v23 = vld [vmem:[%s3501_s19 + $0x58] sm:$0x3]  ;;  %2688 = vst [vmem:[%s3506_s20 + $0x28] sm:$0x3] %v2687_v21 }
  0x2c   : > { %2690 = vst [vmem:[%s3506_s20 + $0x40] sm:$0x3] %v2689_v22  ;;  %2692 = vst [vmem:[%s3506_s20 + $0x58] sm:$0x3] %v2691_v23  ;;  %v2693_v24 = vld [vmem:[%s3501_s19 + $0x70] sm:$0x3] }
  0x2d   : > { %v2695_v25 = vld [vmem:[%s3501_s19 + $0x88] sm:$0x3]  ;;  %v2697_v26 = vld [vmem:[%s3501_s19 + $0xa0] sm:$0x3]  ;;  %2694 = vst [vmem:[%s3506_s20 + $0x70] sm:$0x3] %v2693_v24 }
  0x2e   : > { %2696 = vst [vmem:[%s3506_s20 + $0x88] sm:$0x3] %v2695_v25  ;;  %2698 = vst [vmem:[%s3506_s20 + $0xa0] sm:$0x3] %v2697_v26  ;;  %v2699_v27 = vld [vmem:[%s3501_s19 + $0xb8] sm:$0x3] }
  0x2f   : > { %v2701_v28 = vld [vmem:[%s3501_s19 + $0xd0] sm:$0x3]  ;;  %v2703_v29 = vld [vmem:[%s3501_s19 + $0xe8] sm:$0x3]  ;;  %2700 = vst [vmem:[%s3506_s20 + $0xb8] sm:$0x3] %v2699_v27 }
  0x30   : > { %2702 = vst [vmem:[%s3506_s20 + $0xd0] sm:$0x3] %v2701_v28  ;;  %2704 = vst [vmem:[%s3506_s20 + $0xe8] sm:$0x3] %v2703_v29 }
  0x31   : > { %454 = vsyncadd %s324_s15, 2880 }
  0x32 PF: > { %s456_s28 = smul.u32 240, %s4822_s21  ;;  %s458_s25 = scalar_lea.sflag [#allocation3], %s4822_s21 }
  0x34   : > { %s3567_s29 = scalar_lea.vmem [#allocation2], %s456_s28 }
  0x35   : > { %3321 = dma.done.wait %s458_s25, 2880 }
  0x36   : > { %3322 = vsyncadd %s458_s25, 4294964416  ;;  %s463_s26 = sadd.s32 1, %s3341_s12 }
  0x37   : > { %p2705_p1 = scmp.ge.s32.totalorder %s463_s26, 2 }
  0x38   : > { %s468_s17 = ssub.s32 (!%p2705_p1), 1, %s4822_s21  ;;  %s2602_s18 = smul.u32 (!%p2705_p1), 192, %s3341_s12 }
  0x39   : > { %467 = sbr.rel (%p2705_p1) target bundleno = 80 (0x50), region = 97  ;;  %s476_s14 = scalar_lea.sflag (!%p2705_p1), [#allocation3], %s468_s17 }
  0x3a   : > { %s2603_s19 = smul.u32 (!%p2705_p1), 432, %s3345_s13 }
  0x3b   : > { %s474_s20 = smul.u32 (!%p2705_p1), 240, %s468_s17 }
  0x3c   : > { %s2604_s15 = sadd.s32 (!%p2705_p1), %s2603_s19, %s2602_s18 }
  0x3d   : > { %s3579_s27 = scalar_lea.vmem (!%p2705_p1), %s4782_s0, %s2604_s15  ;;  %s3584_s25 = scalar_lea.vmem (!%p2705_p1), [#allocation2], %s474_s20 }
  0x3e   : > { %v2707_v30 = vld [vmem:[%s3579_s27 + $0xc0] sm:$0xff]  ;;  %v2708_v31 = vld [vmem:[%s3579_s27 + $0xc8] sm:$0xff]  ;;  %v2709_v32 = vld [vmem:[%s3579_s27 + $0xd8] sm:$0xff] }
  0x3f   : > { %534 = vst [vmem:[%s3584_s25] sm:$0xff] %v2707_v30  ;;  %536 = vst [vmem:[%s3584_s25 + $0x8] sm:$0xff] %v2708_v31  ;;  %v2710_v33 = vld [vmem:[%s3579_s27 + $0xe0] sm:$0xff]  ;;  %v2711_v34 = vld [vmem:[%s3579_s27 + $0xf0] sm:$0xff] }
  0x40   : > { %538 = vst [vmem:[%s3584_s25 + $0x18] sm:$0xff] %v2709_v32  ;;  %v2712_v35 = vld [vmem:[%s3579_s27 + $0xf8] sm:$0xff]  ;;  %540 = vst [vmem:[%s3584_s25 + $0x20] sm:$0xff] %v2710_v33  ;;  %v2713_v36 = vld [vmem:[%s3579_s27 + $0x108] sm:$0xff] }
  0x41   : > { %542 = vst [vmem:[%s3584_s25 + $0x30] sm:$0xff] %v2711_v34  ;;  %544 = vst [vmem:[%s3584_s25 + $0x38] sm:$0xff] %v2712_v35  ;;  %v2714_v37 = vld [vmem:[%s3579_s27 + $0x110] sm:$0xff]  ;;  %v2715_v38 = vld [vmem:[%s3579_s27 + $0x120] sm:$0xff] }
  0x42   : > { %546 = vst [vmem:[%s3584_s25 + $0x48] sm:$0xff] %v2713_v36  ;;  %548 = vst [vmem:[%s3584_s25 + $0x50] sm:$0xff] %v2714_v37  ;;  %v2716_v39 = vld [vmem:[%s3579_s27 + $0x128] sm:$0xff]  ;;  %v2717_v40 = vld [vmem:[%s3579_s27 + $0x138] sm:$0xff] }
  0x43   : > { %550 = vst [vmem:[%s3584_s25 + $0x60] sm:$0xff] %v2715_v38  ;;  %v2718_v41 = vld [vmem:[%s3579_s27 + $0x140] sm:$0xff]  ;;  %552 = vst [vmem:[%s3584_s25 + $0x68] sm:$0xff] %v2716_v39  ;;  %v2719_v42 = vld [vmem:[%s3579_s27 + $0x150] sm:$0xff] }
  0x44   : > { %554 = vst [vmem:[%s3584_s25 + $0x78] sm:$0xff] %v2717_v40  ;;  %556 = vst [vmem:[%s3584_s25 + $0x80] sm:$0xff] %v2718_v41  ;;  %v2720_v43 = vld [vmem:[%s3579_s27 + $0x158] sm:$0xff]  ;;  %v2721_v44 = vld [vmem:[%s3579_s27 + $0x168] sm:$0xff] }
  0x45   : > { %558 = vst [vmem:[%s3584_s25 + $0x90] sm:$0xff] %v2719_v42  ;;  %560 = vst [vmem:[%s3584_s25 + $0x98] sm:$0xff] %v2720_v43  ;;  %v2722_v45 = vld [vmem:[%s3579_s27 + $0x170] sm:$0xff]  ;;  %v2723_v46 = vld [vmem:[%s3579_s27 + $0x180] sm:$0xff] }
  0x46   : > { %562 = vst [vmem:[%s3584_s25 + $0xa8] sm:$0xff] %v2721_v44  ;;  %v2724_v47 = vld [vmem:[%s3579_s27 + $0x188] sm:$0xff]  ;;  %564 = vst [vmem:[%s3584_s25 + $0xb0] sm:$0xff] %v2722_v45  ;;  %v2725_v48 = vld [vmem:[%s3579_s27 + $0x198] sm:$0xff] }
  0x47   : > { %566 = vst [vmem:[%s3584_s25 + $0xc0] sm:$0xff] %v2723_v46  ;;  %568 = vst [vmem:[%s3584_s25 + $0xc8] sm:$0xff] %v2724_v47  ;;  %v2726_v49 = vld [vmem:[%s3579_s27 + $0x1a0] sm:$0xff]  ;;  %v2727_v50 = vld [vmem:[%s3579_s27 + $0xd0] sm:$0x3] }
  0x48   : > { %570 = vst [vmem:[%s3584_s25 + $0xd8] sm:$0xff] %v2725_v48  ;;  %572 = vst [vmem:[%s3584_s25 + $0xe0] sm:$0xff] %v2726_v49  ;;  %v2729_v51 = vld [vmem:[%s3579_s27 + $0xe8] sm:$0x3]  ;;  %v2731_v52 = vld [vmem:[%s3579_s27 + $0x100] sm:$0x3] }
  0x49   : > { %2728 = vst [vmem:[%s3584_s25 + $0x10] sm:$0x3] %v2727_v50  ;;  %v2733_v53 = vld [vmem:[%s3579_s27 + $0x118] sm:$0x3]  ;;  %2730 = vst [vmem:[%s3584_s25 + $0x28] sm:$0x3] %v2729_v51 }
  0x4a   : > { %2732 = vst [vmem:[%s3584_s25 + $0x40] sm:$0x3] %v2731_v52  ;;  %2734 = vst [vmem:[%s3584_s25 + $0x58] sm:$0x3] %v2733_v53  ;;  %v2735_v54 = vld [vmem:[%s3579_s27 + $0x130] sm:$0x3] }
  0x4b   : > { %v2737_v55 = vld [vmem:[%s3579_s27 + $0x148] sm:$0x3]  ;;  %v2739_v56 = vld [vmem:[%s3579_s27 + $0x160] sm:$0x3]  ;;  %2736 = vst [vmem:[%s3584_s25 + $0x70] sm:$0x3] %v2735_v54 }
  0x4c   : > { %2738 = vst [vmem:[%s3584_s25 + $0x88] sm:$0x3] %v2737_v55  ;;  %2740 = vst [vmem:[%s3584_s25 + $0xa0] sm:$0x3] %v2739_v56  ;;  %v2741_v57 = vld [vmem:[%s3579_s27 + $0x178] sm:$0x3] }
  0x4d   : > { %v2743_v58 = vld [vmem:[%s3579_s27 + $0x190] sm:$0x3]  ;;  %v2745_v59 = vld [vmem:[%s3579_s27 + $0x1a8] sm:$0x3]  ;;  %2742 = vst [vmem:[%s3584_s25 + $0xb8] sm:$0x3] %v2741_v57 }
  0x4e   : > { %2744 = vst [vmem:[%s3584_s25 + $0xd0] sm:$0x3] %v2743_v58  ;;  %2746 = vst [vmem:[%s3584_s25 + $0xe8] sm:$0x3] %v2745_v59 }
  0x4f   : > { %606 = vsyncadd %s476_s14, 2880 }
  0x50 PF: > { %v625_v60 = vlaneseq  ;;  %v607_v62 = vld [vmem:[%s4783_s1] sm:$0xff]  ;;  %v3664_v10 = vld [vmem:[%s4783_s1 + $0x8] ss:$0 sm:$0xff]  ;;  %s2931_s18 = sshll.u32 %s3341_s12, 4  ;;  %s2925_s27 = sshll.u32 %s3345_s13, 5 }
  0x51   : > { %s2547_s21 = sadd.s32 %s2931_s18, %s2925_s27  ;;  %s2550_s17 = sshll.u32 %s3492_s24, 4  ;;  %s4720_s17 = int_to_ptr.vmem [resolvable:$true] %s2550_s17 }
  0x52   : > { %v3645_v61 = vshrl.u32 %v625_v60, 7  ;;  %s2926_s12 = sshll.u32 %s2547_s21, 7  ;;  %s4804_s15 = sand.u32 1, %s3333_s10  }
  0x53   : > { %s4726_s20 = scalar_lea.hbm %s4791_s9, %s2926_s12  ;;  %s4731_s28 = scalar_lea.sflag [#allocation5], %s4804_s15 }
  0x54   : > { %v627_v0 = vsub.s32 0, %v3645_v61  ;;  %v679_v1 = vsub.s32 1, %v3645_v61  ;;  %v731_v2 = vsub.s32 2, %v3645_v61  ;;  %v784_v3 = vsub.s32 3, %v3645_v61  ;;  %s3263_s25 = scalar_lea.vmem %s4720_s17, 2048  ;;  %s3360_s14 = smov [#allocation4]  }
  0x55   : > { %v609_v63 = vld [vmem:[%s3567_s29] sm:$0xff]  ;;  %v836_v6 = vsub.s32 4, %v3645_v61  ;;  %v888_v7 = vsub.s32 5, %v3645_v61  ;;  %v941_v8 = vsub.s32 6, %v3645_v61  ;;  %v993_v9 = vsub.s32 7, %v3645_v61  ;;  %v2757_v14 = vld [vmem:[%s3567_s29 + $0x18] sm:$0xff]  ;;  %p3264_p2 = scmp.ne.s32.totalorder %s4720_s17, %s3263_s25 }
  0x56   : > { %v661_v4 = vld [vmem:[%s3567_s29 + $0x1] sm:$0xff]  ;;  %v3668_v11 = vrot.slane %v607_v62, %v627_v0  ;;  %v3672_v12 = vrot.slane %v607_v62, %v679_v1  ;;  %v3676_v13 = vrot.slane %v607_v62, %v731_v2  ;;  %v3681_v15 = vrot.slane %v607_v62, %v784_v3  ;;  %v2773_v16 = vld [vmem:[%s3567_s29 + $0x19] sm:$0xff]  ;;  %v3690_v20 = vld [vmem:[%s3567_s29 + $0x30] sm:$0xff]  ;;  %s3267_s26 = sshll.u32 %s3360_s14, 4  ;;  %s3268_s26 = int_to_ptr.vmem [resolvable:$false] %s3267_s26 }
  0x57   : > { %v713_v5 = vld [vmem:[%s3567_s29 + $0x2] sm:$0xff]  ;;  %v2789_v17 = vld [vmem:[%s3567_s29 + $0x1a] sm:$0xff]  ;;  %v3685_v18 = vrot.slane %v607_v62, %v836_v6  ;;  %v3687_v19 = vrot.slane %v607_v62, %v888_v7  ;;  %v3692_v21 = vrot.slane %v607_v62, %v941_v8  ;;  %v3694_v22 = vrot.slane %v607_v62, %v993_v9  ;;  %v3702_v28 = vld [vmem:[%s3567_s29 + $0x31] sm:$0xff]  ;;  %p3265_p4 = pnand %p3264_p2, %p3464_p3  ;;  %s3269_s18 = scalar_lea.vmem %s3268_s26, 4096 }
  0x58   : > { %v610_v23 = vld [vmem:[%s3567_s29 + $0x8] sm:$0xff]  ;;  %v629_v25 = vmul.f32 %v3668_v11, %v609_v63  ;;  %v681_v26 = vmul.f32 %v3672_v12, %v661_v4  ;;  %v733_v27 = vmul.f32 %v3676_v13, %v713_v5  ;;  %v3705_v29 = vld [vmem:[%s3567_s29 + $0x32] sm:$0xff]  ;;  %v786_v31 = vmul.f32 %v2757_v14, %v3681_v15  ;;  %v2758_v33 = vld [vmem:[%s3567_s29 + $0x20] sm:$0xff]  ;;  %p3270_p6 = scmp.lt.s32.totalorder %s4720_s17, %s3268_s26  ;;  %p3271_p7 = scmp.lt.s32.totalorder %s3269_s18, %s3263_s25 }
  0x59   : > { %v662_v24 = vld [vmem:[%s3567_s29 + $0x9] sm:$0xff]  ;;  %v838_v32 = vmul.f32 %v2773_v16, %v3685_v18  ;;  %v2774_v34 = vld [vmem:[%s3567_s29 + $0x21] sm:$0xff]  ;;  %v890_v36 = vmul.f32 %v2789_v17, %v3687_v19  ;;  %v630_v37 = vmul.f32 %v3668_v11, %v610_v23  ;;  %v943_v40 = vmul.f32 %v3690_v20, %v3692_v21  ;;  %v3724_v44 = vld [vmem:[%s3567_s29 + $0x38] sm:$0xff]  ;;  %p3266_p5 = pneg %p3265_p4 }
  0x5a   : > { %v714_v30 = vld [vmem:[%s3567_s29 + $0xa] sm:$0xff]  ;;  %v697_v35 = vadd.f32 %v681_v26, %v629_v25  ;;  %v682_v38 = vmul.f32 %v3672_v12, %v662_v24  ;;  %v2790_v39 = vld [vmem:[%s3567_s29 + $0x22] sm:$0xff]  ;;  %v995_v41 = vmul.f32 %v3702_v28, %v3694_v22  ;;  %v1047_v42 = vmul.f32 %v3664_v10, %v3705_v29  ;;  %v3727_v45 = vld [vmem:[%s3567_s29 + $0x39] sm:$0xff]  ;;  %p3272_p9 = por %p3271_p7, %p3270_p6 }
  0x5b   : > { %v734_v43 = vmul.f32 %v3676_v13, %v714_v30  ;;  %v787_v48 = vmul.f32 %v2758_v33, %v3681_v15  ;;  %v839_v49 = vmul.f32 %v2774_v34, %v3685_v18  ;;  %v3732_v50 = vld [vmem:[%s3567_s29 + $0x3a] sm:$0xff]  ;;  %v891_v51 = vmul.f32 %v2790_v39, %v3687_v19  ;;  %v3743_v59 = vld [vmem:[%s3567_s29 + $0x48] sm:$0xff] }
  0x5c   : > { %v749_v46 = vadd.f32 %v733_v27, %v697_v35  ;;  %v698_v47 = vadd.f32 %v682_v38, %v630_v37  ;;  %v631_v52 = vmul.f32 %v2757_v14, %v3668_v11  ;;  %v683_v53 = vmul.f32 %v2773_v16, %v3672_v12  ;;  %v3752_v5 = vld [vmem:[%s3567_s29 + $0x49] sm:$0xff]  ;;  %v3776_v37 = vld [vmem:[%s3567_s29 + $0x51] sm:$0xff]  ;;  %p3273_p10 = pnand %p3272_p9, %p3266_p5 }
  0x5d   : > { %v735_v54 = vmul.f32 %v2789_v17, %v3676_v13  ;;  %v944_v57 = vmul.f32 %v3724_v44, %v3692_v21  ;;  %v996_v58 = vmul.f32 %v3727_v45, %v3694_v22  ;;  %v1048_v60 = vmul.f32 %v3664_v10, %v3732_v50  ;;  %v3755_v6 = vld [vmem:[%s3567_s29 + $0x4a] sm:$0xff] }
  0x5e   : > { %v802_v55 = vadd.f32 %v786_v31, %v749_v46  ;;  %v750_v56 = vadd.f32 %v734_v43, %v698_v47  ;;  %v699_v62 = vadd.f32 %v683_v53, %v631_v52  ;;  %v788_v63 = vmul.f32 %v3690_v20, %v3681_v15  ;;  %v3785_v46 = vld [vmem:[%s4784_s2] ss:$0 sm:$0xff] }
  0x5f   : > { %v840_v4 = vmul.f32 %v3702_v28, %v3685_v18  ;;  %v892_v9 = vmul.f32 %v3705_v29, %v3687_v19  ;;  %v632_v14 = vmul.f32 %v2758_v33, %v3668_v11  ;;  %v945_v17 = vmul.f32 %v3743_v59, %v3692_v21 }
  0x60   : > { %v854_v7 = vadd.f32 %v838_v32, %v802_v55  ;;  %v803_v8 = vadd.f32 %v787_v48, %v750_v56  ;;  %v751_v16 = vadd.f32 %v735_v54, %v699_v62  ;;  %v684_v23 = vmul.f32 %v2774_v34, %v3672_v12  ;;  %v3773_v34 = vld [vmem:[%s3567_s29 + $0x50] sm:$0xff] }
  0x61   : > { %v736_v24 = vmul.f32 %v2790_v39, %v3676_v13  ;;  %v997_v27 = vmul.f32 %v3752_v5, %v3694_v22  ;;  %v1049_v30 = vmul.f32 %v3664_v10, %v3755_v6  ;;  %v789_v33 = vmul.f32 %v3724_v44, %v3681_v15 }
  0x62   : > { %v906_v25 = vadd.f32 %v890_v36, %v854_v7  ;;  %v855_v26 = vadd.f32 %v839_v49, %v803_v8  ;;  %v804_v31 = vadd.f32 %v788_v63, %v751_v16  ;;  %v700_v32 = vadd.f32 %v684_v23, %v632_v14  ;;  %v3788_v49 = vld [vmem:[%s3567_s29 + $0x52] sm:$0xff]  ;;  %v3810_v16 = vld [vmem:[%s3567_s29 + $0x61] sm:$0xff] }
  0x63   : > { %v841_v35 = vmul.f32 %v3727_v45, %v3685_v18  ;;  %v893_v39 = vmul.f32 %v3732_v50, %v3687_v19  ;;  %v633_v43 = vmul.f32 %v3690_v20, %v3668_v11  ;;  %v946_v20 = vmul.f32 %v3773_v34, %v3692_v21  ;;  %v3816_v23 = vld [vmem:[%s3567_s29 + $0x62] sm:$0xff] }
  0x64   : > { %v959_v36 = vadd.f32 %v943_v40, %v906_v25  ;;  %v907_v38 = vadd.f32 %v891_v51, %v855_v26  ;;  %v856_v47 = vadd.f32 %v840_v4, %v804_v31  ;;  %v752_v48 = vadd.f32 %v736_v24, %v700_v32 }
  0x65   : > { %v685_v40 = vmul.f32 %v3702_v28, %v3672_v12  ;;  %v737_v51 = vmul.f32 %v3705_v29, %v3676_v13  ;;  %v998_v54 = vmul.f32 %v3776_v37, %v3694_v22  ;;  %v790_v63 = vmul.f32 %v3743_v59, %v3681_v15 }
  0x66   : > { %v1011_v52 = vadd.f32 %v995_v41, %v959_v36  ;;  %v960_v53 = vadd.f32 %v944_v57, %v907_v38  ;;  %v908_v55 = vadd.f32 %v892_v9, %v856_v47  ;;  %v805_v56 = vadd.f32 %v789_v33, %v752_v48  ;;  %v3805_v57 = vld [vmem:[%s3567_s29 + $0x60] sm:$0xff] }
  0x67   : > { %v701_v62 = vadd.f32 %v685_v40, %v633_v43  ;;  %v1050_v29 = vmul.f32 %v3664_v10, %v3788_v49  ;;  %v842_v41 = vmul.f32 %v3752_v5, %v3685_v18  ;;  %v894_v9 = vmul.f32 %v3755_v6, %v3687_v19 }
  0x68   : > { %v1063_v28 = vadd.f32 %v1047_v42, %v1011_v52  ;;  %v1012_v4 = vadd.f32 %v996_v58, %v960_v53  ;;  %v961_v7 = vadd.f32 %v945_v17, %v908_v55  ;;  %v857_v8 = vadd.f32 %v841_v35, %v805_v56 }
  0x69   : > { %v753_v14 = vadd.f32 %v737_v51, %v701_v62  ;;  %v634_v24 = vmul.f32 %v3724_v44, %v3668_v11  ;;  %v686_v17 = vmul.f32 %v3727_v45, %v3672_v12  ;;  %v738_v32 = vmul.f32 %v3732_v50, %v3676_v13  ;;  %v3833_v45 = vld [vmem:[%s3567_s29 + $0x68] sm:$0xff] }
  0x6a   : > { %v3813_v42 = vadd.f32 %v3785_v46, %v1063_v28  ;;  %v1064_v58 = vadd.f32 %v1048_v60, %v1012_v4  ;;  %v1013_v25 = vadd.f32 %v997_v27, %v961_v7  ;;  %v909_v26 = vadd.f32 %v893_v39, %v857_v8  ;;  %v3838_v39 = vld [vmem:[%s3567_s29 + $0x69] sm:$0xff] }
  0x6b   : > { %v806_v31 = vadd.f32 %v790_v63, %v753_v14  ;;  %v702_v44 = vadd.f32 %v686_v17, %v634_v24  ;;  %v791_v35 = vmul.f32 %v3773_v34, %v3681_v15  ;;  %v947_v50 = vmul.f32 %v3805_v57, %v3692_v21  ;;  %v3862_v63 = vld [vmem:[%s3567_s29 + $0x78] sm:$0xff] }
  0x6c   : > { %1102 = vadd.xlane.f32.xlu0 %v3813_v42  ;;  %v1150_v60 = vmul.f32 %v3813_v42, %v3813_v42  ;;  %v3828_v33 = vadd.f32 %v3785_v46, %v1064_v58  ;;  %v1065_v27 = vadd.f32 %v1049_v30, %v1013_v25  ;;  %v962_v36 = vadd.f32 %v946_v20, %v909_v26  ;;  %v3847_v30 = vld [vmem:[%s3567_s29 + $0x6a] sm:$0xff] }
  0x6d   : > { %v858_v38 = vadd.f32 %v842_v41, %v806_v31  ;;  %v999_v47 = vmul.f32 %v3810_v16, %v3694_v22  ;;  %v754_v48 = vadd.f32 %v738_v32, %v702_v44  ;;  %v843_v40 = vmul.f32 %v3776_v37, %v3685_v18 }
  0x6e   : > { %1166 = vadd.xlane.f32.xlu1 %v1150_v60  ;;  %v1151_v43 = vmul.f32 %v3828_v33, %v3828_v33  ;;  %v1014_v51 = vadd.f32 %v998_v54, %v962_v36  ;;  %v1051_v53 = vmul.f32 %v3664_v10, %v3816_v23  ;;  %v895_v20 = vmul.f32 %v3788_v49, %v3687_v19  ;;  %v3891_v60 = vld [vmem:[%s3567_s29 + $0x80] sm:$0xff] }
  0x6f   : > { %v910_v52 = vadd.f32 %v894_v9, %v858_v38  ;;  %v3855_v55 = vadd.f32 %v3785_v46, %v1065_v27  ;;  %v807_v56 = vadd.f32 %v791_v35, %v754_v48  ;;  %v635_v62 = vmul.f32 %v3743_v59, %v3668_v11  ;;  %v3873_v9 = vld [vmem:[%s3567_s29 + $0x79] sm:$0xff]  ;;  %v3905_v48 = vld [vmem:[%s3567_s29 + $0x81] sm:$0xff] }
  0x70   : > { %1104 = vadd.xlane.f32.xlu0 %v3828_v33  ;;  %v687_v54 = vmul.f32 %v3752_v5, %v3672_v12  ;;  %v1066_v28 = vadd.f32 %v1050_v29, %v1014_v51  ;;  %v948_v41 = vmul.f32 %v3833_v45, %v3692_v21  ;;  %v739_v7 = vmul.f32 %v3755_v6, %v3676_v13  ;;  %v3876_v29 = vld [vmem:[%s3567_s29 + $0x7a] sm:$0xff] }
  0x71   : > { %v963_v4 = vadd.f32 %v947_v50, %v910_v52  ;;  %v859_v8 = vadd.f32 %v843_v40, %v807_v56  ;;  %v1000_v14 = vmul.f32 %v3838_v39, %v3694_v22  ;;  %v792_v5 = vmul.f32 %v3805_v57, %v3681_v15  ;;  %v3908_v40 = vld [vmem:[%s3567_s29 + $0x82] sm:$0xff] }
  0x72   : > { %1168 = vadd.xlane.f32.xlu1 %v1151_v43  ;;  %v703_v59 = vadd.f32 %v687_v54, %v635_v62  ;;  %v3879_v58 = vadd.f32 %v3785_v46, %v1066_v28  ;;  %v1152_v6 = vmul.f32 %v3855_v55, %v3855_v55  ;;  %v1052_v17 = vmul.f32 %v3664_v10, %v3847_v30 }
  0x73   : > { %v1015_v24 = vadd.f32 %v999_v47, %v963_v4  ;;  %v911_v25 = vadd.f32 %v895_v20, %v859_v8  ;;  %v844_v31 = vmul.f32 %v3810_v16, %v3685_v18  ;;  %v896_v32 = vmul.f32 %v3816_v23, %v3687_v19 }
  0x74   : > { %1106 = vadd.xlane.f32.xlu0 %v3855_v55  ;;  %v755_v26 = vadd.f32 %v739_v7, %v703_v59  ;;  %v949_v35 = vmul.f32 %v3862_v63, %v3692_v21  ;;  %v636_v27 = vmul.f32 %v3773_v34, %v3668_v11  ;;  %v688_v36 = vmul.f32 %v3776_v37, %v3672_v12  ;;  %v3932_v59 = vld [vmem:[%s3567_s29 + $0x90] sm:$0xff] }
  0x75   : > { %v1067_v44 = vadd.f32 %v1051_v53, %v1015_v24  ;;  %v1153_v38 = vmul.f32 %v3879_v58, %v3879_v58  ;;  %v964_v50 = vadd.f32 %v948_v41, %v911_v25  ;;  %v740_v47 = vmul.f32 %v3788_v49, %v3676_v13 }
  0x76   : > { %1108 = vadd.xlane.f32.xlu1 %v3879_v58  ;;  %v808_v43 = vadd.f32 %v792_v5, %v755_v26  ;;  %v1001_v34 = vmul.f32 %v3873_v9, %v3694_v22  ;;  %v1053_v37 = vmul.f32 %v3664_v10, %v3876_v29  ;;  %v704_v51 = vadd.f32 %v688_v36, %v636_v27  ;;  %v3935_v5 = vld [vmem:[%s3567_s29 + $0x91] sm:$0xff] }
  0x77   : > { %v793_v52 = vmul.f32 %v3833_v45, %v3681_v15  ;;  %v3917_v53 = vadd.f32 %v3785_v46, %v1067_v44  ;;  %v1016_v49 = vadd.f32 %v1000_v14, %v964_v50  ;;  %v845_v56 = vmul.f32 %v3838_v39, %v3685_v18 }
  0x78   : > { %1170 = vadd.xlane.f32.xlu0 %v1152_v6  ;;  %v860_v20 = vadd.f32 %v844_v31, %v808_v43  ;;  %v756_v62 = vadd.f32 %v740_v47, %v704_v51  ;;  %v897_v54 = vmul.f32 %v3847_v30, %v3687_v19  ;;  %v950_v28 = vmul.f32 %v3891_v60, %v3692_v21  ;;  %v3950_v31 = vld [vmem:[%s3567_s29 + $0x92] sm:$0xff] }
  0x79   : > { %v637_v4 = vmul.f32 %v3805_v57, %v3668_v11  ;;  %v1068_v41 = vadd.f32 %v1052_v17, %v1016_v49  ;;  %v689_v8 = vmul.f32 %v3810_v16, %v3672_v12  ;;  %v741_v14 = vmul.f32 %v3816_v23, %v3676_v13  ;;  %v3964_v47 = vld [vmem:[%s3567_s29 + $0x98] sm:$0xff] }
  0x7a   : > { %1172 = vadd.xlane.f32.xlu1 %v1153_v38  ;;  %v912_v7 = vadd.f32 %v896_v32, %v860_v20  ;;  %v1154_v6 = vmul.f32 %v3917_v53, %v3917_v53  ;;  %v809_v24 = vadd.f32 %v793_v52, %v756_v62  ;;  %v1002_v57 = vmul.f32 %v3905_v48, %v3694_v22  ;;  %v3973_v20 = vld [vmem:[%s3567_s29 + $0x99] sm:$0xff] }
  0x7b   : > { %v1054_v17 = vmul.f32 %v3664_v10, %v3908_v40  ;;  %v3945_v16 = vadd.f32 %v3785_v46, %v1068_v41  ;;  %v705_v25 = vadd.f32 %v689_v8, %v637_v4  ;;  %v794_v26 = vmul.f32 %v3862_v63, %v3681_v15  ;;  %v3978_v4 = vld [vmem:[%s3567_s29 + $0x9a] sm:$0xff] }
  0x7c   : > { %1110 = vadd.xlane.f32.xlu0 %v3917_v53  ;;  %v965_v23 = vadd.f32 %v949_v35, %v912_v7  ;;  %v861_v32 = vadd.f32 %v845_v56, %v809_v24  ;;  %v846_v44 = vmul.f32 %v3873_v9, %v3685_v18  ;;  %v898_v27 = vmul.f32 %v3876_v29, %v3687_v19  ;;  %v3136_v41 = vld [vmem:[%s4787_s5 + $0xec] ss:$16 sps:$4 sm:$0xff]  }
  0x7d   : > { %v638_v36 = vmul.f32 %v3833_v45, %v3668_v11  ;;  %v1155_v35 = vmul.f32 %v3945_v16, %v3945_v16  ;;  %v757_v50 = vadd.f32 %v741_v14, %v705_v25  ;;  %v690_v43 = vmul.f32 %v3838_v39, %v3672_v12  ;;  %1707 = vmatprep.subr.bf16.mxu1 %v3136_v41 }
  0x7e   : > { %1112 = vadd.xlane.f32.xlu1 %v3945_v16  ;;  %v1017_v38 = vadd.f32 %v1001_v34, %v965_v23  ;;  %v913_v51 = vadd.f32 %v897_v54, %v861_v32  ;;  %v951_v52 = vmul.f32 %v3932_v59, %v3692_v21  ;;  %v1003_v45 = vmul.f32 %v3935_v5, %v3694_v22  ;;  %v3134_v54 = vld [vmem:[%s4787_s5 + $0xe4] ss:$16 sps:$4 sm:$0xff]  }
  0x7f   : > { %v742_v49 = vmul.f32 %v3847_v30, %v3676_v13  ;;  %v810_v56 = vadd.f32 %v794_v26, %v757_v50  ;;  %v706_v62 = vadd.f32 %v690_v43, %v638_v36  ;;  %v795_v39 = vmul.f32 %v3891_v60, %v3681_v15  ;;  %v3138_v30 = vld [vmem:[%s4787_s5 + $0xe0] ss:$16 sps:$4 sm:$0xff]   ;;  %1594 = vmatprep.subr.bf16.mxu0 %v3134_v54  ;;  %v4015_v50 = vld [vmem:[%s3567_s29 + $0xa8] sm:$0xff] }
  0x80   : > { %1174 = vadd.xlane.f32.xlu0 %v1154_v6  ;;  %v1069_v34 = vadd.f32 %v1053_v37, %v1017_v38  ;;  %v966_v37 = vadd.f32 %v950_v28, %v913_v51  ;;  %v1055_v7 = vmul.f32 %v3664_v10, %v3950_v31  ;;  %v847_v8 = vmul.f32 %v3905_v48, %v3685_v18  ;;  %v3139_v6 = vld [vmem:[%s4787_s5 + $0xe8] ss:$16 sps:$4 sm:$0xff]  }
  0x81   : > { %v899_v14 = vmul.f32 %v3908_v40, %v3687_v19  ;;  %v862_v23 = vadd.f32 %v846_v44, %v810_v56  ;;  %v758_v28 = vadd.f32 %v742_v49, %v706_v62  ;;  %v639_v25 = vmul.f32 %v3862_v63, %v3668_v11  ;;  %v3142_v56 = vld [vmem:[%s4787_s5 + $0xcc] ss:$16 sps:$4 sm:$0xff]   ;;  %1595 = vmatpush1.bf16.msra.mxu0 %v3138_v30 }
  0x82   : > { %1176 = vadd.xlane.f32.xlu1 %v1155_v35  ;;  %v3999_v24 = vadd.f32 %v3785_v46, %v1069_v34  ;;  %v1018_v26 = vadd.f32 %v1002_v57, %v966_v37  ;;  %v952_v32 = vmul.f32 %v3964_v47, %v3692_v21  ;;  %v691_v36 = vmul.f32 %v3873_v9, %v3672_v12  ;;  %v3140_v9 = vld [vmem:[%s4787_s5 + $0xc4] ss:$16 sps:$4 sm:$0xff]   ;;  %v4025_v34 = vld [vmem:[%s3567_s29 + $0xa9] sm:$0xff] }
  0x83   : > { %v743_v35 = vmul.f32 %v3876_v29, %v3676_v13  ;;  %v914_v38 = vadd.f32 %v898_v27, %v862_v23  ;;  %v811_v63 = vadd.f32 %v795_v39, %v758_v28  ;;  %v1004_v57 = vmul.f32 %v3973_v20, %v3694_v22  ;;  %v4028_v27 = vld [vmem:[%s3567_s29 + $0xaa] sm:$0xff]  ;;  %1708 = vmatpush1.bf16.msra.mxu1 %v3139_v6 }
  0x84   : > { %1114 = vadd.xlane.f32.xlu0 %v3999_v24  ;;  %v1156_v44 = vmul.f32 %v3999_v24, %v3999_v24  ;;  %v1070_v43 = vadd.f32 %v1054_v17, %v1018_v26  ;;  %v1056_v29 = vmul.f32 %v3664_v10, %v3978_v4  ;;  %v707_v51 = vadd.f32 %v691_v36, %v639_v25  ;;  %v3144_v26 = vld [vmem:[%s4787_s5 + $0xc0] ss:$16 sps:$4 sm:$0xff]  }
  0x85   : > { %v796_v49 = vmul.f32 %v3932_v59, %v3681_v15  ;;  %v967_v62 = vadd.f32 %v951_v52, %v914_v38  ;;  %v863_v39 = vadd.f32 %v847_v8, %v811_v63  ;;  %v848_v17 = vmul.f32 %v3935_v5, %v3685_v18  ;;  %1596 = vmatprep.subr.bf16.mxu0 %v3140_v9  ;;  %v4077_v9 = vld [vmem:[%s3567_s29 + $0xb2] sm:$0xff] }
  0x86   : > { %v900_v54 = vmul.f32 %v3950_v31, %v3687_v19  ;;  %v4038_v37 = vadd.f32 %v3785_v46, %v1070_v43  ;;  %v759_v23 = vadd.f32 %v743_v35, %v707_v51  ;;  %v640_v41 = vmul.f32 %v3891_v60, %v3668_v11  ;;  %1709 = vmatprep.subr.bf16.mxu1 %v3142_v56  ;;  %v3146_v56 = vld [vmem:[%s4787_s5 + $0xa4] ss:$16 sps:$4 sm:$0xff]  }
  0x87   : > { %v692_v28 = vmul.f32 %v3905_v48, %v3672_v12  ;;  %v1019_v52 = vadd.f32 %v1003_v45, %v967_v62  ;;  %v915_v8 = vadd.f32 %v899_v14, %v863_v39  ;;  %v953_v25 = vmul.f32 %v4015_v50, %v3692_v21  ;;  %v4074_v62 = vld [vmem:[%s3567_s29 + $0xb1] sm:$0xff]  ;;  %1597 = vmatpush1.bf16.msra.mxu0 %v3144_v26 }
  0x88   : > { %1178 = vadd.xlane.f32.xlu0 %v1156_v44  ;;  %v744_v30 = vmul.f32 %v3908_v40, %v3676_v13  ;;  %1116 = vadd.xlane.f32.xlu1 %v4038_v37  ;;  %v1157_v60 = vmul.f32 %v4038_v37, %v4038_v37  ;;  %v812_v48 = vadd.f32 %v796_v49, %v759_v23  ;;  %v4061_v44 = vld [vmem:[%s3567_s29 + $0xb0] sm:$0xff] }
  0x89   : > { %v708_v6 = vadd.f32 %v692_v28, %v640_v41  ;;  %v797_v45 = vmul.f32 %v3964_v47, %v3681_v15  ;;  %v1071_v14 = vadd.f32 %v1055_v7, %v1019_v52  ;;  %v968_v36 = vadd.f32 %v952_v32, %v915_v8  ;;  %v3145_v7 = vld [vmem:[%s4787_s5 + $0xc8] ss:$16 sps:$4 sm:$0xff]   ;;  %1598 = vmatprep.subr.bf16.mxu0 %v3146_v56 }
  0x8a   : > { %v1005_v40 = vmul.f32 %v4025_v34, %v3694_v22  ;;  %v1057_v35 = vmul.f32 %v3664_v10, %v4028_v27  ;;  %v864_v38 = vadd.f32 %v848_v17, %v812_v48  ;;  %v849_v43 = vmul.f32 %v3973_v20, %v3685_v18  ;;  %1710 = vmatpush1.bf16.msra.mxu1 %v3145_v7 }
  0x8b   : > { %v760_v63 = vadd.f32 %v744_v30, %v708_v6  ;;  %v901_v51 = vmul.f32 %v3978_v4, %v3687_v19  ;;  %v4071_v32 = vadd.f32 %v3785_v46, %v1071_v14  ;;  %v1020_v49 = vadd.f32 %v1004_v57, %v968_v36  ;;  %v3151_v14 = vld [vmem:[%s4787_s5 + $0xa8] ss:$16 sps:$4 sm:$0xff]  }
  0x8c   : > { %v641_v39 = vmul.f32 %v3932_v59, %v3668_v11  ;;  %v693_v17 = vmul.f32 %v3935_v5, %v3672_v12  ;;  %1180 = vadd.xlane.f32.xlu1 %v1157_v60  ;;  %v916_v23 = vadd.f32 %v900_v54, %v864_v38  ;;  %v954_v57 = vmul.f32 %v4061_v44, %v3692_v21  ;;  %v3148_v59 = vld [vmem:[%s4787_s5 + $0xac] ss:$16 sps:$4 sm:$0xff]  }
  0x8d   : > { %v813_v41 = vadd.f32 %v797_v45, %v760_v63  ;;  %v745_v28 = vmul.f32 %v3950_v31, %v3676_v13  ;;  %1118 = vadd.xlane.f32.xlu0 %v4071_v32  ;;  %v1072_v5 = vadd.f32 %v1056_v29, %v1020_v49  ;;  %v1158_v52 = vmul.f32 %v4071_v32, %v4071_v32  ;;  %v3150_v29 = vld [vmem:[%s4787_s5 + $0xa0] ss:$16 sps:$4 sm:$0xff]  }
  0x8e   : > { %v709_v8 = vadd.f32 %v693_v17, %v641_v39  ;;  %v798_v54 = vmul.f32 %v4015_v50, %v3681_v15  ;;  %v969_v30 = vadd.f32 %v953_v25, %v916_v23  ;;  %v1006_v31 = vmul.f32 %v4074_v62, %v3694_v22  ;;  %v2817_v63 = vld [vmem:[%s3567_s29 + $0xc0] sm:$0xff]  ;;  %1711 = vmatprep.subr.bf16.mxu1 %v3148_v59 }
  0x8f   : > { %v865_v26 = vadd.f32 %v849_v43, %v813_v41  ;;  %v1058_v60 = vmul.f32 %v3664_v10, %v4077_v9  ;;  %v4106_v48 = vadd.f32 %v3785_v46, %v1072_v5  ;;  %v850_v45 = vmul.f32 %v4025_v34, %v3685_v18  ;;  %v2833_v43 = vld [vmem:[%s3567_s29 + $0xc1] sm:$0xff]  ;;  %1599 = vmatpush1.bf16.msra.mxu0 %v3150_v29  ;;  %v3154_v5 = vld [vmem:[%s4787_s5 + $0x8c] ss:$16 sps:$4 sm:$0xff]  }
  0x90   : > { %v761_v6 = vadd.f32 %v745_v28, %v709_v8  ;;  %v902_v25 = vmul.f32 %v4028_v27, %v3687_v19  ;;  %v1021_v36 = vadd.f32 %v1005_v40, %v969_v30  ;;  %v642_v7 = vmul.f32 %v3964_v47, %v3668_v11  ;;  %v3152_v39 = vld [vmem:[%s4787_s5 + $0x84] ss:$16 sps:$4 sm:$0xff]   ;;  %1712 = vmatpush1.bf16.msra.mxu1 %v3151_v14  ;;  %v2818_v29 = vld [vmem:[%s3567_s29 + $0xc8] sm:$0xff] }
  0x91   : > { %v917_v38 = vadd.f32 %v901_v51, %v865_v26  ;;  %v694_v49 = vmul.f32 %v3973_v20, %v3672_v12  ;;  %1120 = vadd.xlane.f32.xlu1 %v4106_v48  ;;  %1182 = vadd.xlane.f32.xlu0 %v1158_v52  ;;  %v1159_v40 = vmul.f32 %v4106_v48, %v4106_v48  ;;  %v3157_v14 = vld [vmem:[%s4787_s5 + $0x88] ss:$16 sps:$4 sm:$0xff]  }
  0x92   : > { %v814_v51 = vadd.f32 %v798_v54, %v761_v6  ;;  %v746_v17 = vmul.f32 %v3978_v4, %v3676_v13  ;;  %v1073_v47 = vadd.f32 %v1057_v35, %v1021_v36  ;;  %v799_v20 = vmul.f32 %v4061_v44, %v3681_v15  ;;  %1600 = vmatprep.subr.bf16.mxu0 %v3152_v39  ;;  %v3156_v54 = vld [vmem:[%s4787_s5 + $0x80] ss:$16 sps:$4 sm:$0xff]  }
  0x93   : > { %v970_v56 = vadd.f32 %v954_v57, %v917_v38  ;;  %v710_v23 = vadd.f32 %v694_v49, %v642_v7  ;;  %v955_v28 = vmul.f32 %v2817_v63, %v3692_v21  ;;  %v1007_v59 = vmul.f32 %v2833_v43, %v3694_v22  ;;  %v2849_v57 = vld [vmem:[%s3567_s29 + $0xc2] sm:$0xff]  ;;  %1713 = vmatprep.subr.bf16.mxu1 %v3154_v5 }
  0x94   : > { %v866_v41 = vadd.f32 %v850_v45, %v814_v51  ;;  %v4137_v4 = vadd.f32 %v3785_v46, %v1073_v47  ;;  %v851_v8 = vmul.f32 %v4074_v62, %v3685_v18  ;;  %v903_v26 = vmul.f32 %v4077_v9, %v3687_v19  ;;  %v2834_v6 = vld [vmem:[%s3567_s29 + $0xc9] sm:$0xff]  ;;  %1601 = vmatpush1.bf16.msra.mxu0 %v3156_v54  ;;  %v2835_v54 = vld [vmem:[%s3567_s29 + $0xd9] sm:$0xff] }
  0x95   : > { %v1022_v35 = vadd.f32 %v1006_v31, %v970_v56  ;;  %v762_v52 = vadd.f32 %v746_v17, %v710_v23  ;;  %1184 = vadd.xlane.f32.xlu1 %v1159_v40  ;;  %v643_v31 = vmul.f32 %v4015_v50, %v3668_v11  ;;  %v695_v45 = vmul.f32 %v4025_v34, %v3672_v12  ;;  %v3160_v47 = vld [vmem:[%s4787_s5 + $0x6c] ss:$16 sps:$4 sm:$0xff]   ;;  %v3162_v5 = vld [vmem:[%s4787_s5 + $0x60] ss:$16 sps:$4 sm:$0xff]  }
  0x96   : > { %v918_v30 = vadd.f32 %v902_v25, %v866_v41  ;;  %1122 = vadd.xlane.f32.xlu0 %v4137_v4  ;;  %v1160_v25 = vmul.f32 %v4137_v4, %v4137_v4  ;;  %v747_v7 = vmul.f32 %v4028_v27, %v3676_v13  ;;  %v1059_v50 = vmul.f32 %v3664_v10, %v2849_v57 }
  0x97   : > { %v1074_v36 = vadd.f32 %v1058_v60, %v1022_v35  ;;  %v815_v38 = vadd.f32 %v799_v20, %v762_v52  ;;  %v711_v34 = vadd.f32 %v695_v45, %v643_v31  ;;  %v800_v39 = vmul.f32 %v2817_v63, %v3681_v15  ;;  %v3158_v60 = vld [vmem:[%s4787_s5 + $0x64] ss:$16 sps:$4 sm:$0xff]   ;;  %v2850_v63 = vld [vmem:[%s3567_s29 + $0xca] sm:$0xff]  ;;  %1714 = vmatpush1.bf16.msra.mxu1 %v3157_v14 }
  0x98   : > { %v971_v49 = vadd.f32 %v955_v28, %v918_v30  ;;  %v956_v17 = vmul.f32 %v2818_v29, %v3692_v21  ;;  %v1008_v27 = vmul.f32 %v2834_v6, %v3694_v22  ;;  %v852_v20 = vmul.f32 %v2833_v43, %v3685_v18  ;;  %v2819_v28 = vld [vmem:[%s3567_s29 + $0xd8] sm:$0xff]  ;;  %1602 = vmatprep.subr.bf16.mxu0 %v3158_v60 }
  0x99   : > { %v4167_v40 = vadd.f32 %v3785_v46, %v1074_v36  ;;  %v867_v51 = vadd.f32 %v851_v8, %v815_v38  ;;  %v763_v23 = vadd.f32 %v747_v7, %v711_v34  ;;  %v904_v41 = vmul.f32 %v2849_v57, %v3687_v19  ;;  %v3163_v43 = vld [vmem:[%s4787_s5 + $0x68] ss:$16 sps:$4 sm:$0xff]   ;;  %1715 = vmatprep.subr.bf16.mxu1 %v3160_v47  ;;  %v3166_v14 = vld [vmem:[%s4787_s5 + $0x4c] ss:$16 sps:$4 sm:$0xff]  }
  0x9a   : > { %v1023_v56 = vadd.f32 %v1007_v59, %v971_v49  ;;  %1186 = vadd.xlane.f32.xlu0 %v1160_v25  ;;  %v644_v52 = vmul.f32 %v4061_v44, %v3668_v11  ;;  %v696_v30 = vmul.f32 %v4074_v62, %v3672_v12  ;;  %v748_v31 = vmul.f32 %v4077_v9, %v3676_v13  ;;  %v2851_v13 = vld [vmem:[%s3567_s29 + $0xda] sm:$0xff] }
  0x9b   : > { %1124 = vadd.xlane.f32.xlu1 %v4167_v40  ;;  %v1161_v35 = vmul.f32 %v4167_v40, %v4167_v40  ;;  %v919_v59 = vadd.f32 %v903_v26, %v867_v51  ;;  %v816_v8 = vadd.f32 %v800_v39, %v763_v23  ;;  %v3164_v26 = vld [vmem:[%s4787_s5 + $0x44] ss:$16 sps:$4 sm:$0xff]   ;;  %v1060_v44 = vmul.f32 %v3664_v10, %v2850_v63  ;;  %v3168_v10 = vld [vmem:[%s4787_s5 + $0x40] ss:$16 sps:$4 sm:$0xff]   ;;  %v3169_v49 = vld [vmem:[%s4787_s5 + $0x48] ss:$16 sps:$4 sm:$0xff]  }
  0x9c   : > { %v1075_v57 = vadd.f32 %v1059_v50, %v1023_v56  ;;  %v957_v45 = vmul.f32 %v2819_v28, %v3692_v21  ;;  %v712_v9 = vadd.f32 %v696_v30, %v644_v52  ;;  %v801_v36 = vmul.f32 %v2818_v29, %v3681_v15  ;;  %1603 = vmatpush1.bf16.msra.mxu0 %v3162_v5  ;;  %v3170_v15 = vld [vmem:[%s4787_s5 + $0x24] ss:$16 sps:$4 sm:$0xff]   ;;  %v3246_v39 = vld [vmem:[%s4783_s1 + $0x8] ss:$0 sm:$0xff]  ;;  %v3174_v23 = vld [vmem:[%s4787_s5 + $0x20] ss:$16 sps:$4 sm:$0xff]  }
  0x9d   : > { %v972_v11 = vadd.f32 %v956_v17, %v919_v59  ;;  %v868_v62 = vadd.f32 %v852_v20, %v816_v8  ;;  %v1009_v38 = vmul.f32 %v2835_v54, %v3694_v22  ;;  %v853_v7 = vmul.f32 %v2834_v6, %v3685_v18  ;;  %1716 = vmatpush1.bf16.msra.mxu1 %v3163_v43  ;;  %v3172_v18 = vld [vmem:[%s4787_s5 + $0x2c] ss:$16 sps:$4 sm:$0xff]   ;;  %v2820_v51 = vld [vmem:[%s3567_s29 + $0xe0] sm:$0xff]  ;;  %v3175_v28 = vld [vmem:[%s4787_s5 + $0x28] ss:$16 sps:$4 sm:$0xff]  }
  0x9e   : > { %v4203_v12 = vadd.f32 %v3785_v46, %v1075_v57  ;;  %v764_v34 = vadd.f32 %v748_v31, %v712_v9  ;;  %1604 = vmatprep.subr.bf16.mxu0 %v3164_v26  ;;  %v1061_v60 = vmul.f32 %v3246_v39, %v2851_v13  ;;  %1717 = vmatprep.subr.bf16.mxu1 %v3166_v14  ;;  %v3359_v17 = vmov 0   ;;  %v3178_v59 = vld [vmem:[%s4787_s5 + $0xc] ss:$16 sps:$4 sm:$0xff]   ;;  %v2852_v43 = vld [vmem:[%s3567_s29 + $0xe2] sm:$0xff] }
  0x9f   : > { %1188 = vadd.xlane.f32.xlu1 %v1161_v35  ;;  %v1024_v25 = vadd.f32 %v1008_v27, %v972_v11  ;;  %v920_v50 = vadd.f32 %v904_v41, %v868_v62  ;;  %1626 = vmatprep.mubr.bf16.mxu0 %v3359_v17  ;;  %v905_v56 = vmul.f32 %v2850_v63, %v3687_v19  ;;  %v2836_v41 = vld [vmem:[%s3567_s29 + $0xe1] sm:$0xff] }
  0xa0   : > { %1126 = vadd.xlane.f32.xlu0 %v4203_v12  ;;  %v1162_v29 = vmul.f32 %v4203_v12, %v4203_v12  ;;  %v817_v47 = vadd.f32 %v801_v36, %v764_v34  ;;  %1605 = vmatpush1.bf16.msra.mxu0 %v3168_v10  ;;  %v3176_v19 = vld [vmem:[%s4787_s5 + $0x4] ss:$16 sps:$4 sm:$0xff]   ;;  %v958_v35 = vmul.f32 %v2820_v51, %v3692_v21  ;;  %v3180_v21 = vld [vmem:[%s4787_s5] ss:$16 sps:$4 sm:$0xff]   ;;  %v3181_v30 = vld [vmem:[%s4787_s5 + $0x8] ss:$16 sps:$4 sm:$0xff]  }
  0xa1   : > { %v1076_v6 = vadd.f32 %v1060_v44, %v1024_v25  ;;  %v973_v27 = vadd.f32 %v957_v45, %v920_v50  ;;  %1739 = vmatprep.mubr.bf16.mxu1 %v3359_v17  ;;  %1718 = vmatpush1.bf16.msra.mxu1 %v3169_v49  ;;  %v1010_v54 = vmul.f32 %v2836_v41, %v3694_v22  ;;  %v3182_v13 = vld [vmem:[%s4789_s7 + $0x78] sm:$0xff]  }
  0xa2   : > { %1606 = vmatprep.subr.bf16.mxu0 %v3170_v15  ;;  %v869_v5 = vadd.f32 %v853_v7, %v817_v47  ;;  %1719 = vmatprep.subr.bf16.mxu1 %v3172_v18  ;;  %v1062_v11 = vmul.f32 %v3246_v39, %v2852_v43  ;;  %v3184_v9 = vld [vmem:[%s4789_s7 + $0xf8] sm:$0xff]  }
  0xa3   : > { %v4235_v20 = vadd.f32 %v3785_v46, %v1076_v6  ;;  %v1025_v63 = vadd.f32 %v1009_v38, %v973_v27 }
  0xa4   : > { %1190 = vadd.xlane.f32.xlu0 %v1162_v29  ;;  %v921_v8 = vadd.f32 %v905_v56, %v869_v5  ;;  %1607 = vmatpush1.bf16.msra.mxu0 %v3174_v23 }
  0xa5   : > { %1128 = vadd.xlane.f32.xlu1 %v4235_v20  ;;  %v1163_v52 = vmul.f32 %v4235_v20, %v4235_v20  ;;  %v1077_v57 = vadd.f32 %v1061_v60, %v1025_v63  ;;  %1720 = vmatpush1.bf16.msra.mxu1 %v3175_v28 }
  0xa6   : > { %1608 = vmatprep.subr.bf16.mxu0 %v3176_v19  ;;  %v974_v26 = vadd.f32 %v958_v35, %v921_v8  ;;  %1721 = vmatprep.subr.bf16.mxu1 %v3178_v59 }
  0xa7   : > { %v4260_v31 = vadd.f32 %v3785_v46, %v1077_v57 }
  0xa8   : > { %v1026_v22 = vadd.f32 %v1010_v54, %v974_v26  ;;  %1609 = vmatpush1.bf16.msra.mxu0 %v3180_v21 }
  0xa9   : > { %1192 = vadd.xlane.f32.xlu1 %v1163_v52  ;;  %1130 = vadd.xlane.f32.xlu0 %v4260_v31  ;;  %v1164_v44 = vmul.f32 %v4260_v31, %v4260_v31 }
  0xaa   : > { %1722 = vmatpush1.bf16.msra.mxu1 %v3181_v30  ;;  %v1078_v45 = vadd.f32 %v1062_v11, %v1026_v22  ;;  %2932 = vmatprep.subr.bf16.mxu0 %v3182_v13 }
  0xab   : > { %2996 = vmatprep.subr.bf16.mxu1 %v3184_v9 }
  0xac   : > { %v4266_v14 = vadd.f32 %v3785_v46, %v1078_v45 }
  0xad   : > { %1194 = vadd.xlane.f32.xlu0 %v1164_v44 }
  0xae   : > { %1132 = vadd.xlane.f32.xlu1 %v4266_v14  ;;  %v1165_v62 = vmul.f32 %v4266_v14, %v4266_v14 }
  0xb2   : > { %1196 = vadd.xlane.f32.xlu1 %v1165_v62 }
  0xf5   : > { %v1103_v36 = vpop.xlane.xlu0 %1102 }
  0xf6   : > { %v1134_v46 = vmul.f32 0.25, %v1103_v36 }
  0xf7   : > { %v1167_v10 = vpop.xlane.xlu1 %1166 }
  0xf8   : > { %v1214_v25 = vmul.f32 %v1134_v46, %v1134_v46  ;;  %v1198_v38 = vmul.f32 0.25, %v1167_v10  ;;  %v1262_v62 = vsub.f32 %v3813_v42, %v1134_v46 }
  0xf9   : > { %v1105_v7 = vpop.xlane.xlu0 %1104 }
  0xfa   : > { %v1230_v49 = vsub.f32 %v1198_v38, %v1214_v25  ;;  %v1135_v15 = vmul.f32 0.25, %v1105_v7 }
  0xfb   : > { %v1169_v29 = vpop.xlane.xlu1 %1168 }
  0xfc   : > { %v1246_v50 = vmax.f32 %v1230_v49, 0.0  ;;  %v1215_v34 = vmul.f32 %v1135_v15, %v1135_v15  ;;  %v1199_v18 = vmul.f32 0.25, %v1169_v29  ;;  %v1263_v42 = vsub.f32 %v3828_v33, %v1135_v15  ;;  %v4310_v33 = vld [vmem:[%s4786_s4] ss:$0 sm:$0xff] }
  0xfd   : > { %v1107_v6 = vpop.xlane.xlu0 %1106 }
  0xfe   : > { %v1278_v39 = vadd.f32 1e-06, %v1246_v50  ;;  %v1231_v60 = vsub.f32 %v1199_v18, %v1215_v34  ;;  %v4277_v51 = vmul.f32 0.25, %v1107_v6  ;;  %v4299_v34 = vld [vmem:[%s4785_s3] ss:$0 sm:$0xff] }
  0xff   : > { %v1109_v27 = vpop.xlane.xlu1 %1108 }
 0x100   : > { %3214 = vrsqrt.f32 %v1278_v39  ;;  %v1247_v47 = vmax.f32 %v1231_v60, 0.0  ;;  %v1216_v56 = vmul.f32 %v4277_v51, %v4277_v51  ;;  %v4281_v23 = vmul.f32 0.25, %v1109_v27 }
 0x101   : > { %v1171_v41 = vpop.xlane.xlu0 %1170 }
 0x102   : > { %v1279_v28 = vadd.f32 1e-06, %v1247_v47  ;;  %v1200_v19 = vmul.f32 0.25, %v1171_v41  ;;  %v1217_v5 = vmul.f32 %v4281_v23, %v4281_v23 }
 0x103   : > { %v1173_v63 = vpop.xlane.xlu1 %1172 }
 0x104   : > { %3216 = vrsqrt.f32 %v1279_v28  ;;  %v1232_v35 = vsub.f32 %v1200_v19, %v1216_v56  ;;  %v1201_v59 = vmul.f32 0.25, %v1173_v63 }
 0x105   : > { %v1111_v52 = vpop.xlane.xlu0 %1110 }
 0x106   : > { %v1248_v43 = vmax.f32 %v1232_v35, 0.0  ;;  %v1233_v57 = vsub.f32 %v1201_v59, %v1217_v5  ;;  %v4285_v8 = vmul.f32 0.25, %v1111_v52  ;;  %v1264_v5 = vsub.f32 %v3855_v55, %v4277_v51  ;;  %v3183_v51 = vld [vmem:[%s4789_s7 + $0x38] sm:$0xff]  }
 0x107   : > { %v1113_v54 = vpop.xlane.xlu1 %1112 }
 0x108   : > { %v1280_v21 = vadd.f32 1e-06, %v1248_v43  ;;  %v1249_v30 = vmax.f32 %v1233_v57, 0.0  ;;  %v1218_v26 = vmul.f32 %v4285_v8, %v4285_v8  ;;  %v4289_v11 = vmul.f32 0.25, %v1113_v54 }
 0x109   : > { %v1175_v22 = vpop.xlane.xlu0 %1174  ;;  %v1265_v54 = vsub.f32 %v3879_v58, %v4281_v23  ;;  %v3186_v23 = vld [vmem:[%s4789_s7 + $0x70] sm:$0xff]  }
 0x10a   : > { %3218 = vrsqrt.f32 %v1280_v21  ;;  %v1281_v44 = vadd.f32 1e-06, %v1249_v30  ;;  %v1202_v45 = vmul.f32 0.25, %v1175_v22  ;;  %v1219_v9 = vmul.f32 %v4289_v11, %v4289_v11 }
 0x10b   : > { %v1177_v13 = vpop.xlane.xlu1 %1176 }
 0x10c   : > { %3220 = vrsqrt.f32 %v1281_v44  ;;  %v1234_v36 = vsub.f32 %v1202_v45, %v1218_v26  ;;  %v1203_v10 = vmul.f32 0.25, %v1177_v13 }
 0x10d   : > { %v3215_v25 = vpop.eup %3214  ;;  %v1115_v38 = vpop.xlane.xlu0 %1114 }
 0x10e   : > { %v1250_v7 = vmax.f32 %v1234_v36, 0.0  ;;  %v1235_v49 = vsub.f32 %v1203_v10, %v1219_v9  ;;  %v4294_v29 = vmul.f32 0.25, %v1115_v38  ;;  %v1310_v50 = vmul.f32 %v3215_v25, %v1262_v62  ;;  %v3185_v62 = vld [vmem:[%s4789_s7 + $0xb8] sm:$0xff]   ;;  %v3188_v9 = vld [vmem:[%s4789_s7 + $0xf0] sm:$0xff]  }
 0x110   : > { %v1282_v46 = vadd.f32 1e-06, %v1250_v7  ;;  %v1251_v18 = vmax.f32 %v1235_v49, 0.0  ;;  %v1220_v6 = vmul.f32 %v4294_v29, %v4294_v29  ;;  %v1333_v27 = vmul.f32 %v4299_v34, %v1310_v50 }
 0x111   : > { %v3217_v39 = vpop.eup %3216  ;;  %v1179_v60 = vpop.xlane.xlu0 %1178 }
 0x112   : > { %3222 = vrsqrt.f32 %v1282_v46  ;;  %v1283_v47 = vadd.f32 1e-06, %v1251_v18  ;;  %v1117_v56 = vpop.xlane.xlu1 %1116  ;;  %v1204_v41 = vmul.f32 0.25, %v1179_v60  ;;  %v1311_v28 = vmul.f32 %v3217_v39, %v1263_v42  ;;  %v3187_v18 = vld [vmem:[%s4789_s7 + $0x30] sm:$0xff]   ;;  %v3190_v60 = vld [vmem:[%s4789_s7 + $0x68] sm:$0xff]  }
 0x113   : > { %v4305_v19 = vmul.f32 0.25, %v1117_v56  ;;  %v1356_v52 = vadd.f32 %v4310_v33, %v1333_v27  ;;  %v3192_v27 = vld [vmem:[%s4789_s7 + $0xe8] sm:$0xff]  }
 0x114   : > { %3224 = vrsqrt.f32 %v1283_v47  ;;  %v1236_v15 = vsub.f32 %v1204_v41, %v1220_v6  ;;  %v1334_v63 = vmul.f32 %v4299_v34, %v1311_v28  ;;  %v3189_v6 = vld [vmem:[%s4789_s7 + $0xb0] sm:$0xff]   ;;  %v1266_v47 = vsub.f32 %v3917_v53, %v4285_v8  ;;  %v3191_v53 = vld [vmem:[%s4789_s7 + $0x28] sm:$0xff]  }
 0x115   : > { %v1221_v21 = vmul.f32 %v4305_v19, %v4305_v19 }
 0x116   : > { %v1252_v35 = vmax.f32 %v1236_v15, 0.0  ;;  %v1181_v59 = vpop.xlane.xlu1 %1180  ;;  %v1357_v43 = vadd.f32 %v4310_v33, %v1334_v63  ;;  %v1119_v26 = vpop.xlane.xlu0 %1118  ;;  %v1267_v63 = vsub.f32 %v3945_v16, %v4289_v11  ;;  %v3193_v16 = vld [vmem:[%s4789_s7 + $0xa8] sm:$0xff]  }
 0x117   : > { %v3219_v57 = vpop.eup %3218  ;;  %v1205_v30 = vmul.f32 0.25, %v1181_v59  ;;  %v4321_v44 = vmul.f32 0.25, %v1119_v26 }
 0x118   : > { %v1284_v22 = vadd.f32 1e-06, %v1252_v35  ;;  %v1372_v45 = vpack.c.bf16 %v1357_v43, %v1356_v52  ;;  %v1312_v55 = vmul.f32 %v3219_v57, %v1264_v5 }
 0x119   : > { %v3221_v13 = vpop.eup %3220  ;;  %v1237_v58 = vsub.f32 %v1205_v30, %v1221_v21  ;;  %v1222_v36 = vmul.f32 %v4321_v44, %v4321_v44  ;;  %v3194_v21 = vld [vmem:[%s4789_s7 + $0x60] sm:$0xff]  }
 0x11a   : > { %3226 = vrsqrt.f32 %v1284_v22  ;;  %1627 = vmatmul.mubr.bf16.vlgmr.msra.gmra.mxu0 %v1372_v45  ;;  %1740 = vmatmul.mubr.bf16.vlgmr.msra.gmra.mxu1 %v1372_v45  ;;  %v1313_v10 = vmul.f32 %v3221_v13, %v1265_v54  ;;  %v1121_v38 = vpop.xlane.xlu1 %1120  ;;  %v1183_v7 = vpop.xlane.xlu0 %1182  ;;  %v1335_v49 = vmul.f32 %v4299_v34, %v1312_v55  ;;  %v3196_v30 = vld [vmem:[%s4789_s7 + $0xe0] sm:$0xff]  }
 0x11b   : > { %v1253_v25 = vmax.f32 %v1237_v58, 0.0  ;;  %1636 = vmatprep.mubr.bf16.mxu0 %v3359_v17  ;;  %1749 = vmatprep.mubr.bf16.mxu1 %v3359_v17  ;;  %v4340_v50 = vmul.f32 0.25, %v1121_v38  ;;  %v1206_v42 = vmul.f32 0.25, %v1183_v7  ;;  %v3198_v38 = vld [vmem:[%s4789_s7 + $0x58] sm:$0xff]  }
 0x11c   : > { %v1336_v46 = vmul.f32 %v4299_v34, %v1313_v10  ;;  %2933 = vmatpush3.bf16.msra.mxu0 %v3183_v51  ;;  %2997 = vmatpush3.bf16.msra.mxu1 %v3185_v62  ;;  %v1358_v41 = vadd.f32 %v4310_v33, %v1335_v49  ;;  %v3200_v7 = vld [vmem:[%s4789_s7 + $0xd8] sm:$0xff]  }
 0x11d   : > { %v1285_v39 = vadd.f32 1e-06, %v1253_v25  ;;  %2934 = vmatprep.subr.bf16.mxu0 %v3186_v23  ;;  %2998 = vmatprep.subr.bf16.mxu1 %v3188_v9  ;;  %v1238_v56 = vsub.f32 %v1206_v42, %v1222_v36  ;;  %v1223_v5 = vmul.f32 %v4340_v50, %v4340_v50  ;;  %v3195_v9 = vld [vmem:[%s4789_s7 + $0x20] sm:$0xff]  }
 0x11e   : > { %v1359_v28 = vadd.f32 %v4310_v33, %v1336_v46  ;;  %v1185_v35 = vpop.xlane.xlu1 %1184  ;;  %v3197_v36 = vld [vmem:[%s4789_s7 + $0xa0] sm:$0xff]  }
 0x11f   : > { %v3223_v15 = vpop.eup %3222  ;;  %3228 = vrsqrt.f32 %v1285_v39  ;;  %v1254_v59 = vmax.f32 %v1238_v56, 0.0  ;;  %v1207_v52 = vmul.f32 0.25, %v1185_v35  ;;  %v1123_v43 = vpop.xlane.xlu0 %1122  ;;  %v3201_v56 = vld [vmem:[%s4789_s7 + $0x98] sm:$0xff]  }
 0x120   : > { %v1373_v57 = vpack.c.bf16 %v1359_v28, %v1358_v41  ;;  %v1314_v54 = vmul.f32 %v3223_v15, %v1266_v47  ;;  %2935 = vmatpush3.bf16.msra.mxu0 %v3187_v18  ;;  %2999 = vmatpush3.bf16.msra.mxu1 %v3189_v6  ;;  %v4369_v11 = vmul.f32 0.25, %v1123_v43  ;;  %v1268_v6 = vsub.f32 %v3999_v24, %v4294_v29  ;;  %v3199_v47 = vld [vmem:[%s4789_s7 + $0x18] sm:$0xff]  }
 0x121   : > { %v3225_v8 = vpop.eup %3224  ;;  %2936 = vmatprep.subr.bf16.mxu0 %v3190_v60  ;;  %3000 = vmatprep.subr.bf16.mxu1 %v3192_v27  ;;  %v1286_v26 = vadd.f32 1e-06, %v1254_v59  ;;  %v1239_v22 = vsub.f32 %v1207_v52, %v1223_v5  ;;  %v3204_v5 = vld [vmem:[%s4789_s7 + $0xd0] sm:$0xff]   ;;  %v1269_v59 = vsub.f32 %v4038_v37, %v4305_v19 }
 0x122   : > { %1637 = vmatmul.mubr.bf16.gmra.mxu0 %v1373_v57  ;;  %1750 = vmatmul.mubr.bf16.gmra.mxu1 %v1373_v57  ;;  %v1315_v45 = vmul.f32 %v3225_v8, %v1267_v63  ;;  %v1337_v55 = vmul.f32 %v4299_v34, %v1314_v54  ;;  %v1224_v51 = vmul.f32 %v4369_v11, %v4369_v11  ;;  %v3202_v63 = vld [vmem:[%s4789_s7 + $0x50] sm:$0xff]  }
 0x123   : > { %1646 = vmatprep.mubr.bf16.mxu0 %v3359_v17  ;;  %1759 = vmatprep.mubr.bf16.mxu1 %v3359_v17  ;;  %3230 = vrsqrt.f32 %v1286_v26  ;;  %v1255_v62 = vmax.f32 %v1239_v22, 0.0  ;;  %v1187_v58 = vpop.xlane.xlu0 %1186  ;;  %v3205_v37 = vld [vmem:[%s4789_s7 + $0x90] sm:$0xff]  }
 0x124   : > { %v1125_v13 = vpop.xlane.xlu1 %1124  ;;  %v1338_v23 = vmul.f32 %v4299_v34, %v1315_v45  ;;  %2937 = vmatpush3.bf16.msra.mxu0 %v3191_v53  ;;  %3001 = vmatpush3.bf16.msra.mxu1 %v3193_v16  ;;  %v1208_v25 = vmul.f32 0.25, %v1187_v58  ;;  %v1360_v42 = vadd.f32 %v4310_v33, %v1337_v55  ;;  %v3203_v53 = vld [vmem:[%s4789_s7 + $0x10] sm:$0xff]   ;;  %v3207_v58 = vld [vmem:[%s4789_s7 + $0x8] sm:$0xff]  }
 0x125   : > { %v4389_v10 = vmul.f32 0.25, %v1125_v13  ;;  %2938 = vmatprep.subr.bf16.mxu0 %v3194_v21  ;;  %3002 = vmatprep.subr.bf16.mxu1 %v3196_v30  ;;  %v1287_v49 = vadd.f32 1e-06, %v1255_v62  ;;  %v3206_v30 = vld [vmem:[%s4789_s7 + $0x48] sm:$0xff]   ;;  %v1270_v62 = vsub.f32 %v4071_v32, %v4321_v44 }
 0x126   : > { %v1361_v46 = vadd.f32 %v4310_v33, %v1338_v23  ;;  %v1240_v39 = vsub.f32 %v1208_v25, %v1224_v51 }
 0x127   : > { %v3227_v18 = vpop.eup %3226  ;;  %3232 = vrsqrt.f32 %v1287_v49  ;;  %v1225_v41 = vmul.f32 %v4389_v10, %v4389_v10 }
 0x128   : > { %v1189_v60 = vpop.xlane.xlu1 %1188  ;;  %v1374_v27 = vpack.c.bf16 %v1361_v46, %v1360_v42  ;;  %2939 = vmatpush3.bf16.msra.mxu0 %v3195_v9  ;;  %3003 = vmatpush3.bf16.msra.mxu1 %v3197_v36  ;;  %v1256_v28 = vmax.f32 %v1240_v39, 0.0  ;;  %v1316_v29 = vmul.f32 %v3227_v18, %v1268_v6  ;;  %v1271_v46 = vsub.f32 %v4106_v48, %v4340_v50 }
 0x129   : > { %v1209_v15 = vmul.f32 0.25, %v1189_v60  ;;  %v1127_v24 = vpop.xlane.xlu0 %1126  ;;  %2940 = vmatprep.subr.bf16.mxu0 %v3198_v38  ;;  %3004 = vmatprep.subr.bf16.mxu1 %v3200_v7 }
 0x12a   : > { %v4415_v35 = vmul.f32 0.25, %v1127_v24  ;;  %1647 = vmatmul.mubr.bf16.gmra.mxu0 %v1374_v27  ;;  %1760 = vmatmul.mubr.bf16.gmra.mxu1 %v1374_v27  ;;  %v1288_v52 = vadd.f32 1e-06, %v1256_v28  ;;  %v1339_v21 = vmul.f32 %v4299_v34, %v1316_v29 }
 0x12b   : > { %v1241_v43 = vsub.f32 %v1209_v15, %v1225_v41  ;;  %1656 = vmatprep.mubr.bf16.mxu0 %v3359_v17  ;;  %1769 = vmatprep.mubr.bf16.mxu1 %v3359_v17  ;;  %v1272_v15 = vsub.f32 %v4137_v4, %v4369_v11 }
 0x12c   : > { %v3229_v57 = vpop.eup %3228  ;;  %v1226_v54 = vmul.f32 %v4415_v35, %v4415_v35  ;;  %2941 = vmatpush3.bf16.msra.mxu0 %v3199_v47  ;;  %3005 = vmatpush3.bf16.msra.mxu1 %v3201_v56  ;;  %3234 = vrsqrt.f32 %v1288_v52  ;;  %v1362_v9 = vadd.f32 %v4310_v33, %v1339_v21 }
 0x12d   : > { %v1257_v19 = vmax.f32 %v1241_v43, 0.0  ;;  %v1191_v16 = vpop.xlane.xlu0 %1190  ;;  %v1317_v8 = vmul.f32 %v3229_v57, %v1269_v59  ;;  %2942 = vmatprep.subr.bf16.mxu0 %v3202_v63  ;;  %3006 = vmatprep.subr.bf16.mxu1 %v3204_v5 }
 0x12e   : > { %v1129_v26 = vpop.xlane.xlu1 %1128  ;;  %v1210_v22 = vmul.f32 0.25, %v1191_v16 }
 0x12f   : > { %v1289_v45 = vadd.f32 1e-06, %v1257_v19  ;;  %v4433_v55 = vmul.f32 0.25, %v1129_v26  ;;  %v1340_v51 = vmul.f32 %v4299_v34, %v1317_v8 }
 0x130   : > { %v1242_v13 = vsub.f32 %v1210_v22, %v1226_v54  ;;  %2943 = vmatpush3.bf16.msra.mxu0 %v3203_v53  ;;  %3007 = vmatpush3.bf16.msra.mxu1 %v3205_v37  ;;  %v3231_v23 = vpop.eup %3230  ;;  %v1273_v37 = vsub.f32 %v4167_v40, %v4389_v10  ;;  %v1274_v10 = vsub.f32 %v4203_v12, %v4415_v35 }
 0x131   : > { %3236 = vrsqrt.f32 %v1289_v45  ;;  %v1363_v36 = vadd.f32 %v4310_v33, %v1340_v51  ;;  %2944 = vmatprep.subr.bf16.mxu0 %v3206_v30  ;;  %v1318_v7 = vmul.f32 %v3231_v23, %v1270_v62  ;;  %v1227_v32 = vmul.f32 %v4433_v55, %v4433_v55 }
 0x132   : > { %v1258_v25 = vmax.f32 %v1242_v13, 0.0  ;;  %v1193_v38 = vpop.xlane.xlu1 %1192  ;;  %v1131_v49 = vpop.xlane.xlu0 %1130 }
 0x133   : > { %v1211_v44 = vmul.f32 0.25, %v1193_v38  ;;  %v1375_v42 = vpack.c.bf16 %v1363_v36, %v1362_v9  ;;  %v4447_v6 = vmul.f32 0.25, %v1131_v49  ;;  %v1341_v56 = vmul.f32 %v4299_v34, %v1318_v7 }
 0x134   : > { %v1290_v18 = vadd.f32 1e-06, %v1258_v25  ;;  %2945 = vmatpush3.bf16.msra.mxu0 %v3207_v58  ;;  %v3233_v39 = vpop.eup %3232  ;;  %v1275_v9 = vsub.f32 %v4235_v20, %v4433_v55 }
 0x135   : > { %v1243_v60 = vsub.f32 %v1211_v44, %v1227_v32  ;;  %1657 = vmatmul.mubr.bf16.gmra.mxu0 %v1375_v42  ;;  %1770 = vmatmul.mubr.bf16.gmra.mxu1 %v1375_v42  ;;  %v1228_v27 = vmul.f32 %v4447_v6, %v4447_v6  ;;  %v1319_v47 = vmul.f32 %v3233_v39, %v1271_v46 }
 0x136   : > { %3238 = vrsqrt.f32 %v1290_v18  ;;  %1666 = vmatprep.mubr.bf16.mxu0 %v3359_v17  ;;  %1779 = vmatprep.mubr.bf16.mxu1 %v3359_v17  ;;  %v1195_v50 = vpop.xlane.xlu0 %1194  ;;  %v1364_v52 = vadd.f32 %v4310_v33, %v1341_v56  ;;  %v1276_v20 = vsub.f32 %v4260_v31, %v4447_v6  ;;  %v1412_v56 = vld [vmem:[%s4788_s6] sm:$0xf] }
 0x137   : > { %v1259_v48 = vmax.f32 %v1243_v60, 0.0  ;;  %v1212_v41 = vmul.f32 0.25, %v1195_v50  ;;  %v1342_v28 = vmul.f32 %v4299_v34, %v1319_v47  ;;  %v1133_v29 = vpop.xlane.xlu1 %1132  ;;  %v3213_v47 = vld [vmem:[%s4789_s7 + $0x80] sm:$0xff]   ;;  %v4513_v50 = vrot.slane %v1412_v56, %v731_v2 }
 0x138   : > { %v1149_v5 = vmul.f32 0.25, %v1133_v29 }
 0x139   : > { %v1291_v24 = vadd.f32 1e-06, %v1259_v48  ;;  %v3235_v63 = vpop.eup %3234  ;;  %v1244_v59 = vsub.f32 %v1212_v41, %v1228_v27  ;;  %v1365_v43 = vadd.f32 %v4310_v33, %v1342_v28  ;;  %v3212_v27 = vld [vmem:[%s4789_s7 + $0xc0] sm:$0xff]   ;;  %v4509_v48 = vrot.slane %v1412_v56, %v627_v0 }
 0x13a   : > { %v1320_v57 = vmul.f32 %v3235_v63, %v1272_v15  ;;  %v1229_v8 = vmul.f32 %v1149_v5, %v1149_v5  ;;  %v1277_v49 = vsub.f32 %v4266_v14, %v1149_v5  ;;  %v3208_v14 = vld [vmem:[%s4789_s7 + $0xc8] sm:$0xff]   ;;  %v4517_v15 = vrot.slane %v1412_v56, %v679_v1 }
 0x13b   : > { %3240 = vrsqrt.f32 %v1291_v24  ;;  %v1260_v54 = vmax.f32 %v1244_v59, 0.0  ;;  %v1376_v53 = vpack.c.bf16 %v1365_v43, %v1364_v52  ;;  %v1197_v19 = vpop.xlane.xlu1 %1196  ;;  %3008 = vmatprep.subr.bf16.mxu1 %v3208_v14  ;;  %v4521_v24 = vrot.slane %v1412_v56, %v784_v3 }
 0x13c   : > { %v1213_v11 = vmul.f32 0.25, %v1197_v19  ;;  %v1343_v30 = vmul.f32 %v4299_v34, %v1320_v57 }
 0x13d   : > { %v1292_v4 = vadd.f32 1e-06, %v1260_v54  ;;  %1667 = vmatmul.mubr.bf16.gmra.mxu0 %v1376_v53  ;;  %1780 = vmatmul.mubr.bf16.gmra.mxu1 %v1376_v53 }
 0x13e   : > { %v3237_v16 = vpop.eup %3236  ;;  %1676 = vmatprep.mubr.bf16.mxu0 %v3359_v17  ;;  %1789 = vmatprep.mubr.bf16.mxu1 %v3359_v17  ;;  %v1245_v26 = vsub.f32 %v1213_v11, %v1229_v8  ;;  %v1366_v51 = vadd.f32 %v4310_v33, %v1343_v30 }
 0x13f   : > { %v1321_v21 = vmul.f32 %v3237_v16, %v1273_v37  ;;  %3242 = vrsqrt.f32 %v1292_v4 }
 0x140   : > { %v1261_v45 = vmax.f32 %v1245_v26, 0.0 }
 0x141   : > { %v1344_v22 = vmul.f32 %v4299_v34, %v1321_v21 }
 0x142   : > { %v1293_v13 = vadd.f32 1e-06, %v1261_v45 }
 0x143   : > { %v3239_v40 = vpop.eup %3238  ;;  %v1367_v62 = vadd.f32 %v4310_v33, %v1344_v22 }
 0x144   : > { %v1322_v23 = vmul.f32 %v3239_v40, %v1274_v10  ;;  %3244 = vrsqrt.f32 %v1293_v13 }
 0x145   : > { %v1377_v58 = vpack.c.bf16 %v1367_v62, %v1366_v51 }
 0x146   : > { %v1345_v12 = vmul.f32 %v4299_v34, %v1322_v23 }
 0x147   : > { %1677 = vmatmul.mubr.bf16.gmra.mxu0 %v1377_v58  ;;  %1790 = vmatmul.mubr.bf16.gmra.mxu1 %v1377_v58 }
 0x148   : > { %v3241_v36 = vpop.eup %3240  ;;  %1686 = vmatprep.mubr.bf16.mxu0 %v3359_v17  ;;  %1799 = vmatprep.mubr.bf16.mxu1 %v3359_v17  ;;  %v1368_v7 = vadd.f32 %v4310_v33, %v1345_v12 }
 0x149   : > { %v1323_v25 = vmul.f32 %v3241_v36, %v1275_v9 }
 0x14b   : > { %v1346_v35 = vmul.f32 %v4299_v34, %v1323_v25 }
 0x14c   : > { %v3243_v38 = vpop.eup %3242 }
 0x14d   : > { %v1369_v32 = vadd.f32 %v4310_v33, %v1346_v35  ;;  %v1324_v44 = vmul.f32 %v3243_v38, %v1276_v20 }
 0x14f   : > { %v1378_v55 = vpack.c.bf16 %v1369_v32, %v1368_v7  ;;  %v1347_v18 = vmul.f32 %v4299_v34, %v1324_v44 }
 0x151   : > { %1687 = vmatmul.mubr.bf16.gmra.mxu0 %v1378_v55  ;;  %1800 = vmatmul.mubr.bf16.gmra.mxu1 %v1378_v55  ;;  %v3245_v42 = vpop.eup %3244  ;;  %v1370_v60 = vadd.f32 %v4310_v33, %v1347_v18 }
 0x152   : > { %1696 = vmatprep.mubr.bf16.mxu0 %v3359_v17  ;;  %1809 = vmatprep.mubr.bf16.mxu1 %v3359_v17  ;;  %v1325_v46 = vmul.f32 %v3245_v42, %v1277_v49  ;;  %v3209_v17 = vld [vmem:[%s4789_s7 + $0x88] sm:$0xff]  }
 0x153   : > { %3009 = vmatpush3.bf16.msra.mxu1 %v3209_v17 }
 0x154   : > { %v1348_v39 = vmul.f32 %v4299_v34, %v1325_v46  ;;  %v3210_v34 = vld [vmem:[%s4789_s7 + $0x40] sm:$0xff]   ;;  %3010 = vmatprep.subr.bf16.mxu1 %v3212_v27 }
 0x155   : > { %2946 = vmatprep.subr.bf16.mxu0 %v3210_v34 }
 0x156   : > { %v1371_v31 = vadd.f32 %v4310_v33, %v1348_v39  ;;  %v3211_v33 = vld [vmem:[%s4789_s7] sm:$0xff]  }
 0x157   : > { %2947 = vmatpush3.bf16.msra.mxu0 %v3211_v33  ;;  %3011 = vmatpush3.bf16.msra.mxu1 %v3213_v47 }
 0x158   : > { %v1379_v6 = vpack.c.bf16 %v1371_v31, %v1370_v60 }
 0x15a   : > { %1697 = vmatmul.mubr.bf16.gmra.mxu0 %v1379_v6  ;;  %1810 = vmatmul.mubr.bf16.gmra.mxu1 %v1379_v6 }
 0x1da   : > { %v1628_v41 = vpop.f32.mrf.mxu0  ;;  %v1741_v28 = vpop.f32.mrf.mxu1 }
 0x1db   : > { %v1629_v29 = vadd.f32 %v1628_v41, %v4509_v48  ;;  %v1742_v63 = vadd.f32 %v1741_v28, %v4513_v50 }
 0x1dc   : > { %v1630_v0 = vpop.f32.mrf.mxu0  ;;  %v1743_v5 = vpop.f32.mrf.mxu1 }
 0x1dd   : > { %vm1820_vm0 = vcmp.ge.f32.partialorder %v1629_v29, 0.0  ;;  %v1631_v2 = vadd.f32 %v1630_v0, %v4517_v15  ;;  %v1744_v59 = vadd.f32 %v1743_v5, %v4521_v24  ;;  %v1884_v57 = vmul.f32 0.01, %v1629_v29 }
 0x1de   : > { %v1632_v52 = vpop.f32.mrf.mxu0  ;;  %v1745_v43 = vpop.f32.mrf.mxu1  ;;  %vm1822_vm1 = vcmp.ge.f32.partialorder %v1742_v63, 0.0  ;;  %v1886_v3 = vmul.f32 0.01, %v1742_v63 }
 0x1df   : > { %v1633_v1 = vadd.f32 %v1632_v52, %v4509_v48  ;;  %v1746_v61 = vadd.f32 %v1745_v43, %v4513_v50  ;;  %v1885_v54 = vmul.f32 0.01, %v1631_v2  ;;  %v1887_v53 = vmul.f32 0.01, %v1744_v59 }
 0x1e0   : > { %v1634_v37 = vpop.f32.mrf.mxu0  ;;  %v1747_v19 = vpop.f32.mrf.mxu1  ;;  %vm1821_vm4 = vcmp.ge.f32.partialorder %v1631_v2, 0.0  ;;  %vm1823_vm5 = vcmp.ge.f32.partialorder %v1744_v59, 0.0  ;;  %v1948_v26 = vsel %vm1820_vm0, %v1629_v29, %v1884_v57  ;;  %v1950_v10 = vsel %vm1822_vm1, %v1742_v63, %v1886_v3 }
 0x1e1   : > { %vm1824_vm2 = vcmp.ge.f32.partialorder %v1633_v1, 0.0  ;;  %v1888_v16 = vmul.f32 0.01, %v1633_v1  ;;  %vm1826_vm3 = vcmp.ge.f32.partialorder %v1746_v61, 0.0  ;;  %v1890_v8 = vmul.f32 0.01, %v1746_v61 }
 0x1e2   : > { %v1635_v4 = vadd.f32 %v1634_v37, %v4517_v15  ;;  %v1748_v11 = vadd.f32 %v1747_v19, %v4521_v24  ;;  %v1638_v21 = vpop.f32.mrf.mxu0  ;;  %v1751_v30 = vpop.f32.mrf.mxu1  ;;  %v1949_v9 = vsel %vm1821_vm4, %v1631_v2, %v1885_v54  ;;  %v1951_v36 = vsel %vm1823_vm5, %v1744_v59, %v1887_v53 }
 0x1e3   : > { %v1952_v22 = vsel %vm1824_vm2, %v1633_v1, %v1888_v16  ;;  %v1954_v45 = vsel %vm1826_vm3, %v1746_v61, %v1890_v8  ;;  %v4533_v40 = vadd.f32 %v1638_v21, %v4509_v48  ;;  %v4537_v62 = vadd.f32 %v1751_v30, %v4513_v50 }
 0x1e4   : > { %vm1825_vm6 = vcmp.ge.f32.partialorder %v1635_v4, 0.0  ;;  %v1889_v51 = vmul.f32 0.01, %v1635_v4  ;;  %v1640_v13 = vpop.f32.mrf.mxu0  ;;  %v1753_v58 = vpop.f32.mrf.mxu1  ;;  %vm1827_vm7 = vcmp.ge.f32.partialorder %v1748_v11, 0.0  ;;  %v1891_v23 = vmul.f32 0.01, %v1748_v11 }
 0x1e5   : > { %v2012_v25 = vpack.c.bf16 %v1952_v22, %v1948_v26  ;;  %v2014_v12 = vpack.c.bf16 %v1954_v45, %v1950_v10  ;;  %v1641_v35 = vadd.f32 %v1640_v13, %v4517_v15  ;;  %v1754_v38 = vadd.f32 %v1753_v58, %v4521_v24 }
 0x1e6   : > { %v1642_v7 = vpop.f32.mrf.mxu0  ;;  %v1755_v32 = vpop.f32.mrf.mxu1  ;;  %vm1828_vm8 = vcmp.ge.f32.partialorder %v4533_v40, 0.0  ;;  %v1953_v55 = vsel %vm1825_vm6, %v1635_v4, %v1889_v51  ;;  %v1955_v44 = vsel %vm1827_vm7, %v1748_v11, %v1891_v23  ;;  %v1892_v49 = vmul.f32 0.01, %v4533_v40 }
 0x1e7   : > { %v4545_v20 = vadd.f32 %v1642_v7, %v4509_v48  ;;  %vm1830_vm9 = vcmp.ge.f32.partialorder %v4537_v62, 0.0  ;;  %v1894_v42 = vmul.f32 0.01, %v4537_v62  ;;  %v1756_v46 = vadd.f32 %v1755_v32, %v4513_v50 }
 0x1e8   : > { %v1644_v18 = vpop.f32.mrf.mxu0  ;;  %v1757_v39 = vpop.f32.mrf.mxu1  ;;  %vm1829_vm10 = vcmp.ge.f32.partialorder %v1641_v35, 0.0  ;;  %v1893_v60 = vmul.f32 0.01, %v1641_v35  ;;  %vm1831_vm11 = vcmp.ge.f32.partialorder %v1754_v38, 0.0  ;;  %v1895_v31 = vmul.f32 0.01, %v1754_v38 }
 0x1e9   : > { %v1645_v6 = vadd.f32 %v1644_v18, %v4517_v15  ;;  %v1758_v14 = vadd.f32 %v1757_v39, %v4521_v24  ;;  %v2013_v17 = vpack.c.bf16 %v1953_v55, %v1949_v9  ;;  %v2015_v34 = vpack.c.bf16 %v1955_v44, %v1951_v36 }
 0x1ea   : > { %v1648_v33 = vpop.f32.mrf.mxu0  ;;  %v1761_v27 = vpop.f32.mrf.mxu1  ;;  %vm1832_vm12 = vcmp.ge.f32.partialorder %v4545_v20, 0.0  ;;  %v1896_v47 = vmul.f32 0.01, %v4545_v20  ;;  %vm1834_vm15 = vcmp.ge.f32.partialorder %v1756_v46, 0.0  ;;  %v1898_v5 = vmul.f32 0.01, %v1756_v46 }
 0x1eb   : > { %v4557_v56 = vadd.f32 %v1648_v33, %v4509_v48  ;;  %v4560_v41 = vadd.f32 %v1761_v27, %v4513_v50  ;;  %vm1833_vm13 = vcmp.ge.f32.partialorder %v1645_v6, 0.0  ;;  %v1897_v28 = vmul.f32 0.01, %v1645_v6  ;;  %2339 = vmatprep.mubr.bf16.mxu0 %v2013_v17  ;;  %2436 = vmatprep.mubr.bf16.mxu1 %v2015_v34 }
 0x1ec   : > { %vm1835_vm14 = vcmp.ge.f32.partialorder %v1758_v14, 0.0  ;;  %v1899_v29 = vmul.f32 0.01, %v1758_v14  ;;  %v1650_v63 = vpop.f32.mrf.mxu0  ;;  %v1763_v0 = vpop.f32.mrf.mxu1  ;;  %2340 = vmatmul.mubr.bf16.vlgmr.msra.gmra.mxu0 %v2012_v25  ;;  %2437 = vmatmul.mubr.bf16.vlgmr.msra.gmra.mxu1 %v2014_v12  ;;  %v1957_v2 = vsel %vm1829_vm10, %v1641_v35, %v1893_v60  ;;  %v1959_v59 = vsel %vm1831_vm11, %v1754_v38, %v1895_v31 }
 0x1ed   : > { %v1651_v52 = vadd.f32 %v1650_v63, %v4517_v15  ;;  %v1764_v43 = vadd.f32 %v1763_v0, %v4521_v24  ;;  %v1961_v61 = vsel %vm1833_vm13, %v1645_v6, %v1897_v28  ;;  %vm1836_vm0 = vcmp.ge.f32.partialorder %v4557_v56, 0.0 }
 0x1ee   : > { %v1652_v57 = vpop.f32.mrf.mxu0  ;;  %v1765_v1 = vpop.f32.mrf.mxu1  ;;  %v1963_v3 = vsel %vm1835_vm14, %v1758_v14, %v1899_v29  ;;  %v2017_v53 = vpack.c.bf16 %v1961_v61, %v1957_v2  ;;  %v1900_v19 = vmul.f32 0.01, %v4557_v56  ;;  %v1902_v16 = vmul.f32 0.01, %v4560_v41 }
 0x1ef   : > { %v1653_v54 = vadd.f32 %v1652_v57, %v4509_v48  ;;  %v2019_v37 = vpack.c.bf16 %v1963_v3, %v1959_v59  ;;  %v1901_v8 = vmul.f32 0.01, %v1651_v52  ;;  %v1766_v4 = vadd.f32 %v1765_v1, %v4513_v50 }
 0x1f0   : > { %v1654_v11 = vpop.f32.mrf.mxu0  ;;  %v1767_v21 = vpop.f32.mrf.mxu1  ;;  %vm1837_vm1 = vcmp.ge.f32.partialorder %v1651_v52, 0.0  ;;  %vm1839_vm2 = vcmp.ge.f32.partialorder %v1764_v43, 0.0  ;;  %v1903_v30 = vmul.f32 0.01, %v1764_v43  ;;  %2347 = vmatprep.mubr.bf16.mxu0 %v2017_v53  ;;  %v1956_v10 = vsel %vm1828_vm8, %v4533_v40, %v1892_v49 }
 0x1f1   : > { %v1904_v26 = vmul.f32 0.01, %v1653_v54  ;;  %2444 = vmatprep.mubr.bf16.mxu1 %v2019_v37  ;;  %v1655_v22 = vadd.f32 %v1654_v11, %v4517_v15  ;;  %v1768_v45 = vadd.f32 %v1767_v21, %v4521_v24  ;;  %v1960_v51 = vsel %vm1832_vm12, %v4545_v20, %v1896_v47 }
 0x1f2   : > { %vm1840_vm3 = vcmp.ge.f32.partialorder %v1653_v54, 0.0  ;;  %v2016_v13 = vpack.c.bf16 %v1960_v51, %v1956_v10  ;;  %v1958_v58 = vsel %vm1830_vm9, %v4537_v62, %v1894_v42  ;;  %v1962_v23 = vsel %vm1834_vm15, %v1756_v46, %v1898_v5 }
 0x1f3   : > { %vm1841_vm4 = vcmp.ge.f32.partialorder %v1655_v22, 0.0  ;;  %v1905_v9 = vmul.f32 0.01, %v1655_v22  ;;  %vm1843_vm5 = vcmp.ge.f32.partialorder %v1768_v45, 0.0  ;;  %v1907_v36 = vmul.f32 0.01, %v1768_v45 }
 0x1f4   : > { %vm1842_vm6 = vcmp.ge.f32.partialorder %v1766_v4, 0.0  ;;  %v1906_v25 = vmul.f32 0.01, %v1766_v4  ;;  %2348 = vmatmul.mubr.bf16.gmra.mxu0 %v2016_v13  ;;  %v2018_v40 = vpack.c.bf16 %v1962_v23, %v1958_v58  ;;  %v1965_v38 = vsel %vm1837_vm1, %v1651_v52, %v1901_v8 }
 0x1f5   : > { %v1658_v12 = vpop.f32.mrf.mxu0  ;;  %v1771_v35 = vpop.f32.mrf.mxu1  ;;  %v1969_v7 = vsel %vm1841_vm4, %v1655_v22, %v1905_v9  ;;  %v1967_v32 = vsel %vm1839_vm2, %v1764_v43, %v1903_v30  ;;  %v1971_v20 = vsel %vm1843_vm5, %v1768_v45, %v1907_v36  ;;  %v1968_v62 = vsel %vm1840_vm3, %v1653_v54, %v1904_v26 }
 0x1f6   : > { %2445 = vmatmul.mubr.bf16.gmra.mxu1 %v2018_v40  ;;  %v1659_v55 = vadd.f32 %v1658_v12, %v4509_v48  ;;  %v1772_v44 = vadd.f32 %v1771_v35, %v4513_v50  ;;  %v2021_v46 = vpack.c.bf16 %v1969_v7, %v1965_v38  ;;  %v2023_v18 = vpack.c.bf16 %v1971_v20, %v1967_v32 }
 0x1f7   : > { %v1660_v49 = vpop.f32.mrf.mxu0  ;;  %v1773_v42 = vpop.f32.mrf.mxu1  ;;  %vm1838_vm7 = vcmp.ge.f32.partialorder %v4560_v41, 0.0  ;;  %v1964_v6 = vsel %vm1836_vm0, %v4557_v56, %v1900_v19  ;;  %v1970_v14 = vsel %vm1842_vm6, %v1766_v4, %v1906_v25 }
 0x1f8   : > { %v1661_v39 = vadd.f32 %v1660_v49, %v4517_v15  ;;  %2355 = vmatprep.mubr.bf16.mxu0 %v2021_v46  ;;  %2452 = vmatprep.mubr.bf16.mxu1 %v2023_v18  ;;  %v1774_v17 = vadd.f32 %v1773_v42, %v4521_v24  ;;  %v2020_v27 = vpack.c.bf16 %v1968_v62, %v1964_v6  ;;  %vm1844_vm8 = vcmp.ge.f32.partialorder %v1659_v55, 0.0 }
 0x1f9   : > { %v1662_v60 = vpop.f32.mrf.mxu0  ;;  %v1775_v31 = vpop.f32.mrf.mxu1  ;;  %v1908_v47 = vmul.f32 0.01, %v1659_v55  ;;  %vm1846_vm9 = vcmp.ge.f32.partialorder %v1772_v44, 0.0  ;;  %v1966_v63 = vsel %vm1838_vm7, %v4560_v41, %v1902_v16  ;;  %v1910_v43 = vmul.f32 0.01, %v1772_v44 }
 0x1fa   : > { %v1663_v34 = vadd.f32 %v1662_v60, %v4509_v48  ;;  %v1776_v33 = vadd.f32 %v1775_v31, %v4513_v50  ;;  %v1909_v0 = vmul.f32 0.01, %v1661_v39  ;;  %v2022_v2 = vpack.c.bf16 %v1970_v14, %v1966_v63 }
 0x1fb   : > { %v1664_v28 = vpop.f32.mrf.mxu0  ;;  %v1777_v29 = vpop.f32.mrf.mxu1  ;;  %vm1845_vm12 = vcmp.ge.f32.partialorder %v1661_v39, 0.0  ;;  %vm1847_vm13 = vcmp.ge.f32.partialorder %v1774_v17, 0.0  ;;  %v1911_v57 = vmul.f32 0.01, %v1774_v17  ;;  %v1972_v19 = vsel %vm1844_vm8, %v1659_v55, %v1908_v47 }
 0x1fc   : > { %v1912_v56 = vmul.f32 0.01, %v1663_v34  ;;  %v1914_v5 = vmul.f32 0.01, %v1776_v33  ;;  %vm1848_vm10 = vcmp.ge.f32.partialorder %v1663_v34, 0.0  ;;  %vm1850_vm11 = vcmp.ge.f32.partialorder %v1776_v33, 0.0  ;;  %2356 = vmatmul.mubr.bf16.gmra.mxu0 %v2020_v27 }
 0x1fd   : > { %v1665_v59 = vadd.f32 %v1664_v28, %v4517_v15  ;;  %v1778_v52 = vadd.f32 %v1777_v29, %v4521_v24  ;;  %v1668_v1 = vpop.f32.mrf.mxu0  ;;  %v1781_v61 = vpop.f32.mrf.mxu1  ;;  %v1973_v11 = vsel %vm1845_vm12, %v1661_v39, %v1909_v0  ;;  %v1975_v51 = vsel %vm1847_vm13, %v1774_v17, %v1911_v57 }
 0x1fe   : > { %2453 = vmatmul.mubr.bf16.gmra.mxu1 %v2022_v2  ;;  %v1669_v54 = vadd.f32 %v1668_v1, %v4509_v48  ;;  %v1976_v16 = vsel %vm1848_vm10, %v1663_v34, %v1912_v56  ;;  %v1978_v8 = vsel %vm1850_vm11, %v1776_v33, %v1914_v5  ;;  %v4611_v26 = vadd.f32 %v1781_v61, %v4513_v50 }
 0x1ff   : > { %vm1849_vm14 = vcmp.ge.f32.partialorder %v1665_v59, 0.0  ;;  %v1913_v3 = vmul.f32 0.01, %v1665_v59  ;;  %vm1851_vm15 = vcmp.ge.f32.partialorder %v1778_v52, 0.0  ;;  %v1915_v41 = vmul.f32 0.01, %v1778_v52  ;;  %v1670_v53 = vpop.f32.mrf.mxu0  ;;  %v1783_v37 = vpop.f32.mrf.mxu1 }
 0x200   : > { %v1671_v4 = vadd.f32 %v1670_v53, %v4517_v15  ;;  %v1784_v22 = vadd.f32 %v1783_v37, %v4521_v24  ;;  %v1974_v13 = vsel %vm1846_vm9, %v1772_v44, %v1910_v43  ;;  %vm1852_vm0 = vcmp.ge.f32.partialorder %v1669_v54, 0.0 }
 0x201   : > { %v1977_v21 = vsel %vm1849_vm14, %v1665_v59, %v1913_v3  ;;  %v1979_v30 = vsel %vm1851_vm15, %v1778_v52, %v1915_v41  ;;  %v1672_v45 = vpop.f32.mrf.mxu0  ;;  %v1785_v10 = vpop.f32.mrf.mxu1  ;;  %v1916_v58 = vmul.f32 0.01, %v1669_v54  ;;  %v2024_v23 = vpack.c.bf16 %v1976_v16, %v1972_v19 }
 0x202   : > { %v2026_v9 = vpack.c.bf16 %v1978_v8, %v1974_v13  ;;  %v1673_v36 = vadd.f32 %v1672_v45, %v4509_v48  ;;  %v1786_v25 = vadd.f32 %v1785_v10, %v4513_v50  ;;  %v2025_v35 = vpack.c.bf16 %v1977_v21, %v1973_v11 }
 0x203   : > { %v1674_v40 = vpop.f32.mrf.mxu0  ;;  %v1787_v12 = vpop.f32.mrf.mxu1  ;;  %v2027_v38 = vpack.c.bf16 %v1979_v30, %v1975_v51  ;;  %vm1853_vm1 = vcmp.ge.f32.partialorder %v1671_v4, 0.0  ;;  %v1917_v7 = vmul.f32 0.01, %v1671_v4  ;;  %vm1855_vm2 = vcmp.ge.f32.partialorder %v1784_v22, 0.0 }
 0x204   : > { %v1675_v32 = vadd.f32 %v1674_v40, %v4517_v15  ;;  %v1788_v20 = vadd.f32 %v1787_v12, %v4521_v24  ;;  %v1919_v62 = vmul.f32 0.01, %v1784_v22  ;;  %vm1856_vm3 = vcmp.ge.f32.partialorder %v1673_v36, 0.0  ;;  %2363 = vmatprep.mubr.bf16.mxu0 %v2025_v35 }
 0x205   : > { %v1920_v55 = vmul.f32 0.01, %v1673_v36  ;;  %2460 = vmatprep.mubr.bf16.mxu1 %v2027_v38  ;;  %2364 = vmatmul.mubr.bf16.gmra.mxu0 %v2024_v23  ;;  %v1918_v18 = vmul.f32 0.01, %v4611_v26  ;;  %vm1858_vm6 = vcmp.ge.f32.partialorder %v1786_v25, 0.0  ;;  %vm1854_vm7 = vcmp.ge.f32.partialorder %v4611_v26, 0.0 }
 0x206   : > { %vm1857_vm4 = vcmp.ge.f32.partialorder %v1675_v32, 0.0  ;;  %v1921_v44 = vmul.f32 0.01, %v1675_v32  ;;  %vm1859_vm5 = vcmp.ge.f32.partialorder %v1788_v20, 0.0  ;;  %v1923_v49 = vmul.f32 0.01, %v1788_v20  ;;  %2461 = vmatmul.mubr.bf16.gmra.mxu1 %v2026_v9 }
 0x207   : > { %v1678_v42 = vpop.f32.mrf.mxu0  ;;  %v1791_v46 = vpop.f32.mrf.mxu1  ;;  %v1922_v39 = vmul.f32 0.01, %v1786_v25  ;;  %v1984_v33 = vsel %vm1856_vm3, %v1673_v36, %v1920_v55  ;;  %v1981_v27 = vsel %vm1853_vm1, %v1671_v4, %v1917_v7  ;;  %v1983_v47 = vsel %vm1855_vm2, %v1784_v22, %v1919_v62 }
 0x208   : > { %v1679_v60 = vadd.f32 %v1678_v42, %v4509_v48  ;;  %v1792_v31 = vadd.f32 %v1791_v46, %v4513_v50  ;;  %v1985_v17 = vsel %vm1857_vm4, %v1675_v32, %v1921_v44  ;;  %v1987_v34 = vsel %vm1859_vm5, %v1788_v20, %v1923_v49 }
 0x209   : > { %v1680_v6 = vpop.f32.mrf.mxu0  ;;  %v1793_v14 = vpop.f32.mrf.mxu1  ;;  %v1980_v28 = vsel %vm1852_vm0, %v1669_v54, %v1916_v58  ;;  %v2029_v5 = vpack.c.bf16 %v1985_v17, %v1981_v27  ;;  %v2031_v2 = vpack.c.bf16 %v1987_v34, %v1983_v47  ;;  %v1986_v57 = vsel %vm1858_vm6, %v1786_v25, %v1922_v39 }
 0x20a   : > { %v1681_v29 = vadd.f32 %v1680_v6, %v4517_v15  ;;  %v1794_v63 = vadd.f32 %v1793_v14, %v4521_v24  ;;  %v2028_v43 = vpack.c.bf16 %v1984_v33, %v1980_v28  ;;  %vm1860_vm8 = vcmp.ge.f32.partialorder %v1679_v60, 0.0 }
 0x20b   : > { %v1682_v0 = vpop.f32.mrf.mxu0  ;;  %v1795_v56 = vpop.f32.mrf.mxu1  ;;  %v1924_v1 = vmul.f32 0.01, %v1679_v60  ;;  %vm1862_vm9 = vcmp.ge.f32.partialorder %v1792_v31, 0.0  ;;  %2371 = vmatprep.mubr.bf16.mxu0 %v2029_v5  ;;  %2468 = vmatprep.mubr.bf16.mxu1 %v2031_v2  ;;  %v1982_v41 = vsel %vm1854_vm7, %v4611_v26, %v1918_v18  ;;  %v1926_v54 = vmul.f32 0.01, %v1792_v31 }
 0x20c   : > { %v1683_v59 = vadd.f32 %v1682_v0, %v4509_v48  ;;  %v1796_v52 = vadd.f32 %v1795_v56, %v4513_v50  ;;  %vm1861_vm10 = vcmp.ge.f32.partialorder %v1681_v29, 0.0  ;;  %v1925_v53 = vmul.f32 0.01, %v1681_v29 }
 0x20d   : > { %v1684_v61 = vpop.f32.mrf.mxu0  ;;  %v1797_v3 = vpop.f32.mrf.mxu1  ;;  %vm1863_vm11 = vcmp.ge.f32.partialorder %v1794_v63, 0.0  ;;  %2372 = vmatmul.mubr.bf16.gmra.mxu0 %v2028_v43  ;;  %v2030_v8 = vpack.c.bf16 %v1986_v57, %v1982_v41  ;;  %v1927_v4 = vmul.f32 0.01, %v1794_v63  ;;  %v1988_v45 = vsel %vm1860_vm8, %v1679_v60, %v1924_v1 }
 0x20e   : > { %v1928_v37 = vmul.f32 0.01, %v1683_v59  ;;  %v1685_v19 = vadd.f32 %v1684_v61, %v4517_v15  ;;  %v1798_v16 = vadd.f32 %v1797_v3, %v4521_v24  ;;  %vm1864_vm12 = vcmp.ge.f32.partialorder %v1683_v59, 0.0 }
 0x20f   : > { %vm1866_vm13 = vcmp.ge.f32.partialorder %v1796_v52, 0.0  ;;  %v1930_v11 = vmul.f32 0.01, %v1796_v52  ;;  %2469 = vmatmul.mubr.bf16.gmra.mxu1 %v2030_v8  ;;  %v1989_v36 = vsel %vm1861_vm10, %v1681_v29, %v1925_v53  ;;  %v1991_v25 = vsel %vm1863_vm11, %v1794_v63, %v1927_v4 }
 0x210   : > { %vm1865_vm14 = vcmp.ge.f32.partialorder %v1685_v19, 0.0  ;;  %v1929_v21 = vmul.f32 0.01, %v1685_v19  ;;  %vm1867_vm15 = vcmp.ge.f32.partialorder %v1798_v16, 0.0  ;;  %v1931_v30 = vmul.f32 0.01, %v1798_v16 }
 0x211   : > { %v1688_v26 = vpop.f32.mrf.mxu0  ;;  %v1801_v22 = vpop.f32.mrf.mxu1  ;;  %v1992_v9 = vsel %vm1864_vm12, %v1683_v59, %v1928_v37  ;;  %v1990_v40 = vsel %vm1862_vm9, %v1792_v31, %v1926_v54  ;;  %v1994_v12 = vsel %vm1866_vm13, %v1796_v52, %v1930_v11 }
 0x212   : > { %v1689_v10 = vadd.f32 %v1688_v26, %v4509_v48  ;;  %v1993_v58 = vsel %vm1865_vm14, %v1685_v19, %v1929_v21  ;;  %v1995_v23 = vsel %vm1867_vm15, %v1798_v16, %v1931_v30  ;;  %v1802_v55 = vadd.f32 %v1801_v22, %v4513_v50 }
 0x213   : > { %v1690_v51 = vpop.f32.mrf.mxu0  ;;  %v1803_v13 = vpop.f32.mrf.mxu1  ;;  %v2033_v20 = vpack.c.bf16 %v1993_v58, %v1989_v36  ;;  %v2035_v62 = vpack.c.bf16 %v1995_v23, %v1991_v25  ;;  %v2032_v42 = vpack.c.bf16 %v1992_v9, %v1988_v45  ;;  %v2034_v31 = vpack.c.bf16 %v1994_v12, %v1990_v40 }
 0x214   : > { %v1691_v35 = vadd.f32 %v1690_v51, %v4517_v15  ;;  %v1804_v38 = vadd.f32 %v1803_v13, %v4521_v24  ;;  %vm1868_vm0 = vcmp.ge.f32.partialorder %v1689_v10, 0.0  ;;  %v1932_v46 = vmul.f32 0.01, %v1689_v10 }
 0x215   : > { %v1692_v7 = vpop.f32.mrf.mxu0  ;;  %v1805_v32 = vpop.f32.mrf.mxu1  ;;  %2379 = vmatprep.mubr.bf16.mxu0 %v2033_v20  ;;  %2476 = vmatprep.mubr.bf16.mxu1 %v2035_v62  ;;  %vm1870_vm3 = vcmp.ge.f32.partialorder %v1802_v55, 0.0  ;;  %v1934_v27 = vmul.f32 0.01, %v1802_v55 }
 0x216   : > { %v1693_v44 = vadd.f32 %v1692_v7, %v4509_v48  ;;  %v1806_v49 = vadd.f32 %v1805_v32, %v4513_v50  ;;  %v1933_v18 = vmul.f32 0.01, %v1691_v35  ;;  %v1935_v6 = vmul.f32 0.01, %v1804_v38  ;;  %2380 = vmatmul.mubr.bf16.gmra.mxu0 %v2032_v42  ;;  %v4669_v42 = vld [vmem:[%s4790_s8] ss:$0 sm:$0xff] }
 0x217   : > { %v1694_v39 = vpop.f32.mrf.mxu0  ;;  %v1807_v60 = vpop.f32.mrf.mxu1  ;;  %2477 = vmatmul.mubr.bf16.gmra.mxu1 %v2034_v31  ;;  %vm1869_vm4 = vcmp.ge.f32.partialorder %v1691_v35, 0.0  ;;  %vm1871_vm5 = vcmp.ge.f32.partialorder %v1804_v38, 0.0  ;;  %v1996_v0 = vsel %vm1868_vm0, %v1689_v10, %v1932_v46  ;;  %v1998_v54 = vsel %vm1870_vm3, %v1802_v55, %v1934_v27 }
 0x218   : > { %v1936_v14 = vmul.f32 0.01, %v1693_v44  ;;  %v1938_v17 = vmul.f32 0.01, %v1806_v49  ;;  %vm1872_vm1 = vcmp.ge.f32.partialorder %v1693_v44, 0.0  ;;  %vm1874_vm2 = vcmp.ge.f32.partialorder %v1806_v49, 0.0 }
 0x219   : > { %v1695_v34 = vadd.f32 %v1694_v39, %v4517_v15  ;;  %v1808_v33 = vadd.f32 %v1807_v60, %v4521_v24  ;;  %v1997_v2 = vsel %vm1869_vm4, %v1691_v35, %v1933_v18  ;;  %v1999_v52 = vsel %vm1871_vm5, %v1804_v38, %v1935_v6 }
 0x21a   : > { %v1698_v29 = vpop.f32.mrf.mxu0  ;;  %v1811_v63 = vpop.f32.mrf.mxu1  ;;  %v2000_v56 = vsel %vm1872_vm1, %v1693_v44, %v1936_v14  ;;  %v2002_v5 = vsel %vm1874_vm2, %v1806_v49, %v1938_v17 }
 0x21b   : > { %vm1873_vm6 = vcmp.ge.f32.partialorder %v1695_v34, 0.0  ;;  %v1937_v47 = vmul.f32 0.01, %v1695_v34  ;;  %vm1875_vm7 = vcmp.ge.f32.partialorder %v1808_v33, 0.0  ;;  %v1939_v28 = vmul.f32 0.01, %v1808_v33 }
 0x21c   : > { %v1699_v57 = vadd.f32 %v1698_v29, %v4509_v48  ;;  %v1700_v1 = vpop.f32.mrf.mxu0  ;;  %v1813_v61 = vpop.f32.mrf.mxu1  ;;  %v2036_v53 = vpack.c.bf16 %v2000_v56, %v1996_v0  ;;  %v2038_v37 = vpack.c.bf16 %v2002_v5, %v1998_v54  ;;  %v1812_v11 = vadd.f32 %v1811_v63, %v4513_v50 }
 0x21d   : > { %v2001_v59 = vsel %vm1873_vm6, %v1695_v34, %v1937_v47  ;;  %v2003_v43 = vsel %vm1875_vm7, %v1808_v33, %v1939_v28  ;;  %v1701_v19 = vadd.f32 %v1700_v1, %v4517_v15  ;;  %v1814_v16 = vadd.f32 %v1813_v61, %v4521_v24  ;;  %v3247_v28 = vld [vmem:[%s3567_s29 + $0x19] sm:$0xff] }
 0x21e   : > { %v2037_v3 = vpack.c.bf16 %v2001_v59, %v1997_v2  ;;  %v2039_v41 = vpack.c.bf16 %v2003_v43, %v1999_v52  ;;  %v1702_v8 = vpop.f32.mrf.mxu0  ;;  %v1815_v4 = vpop.f32.mrf.mxu1  ;;  %vm1876_vm8 = vcmp.ge.f32.partialorder %v1699_v57, 0.0  ;;  %v1940_v26 = vmul.f32 0.01, %v1699_v57 }
 0x21f   : > { %v1703_v21 = vadd.f32 %v1702_v8, %v4509_v48  ;;  %v1816_v30 = vadd.f32 %v1815_v4, %v4513_v50  ;;  %v1941_v22 = vmul.f32 0.01, %v1701_v19  ;;  %v1943_v51 = vmul.f32 0.01, %v1814_v16  ;;  %v3249_v8 = vld [vmem:[%s3567_s29 + $0x31] sm:$0xff] }
 0x220   : > { %2387 = vmatprep.mubr.bf16.mxu0 %v2037_v3  ;;  %2484 = vmatprep.mubr.bf16.mxu1 %v2039_v41  ;;  %v1704_v45 = vpop.f32.mrf.mxu0  ;;  %v1817_v10 = vpop.f32.mrf.mxu1  ;;  %vm1878_vm11 = vcmp.ge.f32.partialorder %v1812_v11, 0.0  ;;  %v1942_v48 = vmul.f32 0.01, %v1812_v11  ;;  %vm1877_vm12 = vcmp.ge.f32.partialorder %v1701_v19, 0.0  ;;  %vm1879_vm13 = vcmp.ge.f32.partialorder %v1814_v16, 0.0 }
 0x221   : > { %2388 = vmatmul.mubr.bf16.gmra.mxu0 %v2036_v53  ;;  %2485 = vmatmul.mubr.bf16.gmra.mxu1 %v2038_v37  ;;  %v1944_v13 = vmul.f32 0.01, %v1703_v21  ;;  %v1946_v58 = vmul.f32 0.01, %v1816_v30  ;;  %vm1880_vm9 = vcmp.ge.f32.partialorder %v1703_v21, 0.0  ;;  %vm1882_vm10 = vcmp.ge.f32.partialorder %v1816_v30, 0.0 }
 0x222   : > { %v1705_v23 = vadd.f32 %v1704_v45, %v4517_v15  ;;  %v1818_v9 = vadd.f32 %v1817_v10, %v4521_v24  ;;  %v2005_v12 = vsel %vm1877_vm12, %v1701_v19, %v1941_v22  ;;  %v2007_v38 = vsel %vm1879_vm13, %v1814_v16, %v1943_v51 }
 0x223   : > { %v2008_v25 = vsel %vm1880_vm9, %v1703_v21, %v1944_v13  ;;  %v2010_v40 = vsel %vm1882_vm10, %v1816_v30, %v1946_v58  ;;  %v2004_v15 = vsel %vm1876_vm8, %v1699_v57, %v1940_v26  ;;  %v2006_v24 = vsel %vm1878_vm11, %v1812_v11, %v1942_v48  ;;  %v3248_v57 = vld [vmem:[%s3567_s29 + $0x21] sm:$0xff]  ;;  %v3250_v13 = vld [vmem:[%s3567_s29 + $0x39] sm:$0xff] }
 0x224   : > { %vm1881_vm14 = vcmp.ge.f32.partialorder %v1705_v23, 0.0  ;;  %v1945_v50 = vmul.f32 0.01, %v1705_v23  ;;  %vm1883_vm15 = vcmp.ge.f32.partialorder %v1818_v9, 0.0  ;;  %v1947_v36 = vmul.f32 0.01, %v1818_v9 }
 0x225   : > { %v2040_v62 = vpack.c.bf16 %v2008_v25, %v2004_v15  ;;  %v2042_v55 = vpack.c.bf16 %v2010_v40, %v2006_v24 }
 0x226   : > { %v2009_v35 = vsel %vm1881_vm14, %v1705_v23, %v1945_v50  ;;  %v2011_v7 = vsel %vm1883_vm15, %v1818_v9, %v1947_v36 }
 0x227   : > { %v2041_v32 = vpack.c.bf16 %v2009_v35, %v2005_v12  ;;  %v2043_v20 = vpack.c.bf16 %v2011_v7, %v2007_v38  ;;  %v3251_v12 = vld [vmem:[%s3567_s29 + $0x49] sm:$0xff] }
 0x229   : > { %2395 = vmatprep.mubr.bf16.mxu0 %v2041_v32  ;;  %2492 = vmatprep.mubr.bf16.mxu1 %v2043_v20 }
 0x22a   : > { %2396 = vmatmul.mubr.bf16.gmra.mxu0 %v2040_v62  ;;  %2493 = vmatmul.mubr.bf16.gmra.mxu1 %v2042_v55  ;;  %v3252_v55 = vld [vmem:[%s3567_s29 + $0x51] sm:$0xff] }
 0x2ac   : > { %v2948_v44 = vpop.f32.mrf.mxu0  ;;  %v3012_v49 = vpop.f32.mrf.mxu1 }
 0x2ae   : > { %v2949_v46 = vpop.f32.mrf.mxu0  ;;  %v3013_v18 = vpop.f32.mrf.mxu1 }
 0x2af   : > { %v2950_v39 = vadd.f32 %v2949_v46, %v2948_v44  ;;  %v3014_v14 = vadd.f32 %v3013_v18, %v3012_v49 }
 0x2b0   : > { %v2951_v60 = vpop.f32.mrf.mxu0  ;;  %v3015_v31 = vpop.f32.mrf.mxu1 }
 0x2b1   : > { %v2342_v6 = vadd.f32 %v2950_v39, %v4669_v42 }
 0x2b2   : > { %v2952_v17 = vpop.f32.mrf.mxu0  ;;  %v3016_v34 = vpop.f32.mrf.mxu1 }
 0x2b3   : > { %v2439_v33 = vadd.f32 %v3014_v14, %v2342_v6  ;;  %v2953_v27 = vadd.f32 %v2952_v17, %v2951_v60  ;;  %v3017_v0 = vadd.f32 %v3016_v34, %v3015_v31 }
 0x2b4   : > { %v2954_v47 = vpop.f32.mrf.mxu0 }
 0x2b5   : > { %v2501_v29 = vadd.f32 %v3247_v28, %v2439_v33  ;;  %v2345_v63 = vadd.f32 %v2953_v27, %v4669_v42  ;;  %v3253_v33 = vld [vmem:[%s3567_s29 + $0x61] sm:$0xff] }
 0x2b6   : > { %v3018_v56 = vpop.f32.mrf.mxu1  ;;  %v2955_v5 = vpop.f32.mrf.mxu0 }
 0x2b7   : > { %2517 = vst [vmem:[%s3492_s24] sm:$0xff] %v2501_v29  ;;  %v2442_v2 = vadd.f32 %v3017_v0, %v2345_v63  ;;  %v2956_v59 = vadd.f32 %v2955_v5, %v2954_v47 }
 0x2b8   : > { %v3019_v52 = vpop.f32.mrf.mxu1  ;;  %v2957_v43 = vpop.f32.mrf.mxu0 }
 0x2b9   : > { %v2502_v1 = vadd.f32 %v3248_v57, %v2442_v2  ;;  %v2350_v61 = vadd.f32 %v2956_v59, %v4669_v42  ;;  %v3020_v3 = vadd.f32 %v3019_v52, %v3018_v56  ;;  %v3254_v59 = vld [vmem:[%s3567_s29 + $0x69] sm:$0xff] }
 0x2ba   : > { %v3021_v41 = vpop.f32.mrf.mxu1  ;;  %v2958_v54 = vpop.f32.mrf.mxu0 }
 0x2bb   : > { %2518 = vst [vmem:[%s3492_s24 + $0x8] sm:$0xff] %v2502_v1  ;;  %v2447_v53 = vadd.f32 %v3020_v3, %v2350_v61  ;;  %v2959_v37 = vadd.f32 %v2958_v54, %v2957_v43 }
 0x2bc   : > { %v3022_v19 = vpop.f32.mrf.mxu1  ;;  %v2960_v16 = vpop.f32.mrf.mxu0 }
 0x2bd   : > { %v2503_v4 = vadd.f32 %v3249_v8, %v2447_v53  ;;  %v2353_v11 = vadd.f32 %v2959_v37, %v4669_v42  ;;  %v3023_v21 = vadd.f32 %v3022_v19, %v3021_v41  ;;  %v3255_v53 = vld [vmem:[%s3567_s29 + $0x79] sm:$0xff] }
 0x2be   : > { %v3024_v30 = vpop.f32.mrf.mxu1  ;;  %v2961_v26 = vpop.f32.mrf.mxu0 }
 0x2bf   : > { %2519 = vst [vmem:[%s3492_s24 + $0x10] sm:$0xff] %v2503_v4  ;;  %v2450_v22 = vadd.f32 %v3023_v21, %v2353_v11  ;;  %v2962_v45 = vadd.f32 %v2961_v26, %v2960_v16 }
 0x2c0   : > { %v3025_v10 = vpop.f32.mrf.mxu1  ;;  %v2963_v51 = vpop.f32.mrf.mxu0 }
 0x2c1   : > { %v2504_v58 = vadd.f32 %v3250_v13, %v2450_v22  ;;  %v2358_v23 = vadd.f32 %v2962_v45, %v4669_v42  ;;  %v3026_v9 = vadd.f32 %v3025_v10, %v3024_v30  ;;  %v3256_v22 = vld [vmem:[%s3567_s29 + $0x81] sm:$0xff] }
 0x2c2   : > { %v3027_v48 = vpop.f32.mrf.mxu1  ;;  %v2964_v50 = vpop.f32.mrf.mxu0 }
 0x2c3   : > { %2520 = vst [vmem:[%s3492_s24 + $0x18] sm:$0xff] %v2504_v58  ;;  %v2455_v36 = vadd.f32 %v3026_v9, %v2358_v23  ;;  %v2965_v25 = vadd.f32 %v2964_v50, %v2963_v51 }
 0x2c4   : > { %v3028_v40 = vpop.f32.mrf.mxu1 }
 0x2c5   : > { %v2505_v35 = vadd.f32 %v3251_v12, %v2455_v36  ;;  %v2361_v38 = vadd.f32 %v2965_v25, %v4669_v42  ;;  %v3029_v7 = vadd.f32 %v3028_v40, %v3027_v48  ;;  %v2966_v32 = vpop.f32.mrf.mxu0  ;;  %v3257_v36 = vld [vmem:[%s3567_s29 + $0x91] sm:$0xff] }
 0x2c6   : > { %v3030_v20 = vpop.f32.mrf.mxu1 }
 0x2c7   : > { %2521 = vst [vmem:[%s3492_s24 + $0x20] sm:$0xff] %v2505_v35  ;;  %v2458_v15 = vadd.f32 %v3029_v7, %v2361_v38  ;;  %v2967_v24 = vpop.f32.mrf.mxu0 }
 0x2c8   : > { %v3031_v62 = vpop.f32.mrf.mxu1  ;;  %v2968_v49 = vadd.f32 %v2967_v24, %v2966_v32  ;;  %v3258_v24 = vld [vmem:[%s3567_s29 + $0x99] sm:$0xff] }
 0x2c9   : > { %v2506_v44 = vadd.f32 %v3252_v55, %v2458_v15  ;;  %v2969_v46 = vpop.f32.mrf.mxu0  ;;  %v3032_v60 = vadd.f32 %v3031_v62, %v3030_v20 }
 0x2ca   : > { %v3033_v18 = vpop.f32.mrf.mxu1  ;;  %v2366_v39 = vadd.f32 %v2968_v49, %v4669_v42 }
 0x2cb   : > { %2522 = vst [vmem:[%s3492_s24 + $0x28] sm:$0xff] %v2506_v44  ;;  %v2970_v31 = vpop.f32.mrf.mxu0 }
 0x2cc   : > { %v3034_v6 = vpop.f32.mrf.mxu1  ;;  %v2463_v14 = vadd.f32 %v3032_v60, %v2366_v39  ;;  %v2971_v17 = vadd.f32 %v2970_v31, %v2969_v46 }
 0x2cd   : > { %v2972_v34 = vpop.f32.mrf.mxu0  ;;  %v3035_v28 = vadd.f32 %v3034_v6, %v3033_v18  ;;  %v3259_v6 = vld [vmem:[%s3567_s29 + $0xa9] sm:$0xff] }
 0x2ce   : > { %v2507_v27 = vadd.f32 %v3253_v33, %v2463_v14  ;;  %v2369_v47 = vadd.f32 %v2971_v17, %v4669_v42 }
 0x2cf   : > { %v3036_v29 = vpop.f32.mrf.mxu1  ;;  %v2973_v63 = vpop.f32.mrf.mxu0 }
 0x2d0   : > { %2523 = vst [vmem:[%s3492_s24 + $0x30] sm:$0xff] %v2507_v27  ;;  %v2466_v0 = vadd.f32 %v3035_v28, %v2369_v47  ;;  %v2974_v56 = vadd.f32 %v2973_v63, %v2972_v34  ;;  %v3260_v28 = vld [vmem:[%s3567_s29 + $0xb1] sm:$0xff] }
 0x2d1   : > { %v3037_v5 = vpop.f32.mrf.mxu1  ;;  %v2975_v2 = vpop.f32.mrf.mxu0 }
 0x2d2   : > { %v2508_v52 = vadd.f32 %v3254_v59, %v2466_v0  ;;  %v2374_v43 = vadd.f32 %v2974_v56, %v4669_v42  ;;  %v3038_v57 = vadd.f32 %v3037_v5, %v3036_v29 }
 0x2d3   : > { %v3039_v1 = vpop.f32.mrf.mxu1  ;;  %v2976_v61 = vpop.f32.mrf.mxu0 }
 0x2d4   : > { %2524 = vst [vmem:[%s3492_s24 + $0x38] sm:$0xff] %v2508_v52  ;;  %v2471_v3 = vadd.f32 %v3038_v57, %v2374_v43  ;;  %v2977_v41 = vadd.f32 %v2976_v61, %v2975_v2 }
 0x2d5   : > { %v3040_v54 = vpop.f32.mrf.mxu1 }
 0x2d6   : > { %v2509_v37 = vadd.f32 %v3255_v53, %v2471_v3  ;;  %v2377_v19 = vadd.f32 %v2977_v41, %v4669_v42  ;;  %v3041_v16 = vadd.f32 %v3040_v54, %v3039_v1  ;;  %v2978_v8 = vpop.f32.mrf.mxu0  ;;  %v3261_v3 = vld [vmem:[%s3567_s29 + $0xc1] sm:$0xff] }
 0x2d7   : > { %v3042_v4 = vpop.f32.mrf.mxu1 }
 0x2d8   : > { %2525 = vst [vmem:[%s3492_s24 + $0x40] sm:$0xff] %v2509_v37  ;;  %v2474_v11 = vadd.f32 %v3041_v16, %v2377_v19  ;;  %v2979_v21 = vpop.f32.mrf.mxu0  ;;  %v3262_v19 = vld [vmem:[%s3567_s29 + $0xc9] sm:$0xff] }
 0x2d9   : > { %v2980_v30 = vadd.f32 %v2979_v21, %v2978_v8  ;;  %v3043_v26 = vpop.f32.mrf.mxu1 }
 0x2da   : > { %v2510_v45 = vadd.f32 %v3256_v22, %v2474_v11  ;;  %v2981_v10 = vpop.f32.mrf.mxu0  ;;  %v3044_v13 = vadd.f32 %v3043_v26, %v3042_v4 }
 0x2db   : > { %v2382_v51 = vadd.f32 %v2980_v30, %v4669_v42  ;;  %v3045_v58 = vpop.f32.mrf.mxu1 }
 0x2dc   : > { %2526 = vst [vmem:[%s3492_s24 + $0x48] sm:$0xff] %v2510_v45  ;;  %v2982_v23 = vpop.f32.mrf.mxu0 }
 0x2dd   : > { %v2479_v9 = vadd.f32 %v3044_v13, %v2382_v51  ;;  %v2983_v48 = vadd.f32 %v2982_v23, %v2981_v10  ;;  %v3046_v50 = vpop.f32.mrf.mxu1 }
 0x2de   : > { %v3047_v12 = vadd.f32 %v3046_v50, %v3045_v58 }
 0x2df   : > { %v2511_v25 = vadd.f32 %v3257_v36, %v2479_v9  ;;  %v2385_v40 = vadd.f32 %v2983_v48, %v4669_v42 }
 0x2e1   : > { %v2984_v35 = vpop.f32.mrf.mxu0  ;;  %v3048_v38 = vpop.f32.mrf.mxu1  ;;  %2527 = vst [vmem:[%s3492_s24 + $0x50] sm:$0xff] %v2511_v25  ;;  %v2482_v7 = vadd.f32 %v3047_v12, %v2385_v40 }
 0x2e3   : > { %v2985_v32 = vpop.f32.mrf.mxu0  ;;  %v3049_v20 = vpop.f32.mrf.mxu1  ;;  %v2512_v62 = vadd.f32 %v3258_v24, %v2482_v7 }
 0x2e4   : > { %v2986_v15 = vadd.f32 %v2985_v32, %v2984_v35  ;;  %v3050_v46 = vadd.f32 %v3049_v20, %v3048_v38 }
 0x2e5   : > { %v2987_v55 = vpop.f32.mrf.mxu0  ;;  %v3051_v44 = vpop.f32.mrf.mxu1  ;;  %2528 = vst [vmem:[%s3492_s24 + $0x58] sm:$0xff] %v2512_v62 }
 0x2e6   : > { %v2390_v49 = vadd.f32 %v2986_v15, %v4669_v42 }
 0x2e7   : > { %v2988_v18 = vpop.f32.mrf.mxu0  ;;  %v3052_v39 = vpop.f32.mrf.mxu1 }
 0x2e8   : > { %v2487_v60 = vadd.f32 %v3050_v46, %v2390_v49  ;;  %v2989_v31 = vadd.f32 %v2988_v18, %v2987_v55  ;;  %v3053_v34 = vadd.f32 %v3052_v39, %v3051_v44 }
 0x2ea   : > { %v2513_v14 = vadd.f32 %v3259_v6, %v2487_v60  ;;  %v2393_v17 = vadd.f32 %v2989_v31, %v4669_v42  ;;  %v2990_v27 = vpop.f32.mrf.mxu0  ;;  %v3054_v47 = vpop.f32.mrf.mxu1 }
 0x2ec   : > { %2529 = vst [vmem:[%s3492_s24 + $0x60] sm:$0xff] %v2513_v14  ;;  %v2490_v33 = vadd.f32 %v3053_v34, %v2393_v17  ;;  %v2991_v63 = vpop.f32.mrf.mxu0  ;;  %v3055_v0 = vpop.f32.mrf.mxu1 }
 0x2ed   : > { %v2992_v56 = vadd.f32 %v2991_v63, %v2990_v27  ;;  %v3056_v52 = vadd.f32 %v3055_v0, %v3054_v47 }
 0x2ee   : > { %v2514_v29 = vadd.f32 %v3260_v28, %v2490_v33  ;;  %v2993_v5 = vpop.f32.mrf.mxu0  ;;  %v3057_v2 = vpop.f32.mrf.mxu1 }
 0x2ef   : > { %v2398_v59 = vadd.f32 %v2992_v56, %v4669_v42 }
 0x2f0   : > { %2530 = vst [vmem:[%s3492_s24 + $0x68] sm:$0xff] %v2514_v29  ;;  %v2994_v43 = vpop.f32.mrf.mxu0  ;;  %v3058_v57 = vpop.f32.mrf.mxu1 }
 0x2f1   : > { %v2495_v1 = vadd.f32 %v3056_v52, %v2398_v59  ;;  %v2995_v61 = vadd.f32 %v2994_v43, %v2993_v5  ;;  %v3059_v53 = vadd.f32 %v3058_v57, %v3057_v2 }
 0x2f3   : > { %v2515_v41 = vadd.f32 %v3261_v3, %v2495_v1  ;;  %v2401_v54 = vadd.f32 %v2995_v61, %v4669_v42 }
 0x2f5   : > { %2531 = vst [vmem:[%s3492_s24 + $0x70] sm:$0xff] %v2515_v41  ;;  %v2498_v37 = vadd.f32 %v3059_v53, %v2401_v54 }
 0x2f7   : > { %v2516_v16 = vadd.f32 %v3262_v19, %v2498_v37 }
 0x2f9   : > { %2532 = vst [vmem:[%s3492_s24 + $0x78] sm:$0xff] %v2516_v16 }
 0x2fa   : > { %3276 = shalt.err (!%p3273_p10)
}
 0x2fb   : > { %s3277_s24 = scalar_lea.hbm %s4726_s20, 2048  ;;  %s3281_s21 = scalar_lea.hbm %s4791_s9, 8192 }
 0x2fc   : > { %p3278_p11 = scmp.ne.s32.totalorder %s4726_s20, %s3277_s24  ;;  %p3282_p0 = scmp.lt.s32.totalorder %s4726_s20, %s4791_s9 }
 0x2fd   : > { %p3283_p1 = scmp.lt.s32.totalorder %s3281_s21, %s3277_s24 }
 0x2fe   : > { %p3279_p12 = pnand %p3278_p11, %p3464_p3 }
 0x2ff   : > { %p3284_p2 = por %p3283_p1, %p3282_p0 }
 0x300   : > { %p3280_p13 = pneg %p3279_p12 }
 0x302   : > { %p3285_p4 = pnand %p3284_p2, %p3280_p13 }
 0x304   : > { %3288 = shalt.err (!%p3285_p4)
}
 0x305   : > { %s3361_s19 = smov 128   ;;  %s3362_s15 = smov 8  }
 0x306   : > { %3060 = dma.vmem_to_hbm [thread:$0]  (%p3464_p3), %s4720_s17, 2048, %s4726_s20, %s4731_s28, %s3361_s19, %s3361_s19, %s3362_s15  }
 0x307 PF: > { %p3066_p5 = scmp.ge.s32.totalorder %s3357_s16, 2  ;;  %s2565_s25 = sand.u32 1, %s3329_s30  }
 0x308   : > { %s2566_s14 = scalar_lea.sflag [#allocation5], %s2565_s25 }
 0x309   : > { %p3063_p6 = pnand %p3066_p5, %p3473_p8 }
 0x30b   : > { %p3064_p7 = pneg %p3063_p6 }
 0x30d   : > { %3324 = dma.done.wait (%p3064_p7), %s2566_s14, 2048  }
 0x30e   : > { %3326 = vsyncadd (%p3064_p7), %s2566_s14, 4294965248  ;;  %s22_s16 = sadd.s32 1, %s3357_s16   ;;  %s4805_s26 = sld [smem:[#allocation14_spill]] }
 0x30f   : > { %p19_p9 = scmp.ge.s32.totalorder %s22_s16, 6   ;;  %s4806_s12 = sld [smem:[#allocation10_spill]] }
 0x310   : > { %s4807_s13 = sld [smem:[#allocation11_spill]]  ;;  %s4810_s30 = smov %s3333_s10 }
 0x311   : > { %s4808_s14 = sld [smem:[#allocation12_spill]]  ;;  %s4811_s10 = smov %s3337_s11 }
 0x312   : > { %s4809_s15 = sld [smem:[#allocation13_spill]]  ;;  %21 = sbr.rel (!%p19_p9) target bundleno = 5 (0x5), region = 205 }
 0x314   : > { %s4812_s11 = smov %s4805_s26 }
 0x317   :  { %2571 = vsyncpa [#allocation5], 1 }
 0x318   :  { %2573 = vsyncpa [#allocation5 + $0x1], 1 }
 0x319   :  { %2574 = vsyncmov [#allocation3] }
 0x31c   :  { %s2575_s22 = vpop.sfrf %2574 }
 0x31d   :  { %p2929_p3 = scmp.ne.s32.totalorder %s2575_s22, 0 }
 0x31f   :  { %2579 = shalt.err (%p2929_p3)  }
 0x320   :  { %2581 = vsyncmov [#allocation3 + $0x1] }
 0x323   :  { %s2582_s23 = vpop.sfrf %2581 }
 0x324   :  { %p2930_p8 = scmp.ne.s32.totalorder %s2582_s23, 0 }
 0x326   :  { %2586 = shalt.err (%p2930_p8)  }

</bundles_post_ra>
